<compile_context>
chip_gen: v5e
topology: v5e:2x2
jax: 0.10.0
libtpu: 0.0.40
codegen_flags: <defaults>
</compile_context>

<pallas_src>
import jax
import jax.numpy as jnp
from jax.experimental import pallas as pl
from jax.experimental.pallas import tpu as pltpu

C_IN = 256
C_OUT = 73
C_PAD = 128          # lane-dense padded output channel count
KSIZE = 25
PAD = 12


def conv_affine_kernel(xp_ref, w_ref, bias_ref, o_ref):
    # xp_ref:   (B_BLK, Tp, C_IN)     bf16  padded, depooled input block
    # w_ref:    (KSIZE, C_IN, C_PAD)  bf16  std already folded in, zero-padded to 128 lanes
    # bias_ref: (1, C_PAD)            f32   bias*std + mean, zero-padded
    # o_ref:    (B_BLK, T, C_PAD)     f32
    b_blk, t, c_pad = o_ref.shape
    m = b_blk * t
    acc = jnp.zeros((m, c_pad), jnp.float32)
    # Conv1d as a sum of KSIZE shifted (B_BLK*T, Cin) @ (Cin, C_PAD) MXU matmuls.
    for k in range(KSIZE):
        x_k = xp_ref[:, pl.ds(k, t), :].reshape(m, C_IN)
        acc = acc + jnp.dot(x_k, w_ref[k], preferred_element_type=jnp.float32)
    acc = acc + bias_ref[...]
    o_ref[...] = acc.reshape(b_blk, t, c_pad).astype(o_ref.dtype)


def motion_decoder_conv(xp, w, bias, *, b_blk=None):
    """xp: (B, Tp, C_IN) bf16; w: (K, C_IN, C_PAD) bf16; bias: (1, C_PAD) f32.
    Returns (B, T, C_PAD) f32 (conv + folded affine)."""
    B, Tp, _ = xp.shape
    T = Tp - 2 * PAD
    if b_blk is None:
        b_blk = min(B, 8)
    n_blk = pl.cdiv(B, b_blk)
    Bp = n_blk * b_blk
    if Bp != B:                                  # pad batch to a multiple of the block
        xp = jnp.pad(xp, ((0, Bp - B), (0, 0), (0, 0)))

    flops = 2 * Bp * T * KSIZE * C_IN * C_PAD
    bytes_accessed = xp.size * 2 + w.size * 2 + bias.size * 4 + Bp * T * C_PAD * 4

    out = pl.pallas_call(
        conv_affine_kernel,
        out_shape=jax.ShapeDtypeStruct((Bp, T, C_PAD), jnp.float32),
        grid_spec=pltpu.PrefetchScalarGridSpec(
            num_scalar_prefetch=0,
            grid=(n_blk,),
            in_specs=[
                pl.BlockSpec((b_blk, Tp, C_IN), lambda i: (i, 0, 0)),
                pl.BlockSpec((KSIZE, C_IN, C_PAD), lambda i: (0, 0, 0)),  # resident weights
                pl.BlockSpec((1, C_PAD), lambda i: (0, 0)),
            ],
            out_specs=pl.BlockSpec((b_blk, T, C_PAD), lambda i: (i, 0, 0)),
        ),
        compiler_params=pltpu.CompilerParams(
            dimension_semantics=("parallel",)),
        cost_estimate=pl.CostEstimate(
            flops=flops, transcendentals=0, bytes_accessed=bytes_accessed),
    )(xp, w, bias)
    return out[:B]


def depool_channel_last(x_nlc, key):
    """Stochastic x2 upsample along time, channel-last.

    x_nlc: (B, L, C) -> (B, 2L, C); each x[b,l,c] lands at time 2l or 2l+1 (Bernoulli 0.5),
    the other slot is zero.  Matches MotionDecoder.depool semantics (different RNG stream).
    """
    B, L, C = x_nlc.shape
    mask = jax.random.bernoulli(key, 0.5, (B, L, C))
    zeros = jnp.zeros_like(x_nlc)
    even = jnp.where(mask, x_nlc, zeros)
    odd = jnp.where(mask, zeros, x_nlc)
    return jnp.stack([even, odd], axis=2).reshape(B, 2 * L, C)


def prepare_params(params):
    """Fold the (std, mean) affine into the conv weights/bias, zero-pad Cout 73->128, cast w to bf16."""
    w, bias, std, mean = params["w"], params["bias"], params["std"], params["mean"]
    w_f = w * std[None, :, :]                    # (K, Cin, 73) * (1, 1, 73)
    b_f = bias * std + mean                      # (1, 73)
    w_p = jnp.zeros((KSIZE, C_IN, C_PAD), jnp.float32).at[:, :, :C_OUT].set(w_f)
    b_p = jnp.zeros((1, C_PAD), jnp.float32).at[:, :C_OUT].set(b_f)
    return w_p.astype(jnp.bfloat16), b_p


def motion_decoder_forward(x, params, key):
    """x: (B, 256, L) NCL (PyTorch convention).  Returns (B, 73, 2L) NCL."""
    x_nlc = jnp.transpose(x, (0, 2, 1)).astype(jnp.bfloat16)   # (B, L, 256), before depool
    xd = depool_channel_last(x_nlc, key)                       # (B, 2L, 256)
    xp = jnp.pad(xd, ((0, 0), (PAD, PAD), (0, 0)))             # (B, 2L+24, 256)
    w_p, b_p = prepare_params(params)
    y = motion_decoder_conv(xp, w_p, b_p)                      # (B, 2L, 128) f32
    y = y[:, :, :C_OUT]                                        # (B, 2L, 73)
    return jnp.transpose(y, (0, 2, 1))                         # (B, 73, 2L)


def reference_from_padded(xp_bf16, w_bf16, bias_f32):
    """Pure-JAX f32 reference for the in-kernel math, built from the same bf16 operands."""
    xpf = xp_bf16.astype(jnp.float32)
    wf = w_bf16.astype(jnp.float32)
    B, Tp, _ = xpf.shape
    T = Tp - 2 * PAD
    acc = jnp.zeros((B, T, wf.shape[-1]), jnp.float32)
    for k in range(KSIZE):
        acc = acc + jnp.einsum(
            "btc,co->bto", xpf[:, k:k + T, :], wf[k],
            precision=jax.lax.Precision.HIGHEST)
    return acc + bias_f32[None]


def init_params(key):
    kw, kb, ks, km = jax.random.split(key, 4)
    # PyTorch Conv1d weight is (Cout, Cin, K); stored here pre-transposed as (K, Cin, Cout).
    w = 0.02 * jax.random.normal(kw, (KSIZE, C_IN, C_OUT), jnp.float32)
    bias = 0.01 * jax.random.normal(kb, (1, C_OUT), jnp.float32)
    # Module __init__ uses zeros/ones; use nontrivial deterministic values to exercise the path.
    std = 1.0 + 0.1 * jax.random.normal(ks, (1, C_OUT), jnp.float32)
    mean = 0.1 * jax.random.normal(km, (1, C_OUT), jnp.float32)
    return {"w": w, "bias": bias, "std": std, "mean": mean}


if __name__ == "__main__":
    key = jax.random.PRNGKey(0)
    k_x, k_mask, k_param = jax.random.split(key, 3)

    B, L = 2, 8                                              # small: batch=2, seq=8
    x = jax.random.normal(k_x, (B, C_IN, L), jnp.float32)    # (2, 256, 8) NCL
    params = init_params(k_param)

    out = motion_decoder_forward(x, params, k_mask)          # (2, 73, 16)
    out = jax.block_until_ready(out)
    assert out.shape == (B, C_OUT, 2 * L), out.shape

    # Correctness check of the kernel math against a pure-JAX reference using the
    # identical bf16 operands (folding the affine into w/b is exact algebra).
    x_nlc = jnp.transpose(x, (0, 2, 1)).astype(jnp.bfloat16)
    xd = depool_channel_last(x_nlc, k_mask)
    xp = jnp.pad(xd, ((0, 0), (PAD, PAD), (0, 0)))
    w_p, b_p = prepare_params(params)
    ref = reference_from_padded(xp, w_p, b_p)                # (B, 2L, 128)
    ref = jnp.transpose(ref[:, :, :C_OUT], (0, 2, 1))        # (B, 73, 2L)
    assert jnp.allclose(out, ref, atol=1e-3, rtol=1e-3), float(jnp.max(jnp.abs(out - ref)))

    print("KERNEL_OK")
</pallas_src>

<mosaic_0001>
module attributes {stable_mosaic.version = 11 : i64} {
  func.func @conv_affine_kernel(%arg0: i32, %arg1: memref<2x40x256xbf16, #tpu.memory_space<vmem>>, %arg2: memref<25x256x128xbf16, #tpu.memory_space<vmem>>, %arg3: memref<1x128xf32, #tpu.memory_space<vmem>>, %arg4: memref<2x16x128xf32, #tpu.memory_space<vmem>>) attributes {dimension_semantics = [#tpu.dimension_semantics<parallel>], iteration_bounds = array<i64: 1>, scalar_prefetch = 0 : i64, scratch_operands = 0 : i64, tpu.core_type = #tpu.core_type<tc>, window_params = [{transform_indices = @transform_0, window_bounds = array<i64: 2, 40, 256>}, {pipeline_mode = #tpu.pipeline_mode<synchronous>, transform_indices = @transform_1, window_bounds = array<i64: 25, 256, 128>}, {pipeline_mode = #tpu.pipeline_mode<synchronous>, transform_indices = @transform_2, window_bounds = array<i64: 1, 128>}, {transform_indices = @transform_3, window_bounds = array<i64: 2, 16, 128>}]} {
    %cst = arith.constant 0.000000e+00 : f32
    %0 = vector.broadcast %cst : f32 to vector<32x128xf32>
    %c0 = arith.constant 0 : index
    %c0_0 = arith.constant 0 : index
    %c0_1 = arith.constant 0 : index
    %1 = vector.load %arg1[%c0, %c0_0, %c0_1] : memref<2x40x256xbf16, #tpu.memory_space<vmem>>, vector<2x16x256xbf16>
    %2 = vector.shape_cast %1 : vector<2x16x256xbf16> to vector<32x256xbf16>
    %c0_2 = arith.constant 0 : index
    %c0_3 = arith.constant 0 : index
    %c0_4 = arith.constant 0 : index
    %3 = vector.load %arg2[%c0_2, %c0_3, %c0_4] : memref<25x256x128xbf16, #tpu.memory_space<vmem>>, vector<1x256x128xbf16>
    %4 = vector.shape_cast %3 : vector<1x256x128xbf16> to vector<256x128xbf16>
    %cst_5 = arith.constant dense<0.000000e+00> : vector<32x128xf32>
    %5 = tpu.matmul %2, %4, %cst_5 {dimension_numbers = #tpu.dot_dimension_numbers<[1], [0], [0], [1], [0, 0, 1, 1], [], []>} : vector<32x256xbf16>, vector<256x128xbf16>, vector<32x128xf32> -> vector<32x128xf32>
    %6 = arith.addf %0, %5 : vector<32x128xf32>
    %c0_6 = arith.constant 0 : index
    %c1 = arith.constant 1 : index
    %c0_7 = arith.constant 0 : index
    %7 = vector.load %arg1[%c0_6, %c1, %c0_7] : memref<2x40x256xbf16, #tpu.memory_space<vmem>>, vector<2x16x256xbf16>
    %8 = vector.shape_cast %7 : vector<2x16x256xbf16> to vector<32x256xbf16>
    %c1_8 = arith.constant 1 : index
    %c0_9 = arith.constant 0 : index
    %c0_10 = arith.constant 0 : index
    %9 = vector.load %arg2[%c1_8, %c0_9, %c0_10] : memref<25x256x128xbf16, #tpu.memory_space<vmem>>, vector<1x256x128xbf16>
    %10 = vector.shape_cast %9 : vector<1x256x128xbf16> to vector<256x128xbf16>
    %cst_11 = arith.constant dense<0.000000e+00> : vector<32x128xf32>
    %11 = tpu.matmul %8, %10, %cst_11 {dimension_numbers = #tpu.dot_dimension_numbers<[1], [0], [0], [1], [0, 0, 1, 1], [], []>} : vector<32x256xbf16>, vector<256x128xbf16>, vector<32x128xf32> -> vector<32x128xf32>
    %12 = arith.addf %6, %11 : vector<32x128xf32>
    %c0_12 = arith.constant 0 : index
    %c2 = arith.constant 2 : index
    %c0_13 = arith.constant 0 : index
    %13 = vector.load %arg1[%c0_12, %c2, %c0_13] : memref<2x40x256xbf16, #tpu.memory_space<vmem>>, vector<2x16x256xbf16>
    %14 = vector.shape_cast %13 : vector<2x16x256xbf16> to vector<32x256xbf16>
    %c2_14 = arith.constant 2 : index
    %c0_15 = arith.constant 0 : index
    %c0_16 = arith.constant 0 : index
    %15 = vector.load %arg2[%c2_14, %c0_15, %c0_16] : memref<25x256x128xbf16, #tpu.memory_space<vmem>>, vector<1x256x128xbf16>
    %16 = vector.shape_cast %15 : vector<1x256x128xbf16> to vector<256x128xbf16>
    %cst_17 = arith.constant dense<0.000000e+00> : vector<32x128xf32>
    %17 = tpu.matmul %14, %16, %cst_17 {dimension_numbers = #tpu.dot_dimension_numbers<[1], [0], [0], [1], [0, 0, 1, 1], [], []>} : vector<32x256xbf16>, vector<256x128xbf16>, vector<32x128xf32> -> vector<32x128xf32>
    %18 = arith.addf %12, %17 : vector<32x128xf32>
    %c0_18 = arith.constant 0 : index
    %c3 = arith.constant 3 : index
    %c0_19 = arith.constant 0 : index
    %19 = vector.load %arg1[%c0_18, %c3, %c0_19] : memref<2x40x256xbf16, #tpu.memory_space<vmem>>, vector<2x16x256xbf16>
    %20 = vector.shape_cast %19 : vector<2x16x256xbf16> to vector<32x256xbf16>
    %c3_20 = arith.constant 3 : index
    %c0_21 = arith.constant 0 : index
    %c0_22 = arith.constant 0 : index
    %21 = vector.load %arg2[%c3_20, %c0_21, %c0_22] : memref<25x256x128xbf16, #tpu.memory_space<vmem>>, vector<1x256x128xbf16>
    %22 = vector.shape_cast %21 : vector<1x256x128xbf16> to vector<256x128xbf16>
    %cst_23 = arith.constant dense<0.000000e+00> : vector<32x128xf32>
    %23 = tpu.matmul %20, %22, %cst_23 {dimension_numbers = #tpu.dot_dimension_numbers<[1], [0], [0], [1], [0, 0, 1, 1], [], []>} : vector<32x256xbf16>, vector<256x128xbf16>, vector<32x128xf32> -> vector<32x128xf32>
    %24 = arith.addf %18, %23 : vector<32x128xf32>
    %c0_24 = arith.constant 0 : index
    %c4 = arith.constant 4 : index
    %c0_25 = arith.constant 0 : index
    %25 = vector.load %arg1[%c0_24, %c4, %c0_25] : memref<2x40x256xbf16, #tpu.memory_space<vmem>>, vector<2x16x256xbf16>
    %26 = vector.shape_cast %25 : vector<2x16x256xbf16> to vector<32x256xbf16>
    %c4_26 = arith.constant 4 : index
    %c0_27 = arith.constant 0 : index
    %c0_28 = arith.constant 0 : index
    %27 = vector.load %arg2[%c4_26, %c0_27, %c0_28] : memref<25x256x128xbf16, #tpu.memory_space<vmem>>, vector<1x256x128xbf16>
    %28 = vector.shape_cast %27 : vector<1x256x128xbf16> to vector<256x128xbf16>
    %cst_29 = arith.constant dense<0.000000e+00> : vector<32x128xf32>
    %29 = tpu.matmul %26, %28, %cst_29 {dimension_numbers = #tpu.dot_dimension_numbers<[1], [0], [0], [1], [0, 0, 1, 1], [], []>} : vector<32x256xbf16>, vector<256x128xbf16>, vector<32x128xf32> -> vector<32x128xf32>
    %30 = arith.addf %24, %29 : vector<32x128xf32>
    %c0_30 = arith.constant 0 : index
    %c5 = arith.constant 5 : index
    %c0_31 = arith.constant 0 : index
    %31 = vector.load %arg1[%c0_30, %c5, %c0_31] : memref<2x40x256xbf16, #tpu.memory_space<vmem>>, vector<2x16x256xbf16>
    %32 = vector.shape_cast %31 : vector<2x16x256xbf16> to vector<32x256xbf16>
    %c5_32 = arith.constant 5 : index
    %c0_33 = arith.constant 0 : index
    %c0_34 = arith.constant 0 : index
    %33 = vector.load %arg2[%c5_32, %c0_33, %c0_34] : memref<25x256x128xbf16, #tpu.memory_space<vmem>>, vector<1x256x128xbf16>
    %34 = vector.shape_cast %33 : vector<1x256x128xbf16> to vector<256x128xbf16>
    %cst_35 = arith.constant dense<0.000000e+00> : vector<32x128xf32>
    %35 = tpu.matmul %32, %34, %cst_35 {dimension_numbers = #tpu.dot_dimension_numbers<[1], [0], [0], [1], [0, 0, 1, 1], [], []>} : vector<32x256xbf16>, vector<256x128xbf16>, vector<32x128xf32> -> vector<32x128xf32>
    %36 = arith.addf %30, %35 : vector<32x128xf32>
    %c0_36 = arith.constant 0 : index
    %c6 = arith.constant 6 : index
    %c0_37 = arith.constant 0 : index
    %37 = vector.load %arg1[%c0_36, %c6, %c0_37] : memref<2x40x256xbf16, #tpu.memory_space<vmem>>, vector<2x16x256xbf16>
    %38 = vector.shape_cast %37 : vector<2x16x256xbf16> to vector<32x256xbf16>
    %c6_38 = arith.constant 6 : index
    %c0_39 = arith.constant 0 : index
    %c0_40 = arith.constant 0 : index
    %39 = vector.load %arg2[%c6_38, %c0_39, %c0_40] : memref<25x256x128xbf16, #tpu.memory_space<vmem>>, vector<1x256x128xbf16>
    %40 = vector.shape_cast %39 : vector<1x256x128xbf16> to vector<256x128xbf16>
    %cst_41 = arith.constant dense<0.000000e+00> : vector<32x128xf32>
    %41 = tpu.matmul %38, %40, %cst_41 {dimension_numbers = #tpu.dot_dimension_numbers<[1], [0], [0], [1], [0, 0, 1, 1], [], []>} : vector<32x256xbf16>, vector<256x128xbf16>, vector<32x128xf32> -> vector<32x128xf32>
    %42 = arith.addf %36, %41 : vector<32x128xf32>
    %c0_42 = arith.constant 0 : index
    %c7 = arith.constant 7 : index
    %c0_43 = arith.constant 0 : index
    %43 = vector.load %arg1[%c0_42, %c7, %c0_43] : memref<2x40x256xbf16, #tpu.memory_space<vmem>>, vector<2x16x256xbf16>
    %44 = vector.shape_cast %43 : vector<2x16x256xbf16> to vector<32x256xbf16>
    %c7_44 = arith.constant 7 : index
    %c0_45 = arith.constant 0 : index
    %c0_46 = arith.constant 0 : index
    %45 = vector.load %arg2[%c7_44, %c0_45, %c0_46] : memref<25x256x128xbf16, #tpu.memory_space<vmem>>, vector<1x256x128xbf16>
    %46 = vector.shape_cast %45 : vector<1x256x128xbf16> to vector<256x128xbf16>
    %cst_47 = arith.constant dense<0.000000e+00> : vector<32x128xf32>
    %47 = tpu.matmul %44, %46, %cst_47 {dimension_numbers = #tpu.dot_dimension_numbers<[1], [0], [0], [1], [0, 0, 1, 1], [], []>} : vector<32x256xbf16>, vector<256x128xbf16>, vector<32x128xf32> -> vector<32x128xf32>
    %48 = arith.addf %42, %47 : vector<32x128xf32>
    %c0_48 = arith.constant 0 : index
    %c8 = arith.constant 8 : index
    %c0_49 = arith.constant 0 : index
    %49 = vector.load %arg1[%c0_48, %c8, %c0_49] : memref<2x40x256xbf16, #tpu.memory_space<vmem>>, vector<2x16x256xbf16>
    %50 = vector.shape_cast %49 : vector<2x16x256xbf16> to vector<32x256xbf16>
    %c8_50 = arith.constant 8 : index
    %c0_51 = arith.constant 0 : index
    %c0_52 = arith.constant 0 : index
    %51 = vector.load %arg2[%c8_50, %c0_51, %c0_52] : memref<25x256x128xbf16, #tpu.memory_space<vmem>>, vector<1x256x128xbf16>
    %52 = vector.shape_cast %51 : vector<1x256x128xbf16> to vector<256x128xbf16>
    %cst_53 = arith.constant dense<0.000000e+00> : vector<32x128xf32>
    %53 = tpu.matmul %50, %52, %cst_53 {dimension_numbers = #tpu.dot_dimension_numbers<[1], [0], [0], [1], [0, 0, 1, 1], [], []>} : vector<32x256xbf16>, vector<256x128xbf16>, vector<32x128xf32> -> vector<32x128xf32>
    %54 = arith.addf %48, %53 : vector<32x128xf32>
    %c0_54 = arith.constant 0 : index
    %c9 = arith.constant 9 : index
    %c0_55 = arith.constant 0 : index
    %55 = vector.load %arg1[%c0_54, %c9, %c0_55] : memref<2x40x256xbf16, #tpu.memory_space<vmem>>, vector<2x16x256xbf16>
    %56 = vector.shape_cast %55 : vector<2x16x256xbf16> to vector<32x256xbf16>
    %c9_56 = arith.constant 9 : index
    %c0_57 = arith.constant 0 : index
    %c0_58 = arith.constant 0 : index
    %57 = vector.load %arg2[%c9_56, %c0_57, %c0_58] : memref<25x256x128xbf16, #tpu.memory_space<vmem>>, vector<1x256x128xbf16>
    %58 = vector.shape_cast %57 : vector<1x256x128xbf16> to vector<256x128xbf16>
    %cst_59 = arith.constant dense<0.000000e+00> : vector<32x128xf32>
    %59 = tpu.matmul %56, %58, %cst_59 {dimension_numbers = #tpu.dot_dimension_numbers<[1], [0], [0], [1], [0, 0, 1, 1], [], []>} : vector<32x256xbf16>, vector<256x128xbf16>, vector<32x128xf32> -> vector<32x128xf32>
    %60 = arith.addf %54, %59 : vector<32x128xf32>
    %c0_60 = arith.constant 0 : index
    %c10 = arith.constant 10 : index
    %c0_61 = arith.constant 0 : index
    %61 = vector.load %arg1[%c0_60, %c10, %c0_61] : memref<2x40x256xbf16, #tpu.memory_space<vmem>>, vector<2x16x256xbf16>
    %62 = vector.shape_cast %61 : vector<2x16x256xbf16> to vector<32x256xbf16>
    %c10_62 = arith.constant 10 : index
    %c0_63 = arith.constant 0 : index
    %c0_64 = arith.constant 0 : index
    %63 = vector.load %arg2[%c10_62, %c0_63, %c0_64] : memref<25x256x128xbf16, #tpu.memory_space<vmem>>, vector<1x256x128xbf16>
    %64 = vector.shape_cast %63 : vector<1x256x128xbf16> to vector<256x128xbf16>
    %cst_65 = arith.constant dense<0.000000e+00> : vector<32x128xf32>
    %65 = tpu.matmul %62, %64, %cst_65 {dimension_numbers = #tpu.dot_dimension_numbers<[1], [0], [0], [1], [0, 0, 1, 1], [], []>} : vector<32x256xbf16>, vector<256x128xbf16>, vector<32x128xf32> -> vector<32x128xf32>
    %66 = arith.addf %60, %65 : vector<32x128xf32>
    %c0_66 = arith.constant 0 : index
    %c11 = arith.constant 11 : index
    %c0_67 = arith.constant 0 : index
    %67 = vector.load %arg1[%c0_66, %c11, %c0_67] : memref<2x40x256xbf16, #tpu.memory_space<vmem>>, vector<2x16x256xbf16>
    %68 = vector.shape_cast %67 : vector<2x16x256xbf16> to vector<32x256xbf16>
    %c11_68 = arith.constant 11 : index
    %c0_69 = arith.constant 0 : index
    %c0_70 = arith.constant 0 : index
    %69 = vector.load %arg2[%c11_68, %c0_69, %c0_70] : memref<25x256x128xbf16, #tpu.memory_space<vmem>>, vector<1x256x128xbf16>
    %70 = vector.shape_cast %69 : vector<1x256x128xbf16> to vector<256x128xbf16>
    %cst_71 = arith.constant dense<0.000000e+00> : vector<32x128xf32>
    %71 = tpu.matmul %68, %70, %cst_71 {dimension_numbers = #tpu.dot_dimension_numbers<[1], [0], [0], [1], [0, 0, 1, 1], [], []>} : vector<32x256xbf16>, vector<256x128xbf16>, vector<32x128xf32> -> vector<32x128xf32>
    %72 = arith.addf %66, %71 : vector<32x128xf32>
    %c0_72 = arith.constant 0 : index
    %c12 = arith.constant 12 : index
    %c0_73 = arith.constant 0 : index
    %73 = vector.load %arg1[%c0_72, %c12, %c0_73] : memref<2x40x256xbf16, #tpu.memory_space<vmem>>, vector<2x16x256xbf16>
    %74 = vector.shape_cast %73 : vector<2x16x256xbf16> to vector<32x256xbf16>
    %c12_74 = arith.constant 12 : index
    %c0_75 = arith.constant 0 : index
    %c0_76 = arith.constant 0 : index
    %75 = vector.load %arg2[%c12_74, %c0_75, %c0_76] : memref<25x256x128xbf16, #tpu.memory_space<vmem>>, vector<1x256x128xbf16>
    %76 = vector.shape_cast %75 : vector<1x256x128xbf16> to vector<256x128xbf16>
    %cst_77 = arith.constant dense<0.000000e+00> : vector<32x128xf32>
    %77 = tpu.matmul %74, %76, %cst_77 {dimension_numbers = #tpu.dot_dimension_numbers<[1], [0], [0], [1], [0, 0, 1, 1], [], []>} : vector<32x256xbf16>, vector<256x128xbf16>, vector<32x128xf32> -> vector<32x128xf32>
    %78 = arith.addf %72, %77 : vector<32x128xf32>
    %c0_78 = arith.constant 0 : index
    %c13 = arith.constant 13 : index
    %c0_79 = arith.constant 0 : index
    %79 = vector.load %arg1[%c0_78, %c13, %c0_79] : memref<2x40x256xbf16, #tpu.memory_space<vmem>>, vector<2x16x256xbf16>
    %80 = vector.shape_cast %79 : vector<2x16x256xbf16> to vector<32x256xbf16>
    %c13_80 = arith.constant 13 : index
    %c0_81 = arith.constant 0 : index
    %c0_82 = arith.constant 0 : index
    %81 = vector.load %arg2[%c13_80, %c0_81, %c0_82] : memref<25x256x128xbf16, #tpu.memory_space<vmem>>, vector<1x256x128xbf16>
    %82 = vector.shape_cast %81 : vector<1x256x128xbf16> to vector<256x128xbf16>
    %cst_83 = arith.constant dense<0.000000e+00> : vector<32x128xf32>
    %83 = tpu.matmul %80, %82, %cst_83 {dimension_numbers = #tpu.dot_dimension_numbers<[1], [0], [0], [1], [0, 0, 1, 1], [], []>} : vector<32x256xbf16>, vector<256x128xbf16>, vector<32x128xf32> -> vector<32x128xf32>
    %84 = arith.addf %78, %83 : vector<32x128xf32>
    %c0_84 = arith.constant 0 : index
    %c14 = arith.constant 14 : index
    %c0_85 = arith.constant 0 : index
    %85 = vector.load %arg1[%c0_84, %c14, %c0_85] : memref<2x40x256xbf16, #tpu.memory_space<vmem>>, vector<2x16x256xbf16>
    %86 = vector.shape_cast %85 : vector<2x16x256xbf16> to vector<32x256xbf16>
    %c14_86 = arith.constant 14 : index
    %c0_87 = arith.constant 0 : index
    %c0_88 = arith.constant 0 : index
    %87 = vector.load %arg2[%c14_86, %c0_87, %c0_88] : memref<25x256x128xbf16, #tpu.memory_space<vmem>>, vector<1x256x128xbf16>
    %88 = vector.shape_cast %87 : vector<1x256x128xbf16> to vector<256x128xbf16>
    %cst_89 = arith.constant dense<0.000000e+00> : vector<32x128xf32>
    %89 = tpu.matmul %86, %88, %cst_89 {dimension_numbers = #tpu.dot_dimension_numbers<[1], [0], [0], [1], [0, 0, 1, 1], [], []>} : vector<32x256xbf16>, vector<256x128xbf16>, vector<32x128xf32> -> vector<32x128xf32>
    %90 = arith.addf %84, %89 : vector<32x128xf32>
    %c0_90 = arith.constant 0 : index
    %c15 = arith.constant 15 : index
    %c0_91 = arith.constant 0 : index
    %91 = vector.load %arg1[%c0_90, %c15, %c0_91] : memref<2x40x256xbf16, #tpu.memory_space<vmem>>, vector<2x16x256xbf16>
    %92 = vector.shape_cast %91 : vector<2x16x256xbf16> to vector<32x256xbf16>
    %c15_92 = arith.constant 15 : index
    %c0_93 = arith.constant 0 : index
    %c0_94 = arith.constant 0 : index
    %93 = vector.load %arg2[%c15_92, %c0_93, %c0_94] : memref<25x256x128xbf16, #tpu.memory_space<vmem>>, vector<1x256x128xbf16>
    %94 = vector.shape_cast %93 : vector<1x256x128xbf16> to vector<256x128xbf16>
    %cst_95 = arith.constant dense<0.000000e+00> : vector<32x128xf32>
    %95 = tpu.matmul %92, %94, %cst_95 {dimension_numbers = #tpu.dot_dimension_numbers<[1], [0], [0], [1], [0, 0, 1, 1], [], []>} : vector<32x256xbf16>, vector<256x128xbf16>, vector<32x128xf32> -> vector<32x128xf32>
    %96 = arith.addf %90, %95 : vector<32x128xf32>
    %c0_96 = arith.constant 0 : index
    %c16 = arith.constant 16 : index
    %c0_97 = arith.constant 0 : index
    %97 = vector.load %arg1[%c0_96, %c16, %c0_97] : memref<2x40x256xbf16, #tpu.memory_space<vmem>>, vector<2x16x256xbf16>
    %98 = vector.shape_cast %97 : vector<2x16x256xbf16> to vector<32x256xbf16>
    %c16_98 = arith.constant 16 : index
    %c0_99 = arith.constant 0 : index
    %c0_100 = arith.constant 0 : index
    %99 = vector.load %arg2[%c16_98, %c0_99, %c0_100] : memref<25x256x128xbf16, #tpu.memory_space<vmem>>, vector<1x256x128xbf16>
    %100 = vector.shape_cast %99 : vector<1x256x128xbf16> to vector<256x128xbf16>
    %cst_101 = arith.constant dense<0.000000e+00> : vector<32x128xf32>
    %101 = tpu.matmul %98, %100, %cst_101 {dimension_numbers = #tpu.dot_dimension_numbers<[1], [0], [0], [1], [0, 0, 1, 1], [], []>} : vector<32x256xbf16>, vector<256x128xbf16>, vector<32x128xf32> -> vector<32x128xf32>
    %102 = arith.addf %96, %101 : vector<32x128xf32>
    %c0_102 = arith.constant 0 : index
    %c17 = arith.constant 17 : index
    %c0_103 = arith.constant 0 : index
    %103 = vector.load %arg1[%c0_102, %c17, %c0_103] : memref<2x40x256xbf16, #tpu.memory_space<vmem>>, vector<2x16x256xbf16>
    %104 = vector.shape_cast %103 : vector<2x16x256xbf16> to vector<32x256xbf16>
    %c17_104 = arith.constant 17 : index
    %c0_105 = arith.constant 0 : index
    %c0_106 = arith.constant 0 : index
    %105 = vector.load %arg2[%c17_104, %c0_105, %c0_106] : memref<25x256x128xbf16, #tpu.memory_space<vmem>>, vector<1x256x128xbf16>
    %106 = vector.shape_cast %105 : vector<1x256x128xbf16> to vector<256x128xbf16>
    %cst_107 = arith.constant dense<0.000000e+00> : vector<32x128xf32>
    %107 = tpu.matmul %104, %106, %cst_107 {dimension_numbers = #tpu.dot_dimension_numbers<[1], [0], [0], [1], [0, 0, 1, 1], [], []>} : vector<32x256xbf16>, vector<256x128xbf16>, vector<32x128xf32> -> vector<32x128xf32>
    %108 = arith.addf %102, %107 : vector<32x128xf32>
    %c0_108 = arith.constant 0 : index
    %c18 = arith.constant 18 : index
    %c0_109 = arith.constant 0 : index
    %109 = vector.load %arg1[%c0_108, %c18, %c0_109] : memref<2x40x256xbf16, #tpu.memory_space<vmem>>, vector<2x16x256xbf16>
    %110 = vector.shape_cast %109 : vector<2x16x256xbf16> to vector<32x256xbf16>
    %c18_110 = arith.constant 18 : index
    %c0_111 = arith.constant 0 : index
    %c0_112 = arith.constant 0 : index
    %111 = vector.load %arg2[%c18_110, %c0_111, %c0_112] : memref<25x256x128xbf16, #tpu.memory_space<vmem>>, vector<1x256x128xbf16>
    %112 = vector.shape_cast %111 : vector<1x256x128xbf16> to vector<256x128xbf16>
    %cst_113 = arith.constant dense<0.000000e+00> : vector<32x128xf32>
    %113 = tpu.matmul %110, %112, %cst_113 {dimension_numbers = #tpu.dot_dimension_numbers<[1], [0], [0], [1], [0, 0, 1, 1], [], []>} : vector<32x256xbf16>, vector<256x128xbf16>, vector<32x128xf32> -> vector<32x128xf32>
    %114 = arith.addf %108, %113 : vector<32x128xf32>
    %c0_114 = arith.constant 0 : index
    %c19 = arith.constant 19 : index
    %c0_115 = arith.constant 0 : index
    %115 = vector.load %arg1[%c0_114, %c19, %c0_115] : memref<2x40x256xbf16, #tpu.memory_space<vmem>>, vector<2x16x256xbf16>
    %116 = vector.shape_cast %115 : vector<2x16x256xbf16> to vector<32x256xbf16>
    %c19_116 = arith.constant 19 : index
    %c0_117 = arith.constant 0 : index
    %c0_118 = arith.constant 0 : index
    %117 = vector.load %arg2[%c19_116, %c0_117, %c0_118] : memref<25x256x128xbf16, #tpu.memory_space<vmem>>, vector<1x256x128xbf16>
    %118 = vector.shape_cast %117 : vector<1x256x128xbf16> to vector<256x128xbf16>
    %cst_119 = arith.constant dense<0.000000e+00> : vector<32x128xf32>
    %119 = tpu.matmul %116, %118, %cst_119 {dimension_numbers = #tpu.dot_dimension_numbers<[1], [0], [0], [1], [0, 0, 1, 1], [], []>} : vector<32x256xbf16>, vector<256x128xbf16>, vector<32x128xf32> -> vector<32x128xf32>
    %120 = arith.addf %114, %119 : vector<32x128xf32>
    %c0_120 = arith.constant 0 : index
    %c20 = arith.constant 20 : index
    %c0_121 = arith.constant 0 : index
    %121 = vector.load %arg1[%c0_120, %c20, %c0_121] : memref<2x40x256xbf16, #tpu.memory_space<vmem>>, vector<2x16x256xbf16>
    %122 = vector.shape_cast %121 : vector<2x16x256xbf16> to vector<32x256xbf16>
    %c20_122 = arith.constant 20 : index
    %c0_123 = arith.constant 0 : index
    %c0_124 = arith.constant 0 : index
    %123 = vector.load %arg2[%c20_122, %c0_123, %c0_124] : memref<25x256x128xbf16, #tpu.memory_space<vmem>>, vector<1x256x128xbf16>
    %124 = vector.shape_cast %123 : vector<1x256x128xbf16> to vector<256x128xbf16>
    %cst_125 = arith.constant dense<0.000000e+00> : vector<32x128xf32>
    %125 = tpu.matmul %122, %124, %cst_125 {dimension_numbers = #tpu.dot_dimension_numbers<[1], [0], [0], [1], [0, 0, 1, 1], [], []>} : vector<32x256xbf16>, vector<256x128xbf16>, vector<32x128xf32> -> vector<32x128xf32>
    %126 = arith.addf %120, %125 : vector<32x128xf32>
    %c0_126 = arith.constant 0 : index
    %c21 = arith.constant 21 : index
    %c0_127 = arith.constant 0 : index
    %127 = vector.load %arg1[%c0_126, %c21, %c0_127] : memref<2x40x256xbf16, #tpu.memory_space<vmem>>, vector<2x16x256xbf16>
    %128 = vector.shape_cast %127 : vector<2x16x256xbf16> to vector<32x256xbf16>
    %c21_128 = arith.constant 21 : index
    %c0_129 = arith.constant 0 : index
    %c0_130 = arith.constant 0 : index
    %129 = vector.load %arg2[%c21_128, %c0_129, %c0_130] : memref<25x256x128xbf16, #tpu.memory_space<vmem>>, vector<1x256x128xbf16>
    %130 = vector.shape_cast %129 : vector<1x256x128xbf16> to vector<256x128xbf16>
    %cst_131 = arith.constant dense<0.000000e+00> : vector<32x128xf32>
    %131 = tpu.matmul %128, %130, %cst_131 {dimension_numbers = #tpu.dot_dimension_numbers<[1], [0], [0], [1], [0, 0, 1, 1], [], []>} : vector<32x256xbf16>, vector<256x128xbf16>, vector<32x128xf32> -> vector<32x128xf32>
    %132 = arith.addf %126, %131 : vector<32x128xf32>
    %c0_132 = arith.constant 0 : index
    %c22 = arith.constant 22 : index
    %c0_133 = arith.constant 0 : index
    %133 = vector.load %arg1[%c0_132, %c22, %c0_133] : memref<2x40x256xbf16, #tpu.memory_space<vmem>>, vector<2x16x256xbf16>
    %134 = vector.shape_cast %133 : vector<2x16x256xbf16> to vector<32x256xbf16>
    %c22_134 = arith.constant 22 : index
    %c0_135 = arith.constant 0 : index
    %c0_136 = arith.constant 0 : index
    %135 = vector.load %arg2[%c22_134, %c0_135, %c0_136] : memref<25x256x128xbf16, #tpu.memory_space<vmem>>, vector<1x256x128xbf16>
    %136 = vector.shape_cast %135 : vector<1x256x128xbf16> to vector<256x128xbf16>
    %cst_137 = arith.constant dense<0.000000e+00> : vector<32x128xf32>
    %137 = tpu.matmul %134, %136, %cst_137 {dimension_numbers = #tpu.dot_dimension_numbers<[1], [0], [0], [1], [0, 0, 1, 1], [], []>} : vector<32x256xbf16>, vector<256x128xbf16>, vector<32x128xf32> -> vector<32x128xf32>
    %138 = arith.addf %132, %137 : vector<32x128xf32>
    %c0_138 = arith.constant 0 : index
    %c23 = arith.constant 23 : index
    %c0_139 = arith.constant 0 : index
    %139 = vector.load %arg1[%c0_138, %c23, %c0_139] : memref<2x40x256xbf16, #tpu.memory_space<vmem>>, vector<2x16x256xbf16>
    %140 = vector.shape_cast %139 : vector<2x16x256xbf16> to vector<32x256xbf16>
    %c23_140 = arith.constant 23 : index
    %c0_141 = arith.constant 0 : index
    %c0_142 = arith.constant 0 : index
    %141 = vector.load %arg2[%c23_140, %c0_141, %c0_142] : memref<25x256x128xbf16, #tpu.memory_space<vmem>>, vector<1x256x128xbf16>
    %142 = vector.shape_cast %141 : vector<1x256x128xbf16> to vector<256x128xbf16>
    %cst_143 = arith.constant dense<0.000000e+00> : vector<32x128xf32>
    %143 = tpu.matmul %140, %142, %cst_143 {dimension_numbers = #tpu.dot_dimension_numbers<[1], [0], [0], [1], [0, 0, 1, 1], [], []>} : vector<32x256xbf16>, vector<256x128xbf16>, vector<32x128xf32> -> vector<32x128xf32>
    %144 = arith.addf %138, %143 : vector<32x128xf32>
    %c0_144 = arith.constant 0 : index
    %c24 = arith.constant 24 : index
    %c0_145 = arith.constant 0 : index
    %145 = vector.load %arg1[%c0_144, %c24, %c0_145] : memref<2x40x256xbf16, #tpu.memory_space<vmem>>, vector<2x16x256xbf16>
    %146 = vector.shape_cast %145 : vector<2x16x256xbf16> to vector<32x256xbf16>
    %c24_146 = arith.constant 24 : index
    %c0_147 = arith.constant 0 : index
    %c0_148 = arith.constant 0 : index
    %147 = vector.load %arg2[%c24_146, %c0_147, %c0_148] : memref<25x256x128xbf16, #tpu.memory_space<vmem>>, vector<1x256x128xbf16>
    %148 = vector.shape_cast %147 : vector<1x256x128xbf16> to vector<256x128xbf16>
    %cst_149 = arith.constant dense<0.000000e+00> : vector<32x128xf32>
    %149 = tpu.matmul %146, %148, %cst_149 {dimension_numbers = #tpu.dot_dimension_numbers<[1], [0], [0], [1], [0, 0, 1, 1], [], []>} : vector<32x256xbf16>, vector<256x128xbf16>, vector<32x128xf32> -> vector<32x128xf32>
    %150 = arith.addf %144, %149 : vector<32x128xf32>
    %c0_150 = arith.constant 0 : index
    %c0_151 = arith.constant 0 : index
    %151 = vector.load %arg3[%c0_150, %c0_151] : memref<1x128xf32, #tpu.memory_space<vmem>>, vector<1x128xf32>
    %152 = vector.broadcast %151 : vector<1x128xf32> to vector<32x128xf32>
    %153 = arith.addf %150, %152 : vector<32x128xf32>
    %154 = vector.shape_cast %153 : vector<32x128xf32> to vector<2x16x128xf32>
    %c0_152 = arith.constant 0 : index
    %c0_153 = arith.constant 0 : index
    %c0_154 = arith.constant 0 : index
    %155 = vector.load %arg4[%c0_152, %c0_153, %c0_154] : memref<2x16x128xf32, #tpu.memory_space<vmem>>, vector<2x16x128xf32>
    tpu.vector_store %arg4[%c0_152, %c0_153, %c0_154], %154 {strides = array<i32>} : memref<2x16x128xf32, #tpu.memory_space<vmem>>, vector<2x16x128xf32>,
    return
  }
  func.func @transform_0(%arg0: i32) -> (i32, i32, i32) {
    %c0_i32 = arith.constant 0 : i32
    %c0_i32_0 = arith.constant 0 : i32
    %c0_i32_1 = arith.constant 0 : i32
    return %arg0, %c0_i32, %c0_i32_0 : i32, i32, i32
  }
  func.func @transform_1(%arg0: i32) -> (i32, i32, i32) {
    %c0_i32 = arith.constant 0 : i32
    %c0_i32_0 = arith.constant 0 : i32
    %c0_i32_1 = arith.constant 0 : i32
    %c0_i32_2 = arith.constant 0 : i32
    return %c0_i32, %c0_i32_0, %c0_i32_1 : i32, i32, i32
  }
  func.func @transform_2(%arg0: i32) -> (i32, i32) {
    %c0_i32 = arith.constant 0 : i32
    %c0_i32_0 = arith.constant 0 : i32
    %c0_i32_1 = arith.constant 0 : i32
    return %c0_i32, %c0_i32_0 : i32, i32
  }
  func.func @transform_3(%arg0: i32) -> (i32, i32, i32) {
    %c0_i32 = arith.constant 0 : i32
    %c0_i32_0 = arith.constant 0 : i32
    %c0_i32_1 = arith.constant 0 : i32
    return %arg0, %c0_i32, %c0_i32_0 : i32, i32, i32
  }
}

</mosaic_0001>

<bundles_post_ra>
// kernel: tpu_custom_call.1
= control target key start
LH: loop header
LB: loop body
LE: loop exit
PB: predicated region body
PF: predicated region fallthrough
CT: control target
= control target key end

     0   :  { %8 = vsyncpa [#allocation3], 0  ;;  %s8391_s0 = inlined_call_operand.hbm [shape: bf16[2,40,256], index: 0, kind: input, shape index: {}]   ;;  %s8392_s1 = inlined_call_operand.hbm [shape: bf16[25,256,128], index: 1, kind: input, shape index: {}]   ;;  %s8393_s2 = inlined_call_operand.hbm [shape: f32[1,128], index: 2, kind: input, shape index: {}]   ;;  %s8394_s3 = inlined_call_operand.hbm [shape: f32[2,16,128], index: 3, kind: output, shape index: {}]  }
   0x1   :  { %9 = vsyncpa [#allocation6], 0  ;;  %s28_s14 = sshll.u32 %s8392_s1, 4  ;;  %s29_s14 = int_to_ptr.hbm [resolvable:$true] %s28_s14 }
   0x2   :  { %10 = vsyncpa [#allocation4], 0  ;;  %s7722_s15 = smov [#allocation5]   ;;  %s15_s19 = sshll.u32 %s8391_s0, 4  ;;  %s16_s19 = int_to_ptr.hbm [resolvable:$true] %s15_s19 }
   0x3   :  { %s30_s16 = sshll.u32 %s7722_s15, 4  ;;  %s7723_s20 = smov 64   ;;  %s31_s16 = int_to_ptr.vmem [resolvable:$true] %s30_s16 }
   0x4   :  { %s7724_s21 = smov 4   ;;  %s7725_s22 = smov [#allocation2]  }
   0x5   :  { %36 = dma.hbm_to_vmem [thread:$0]  %s29_s14, 51200, %s31_s16, [#allocation6], %s7723_s20, %s7723_s20, %s7724_s21  }
   0x6   :  { %s17_s23 = sshll.u32 %s7725_s22, 4  ;;  %s7726_s24 = smov 128   ;;  %s18_s23 = int_to_ptr.vmem [resolvable:$true] %s17_s23 }
   0x7   :  { %s7727_s25 = smov 8   ;;  %s42_s27 = sshll.u32 %s8393_s2, 4  ;;  %s43_s27 = int_to_ptr.hbm [resolvable:$true] %s42_s27 }
   0x8   :  { %23 = dma.hbm_to_vmem [thread:$0]  %s16_s19, 1280, %s18_s23, [#allocation3], %s7726_s24, %s7726_s24, %s7727_s25  }
   0x9   :  { %s7728_s28 = smov [#allocation7]  }
   0xa   :  { %s44_s0 = sshll.u32 %s7728_s28, 4  ;;  %s45_s0 = int_to_ptr.vmem [resolvable:$true] %s44_s0 }
   0xb   :  { %47 = dma.hbm_to_vmem [thread:$0]  %s43_s27, 16, %s45_s0, [#allocation6]  }
   0xc   :  { %7716 = dma.done.wait [#allocation3], 1280  }
   0xd   :  { %7717 = vsyncadd [#allocation3], 4294966016 }
   0xe   :  { %7718 = dma.done.wait [#allocation6], 51216  }
   0xf   :  { %7719 = vsyncadd [#allocation6], 4294916080  ;;  %v7206_v0 = vld [vmem:[#allocation5 + $0xb8] sm:$0xff]  ;;  %v7205_v4 = vld [vmem:[#allocation5 + $0xb0] sm:$0xff]  ;;  %vm98_vm0 = vsmask.f32 3328 }
  0x10   :  { %v7214_v1 = vld [vmem:[#allocation5 + $0xf8] sm:$0xff]  ;;  %294 = vmatpush.bf16.msra.mxu0 %v7206_v0  ;;  %v7213_v5 = vld [vmem:[#allocation5 + $0xf0] sm:$0xff]  ;;  %v7204_v8 = vld [vmem:[#allocation5 + $0xa8] sm:$0xff]  ;;  %vm99_vm1 = vsmask.f32 7440  ;;  %vm492_vm3 = vcmask 1042432  }
  0x11   :  { %v7190_v2 = vld [vmem:[#allocation5 + $0x38] sm:$0xff]  ;;  %313 = vmatpush.bf16.msra.mxu1 %v7214_v1  ;;  %v7189_v6 = vld [vmem:[#allocation5 + $0x30] sm:$0xff]  ;;  %v7212_v9 = vld [vmem:[#allocation5 + $0xe8] sm:$0xff]  ;;  %vm493_vm4 = vcmask 1046532   ;;  %vm698_vm5 = vsmask.f32 2304 }
  0x12   :  { %v7198_v3 = vld [vmem:[#allocation5 + $0x78] sm:$0xff]  ;;  %448 = vmatpush.bf16.msra.mxu2 %v7190_v2  ;;  %v7197_v7 = vld [vmem:[#allocation5 + $0x70] sm:$0xff]  ;;  %v7188_v10 = vld [vmem:[#allocation5 + $0x28] sm:$0xff]  ;;  %vm699_vm6 = vsmask.f32 6416  ;;  %vm940_vm9 = vcmask 1041408  }
  0x13   :  { %467 = vmatpush.bf16.msra.mxu3 %v7198_v3  ;;  %v7196_v11 = vld [vmem:[#allocation5 + $0x68] sm:$0xff]  ;;  %v7203_v12 = vld [vmem:[#allocation5 + $0xa0] sm:$0xff]  ;;  %v7762_v15 = vld [vmem:[#allocation2] sm:$0xff]  ;;  %vm941_vm10 = vcmask 1045508   ;;  %vm1146_vm11 = vsmask.f32 1280 }
  0x14   :  { %295 = vmatpush.bf16.msra.mxu0 %v7205_v4  ;;  %v7211_v13 = vld [vmem:[#allocation5 + $0xe0] sm:$0xff]  ;;  %v7764_v17 = vld [vmem:[#allocation2 + $0x8] sm:$0xff]  ;;  %v102_v19 = vshrl.u32 %v7762_v15, 16  ;;  %v105_v20 = vshll.u32 %v7762_v15, 16  ;;  %vm7781_vm2 = vmor %vm98_vm0, %vm99_vm1  ;;  %v336_v54 = vunpack.c.l.b16 %v7762_v15  ;;  %v337_v56 = vunpack.c.h.b16 %v7762_v15  ;;  %s7729_s2 = smov [#allocation8]   ;;  %s5513_s5 = sshll.u32 %s8394_s3, 4  ;;  %s5514_s5 = int_to_ptr.hbm [resolvable:$true] %s5513_s5 }
  0x15   :  { %314 = vmatpush.bf16.msra.mxu1 %v7213_v5  ;;  %v7187_v14 = vld [vmem:[#allocation5 + $0x20] sm:$0xff]  ;;  %v7771_v21 = vshll.u32 %v7764_v17, 16  ;;  %v7774_v22 = vshrl.u32 %v7764_v17, 16  ;;  %v7202_v25 = vld [vmem:[#allocation5 + $0x98] sm:$0xff]  ;;  %v7201_v35 = vld [vmem:[#allocation5 + $0x90] sm:$0xff]  ;;  %v338_v55 = vunpack.c.l.b16 %v7764_v17  ;;  %v339_v57 = vunpack.c.h.b16 %v7764_v17  ;;  %s5511_s29 = sshll.u32 %s7729_s2, 4  ;;  %s5512_s29 = int_to_ptr.vmem [resolvable:$true] %s5511_s29 }
  0x16   :  { %449 = vmatpush.bf16.msra.mxu2 %v7189_v6  ;;  %v7195_v16 = vld [vmem:[#allocation5 + $0x60] sm:$0xff]  ;;  %v104_v23 = vrot.slane %v102_v19, 4  ;;  %v107_v24 = vrot.slane %v105_v20, 5  ;;  %v7210_v26 = vld [vmem:[#allocation5 + $0xd8] sm:$0xff]  ;;  %v7209_v36 = vld [vmem:[#allocation5 + $0xd0] sm:$0xff]  ;;  %vm1388_vm15 = vcmask 1040384  }
  0x17   :  { %468 = vmatpush.bf16.msra.mxu3 %v7197_v7  ;;  %v7766_v18 = vld [vmem:[#allocation2 + $0x10] sm:$0x11]  ;;  %v113_v27 = vrot.slane %v7771_v21, 5  ;;  %v117_v28 = vrot.slane %v7774_v22, 4  ;;  %v7186_v30 = vld [vmem:[#allocation5 + $0x18] sm:$0xff]  ;;  %v7185_v41 = vld [vmem:[#allocation5 + $0x10] sm:$0xff] }
  0x18   :  { %296 = vmatpush.bf16.msra.mxu0 %v7204_v8  ;;  %v121_v29 = vshll.u32 %v7766_v18, 16  ;;  %v7194_v31 = vld [vmem:[#allocation5 + $0x58] sm:$0xff]  ;;  %v108_v32 = vor.u32 %v107_v24, %v104_v23  ;;  %v7193_v42 = vld [vmem:[#allocation5 + $0x50] sm:$0xff]  ;;  %v7787_v43 = vld [vmem:[#allocation2 + $0x30] sm:$0xff]  ;;  %vm1147_vm12 = vsmask.f32 5392 }
  0x19   :  { %315 = vmatpush.bf16.msra.mxu1 %v7212_v9  ;;  %v118_v33 = vor.u32 %v117_v28, %v113_v27  ;;  %v7785_v40 = vld [vmem:[#allocation2 + $0x28] sm:$0xff]  ;;  %v7200_v46 = vld [vmem:[#allocation5 + $0x88] sm:$0xff]  ;;  %v7796_v50 = vshll.u32 %v7787_v43, 16  ;;  %v7799_v51 = vshrl.u32 %v7787_v43, 16  ;;  %v7199_v62 = vld [vmem:[#allocation5 + $0x80] sm:$0xff]  ;;  %vm1389_vm0 = vcmask 1044484  }
  0x1a   :  { %450 = vmatpush.bf16.msra.mxu2 %v7188_v10  ;;  %v109_v37 = vrot.slane %v108_v32, 4  ;;  %v123_v39 = vrot.slane %v121_v29, 5  ;;  %v126_v44 = vshrl.u32 %v7785_v40, 16  ;;  %v129_v45 = vshll.u32 %v7785_v40, 16  ;;  %v7208_v47 = vld [vmem:[#allocation5 + $0xc8] sm:$0xff]  ;;  %v7207_v63 = vld [vmem:[#allocation5 + $0xc0] sm:$0xff]  ;;  %vm7840_vm7 = vmor %vm492_vm3, %vm493_vm4 }
  0x1b   :  { %469 = vmatpush.bf16.msra.mxu3 %v7196_v11  ;;  %v119_v38 = vrot.slane %v118_v33, 4  ;;  %v7184_v52 = vld [vmem:[#allocation5 + $0x8] sm:$0xff]  ;;  %v137_v2 = vrot.slane %v7796_v50, 5  ;;  %v141_v3 = vrot.slane %v7799_v51, 4  ;;  %v7183_v4 = vld [vmem:[#allocation5] sm:$0xff]  ;;  %v7238_v7 = vld [vmem:[#allocation5 + $0x1b8] sm:$0xff]  ;;  %v344_v11 = vpack.c.b16 %v338_v55, %v336_v54 }
  0x1c   :  { %297 = vmatpush.bf16.msra.mxu0 %v7203_v12  ;;  %v114_v48 = vsel %vm7781_vm2, %v109_v37, %v113_v27  ;;  %v7192_v53 = vld [vmem:[#allocation5 + $0x48] sm:$0xff]  ;;  %v128_v0 = vrot.slane %v126_v44, 4  ;;  %v131_v1 = vrot.slane %v129_v45, 5  ;;  %v7191_v5 = vld [vmem:[#allocation5 + $0x40] sm:$0xff]  ;;  %v7246_v8 = vld [vmem:[#allocation5 + $0x1f8] sm:$0xff]  ;;  %v345_v12 = vpack.c.b16 %v339_v57, %v337_v56 }
  0x1d   :  { %316 = vmatpush.bf16.msra.mxu1 %v7211_v13  ;;  %v124_v49 = vsel %vm7781_vm2, %v119_v38, %v123_v39  ;;  %v182_v58 = vunpack.c.l.b16 %v114_v48  ;;  %v183_v60 = vunpack.c.h.b16 %v114_v48  ;;  %v7807_v6 = vld [vmem:[#allocation2 + $0x38] sm:$0x11]  ;;  %v7230_v19 = vld [vmem:[#allocation5 + $0x178] sm:$0xff]  ;;  %v7237_v20 = vld [vmem:[#allocation5 + $0x1b0] sm:$0xff]  ;;  %v342_v44 = vunpack.c.l.b16 %v7787_v43 }
  0x1e   :  { %451 = vmatpush.bf16.msra.mxu2 %v7187_v14  ;;  %v184_v59 = vunpack.c.l.b16 %v124_v49  ;;  %v185_v61 = vunpack.c.h.b16 %v124_v49  ;;  %v132_v13 = vor.u32 %v131_v1, %v128_v0  ;;  %v142_v14 = vor.u32 %v141_v3, %v137_v2  ;;  %v7245_v23 = vld [vmem:[#allocation5 + $0x1f0] sm:$0xff]  ;;  %v7220_v37 = vld [vmem:[#allocation5 + $0x128] sm:$0xff]  ;;  %v7235_v39 = vld [vmem:[#allocation5 + $0x1a0] sm:$0xff] }
  0x1f   :  { %470 = vmatpush.bf16.msra.mxu3 %v7195_v16  ;;  %v145_v15 = vshll.u32 %v7807_v6, 16  ;;  %v7222_v16 = vld [vmem:[#allocation5 + $0x138] sm:$0xff]  ;;  %v7221_v27 = vld [vmem:[#allocation5 + $0x130] sm:$0xff]  ;;  %v7228_v38 = vld [vmem:[#allocation5 + $0x168] sm:$0xff]  ;;  %vm1594_vm1 = vsmask.f32 256 }
  0x20   :  { %298 = vmatpush.bf16.msra.mxu0 %v7202_v25  ;;  %v190_v9 = vpack.c.b16 %v184_v59, %v182_v58  ;;  %v191_v10 = vpack.c.b16 %v185_v61, %v183_v60  ;;  %v133_v24 = vrot.slane %v132_v13, 4  ;;  %v143_v25 = vrot.slane %v142_v14, 4  ;;  %v7229_v28 = vld [vmem:[#allocation5 + $0x170] sm:$0xff]  ;;  %v7824_v45 = vld [vmem:[#allocation2 + $0x10] sm:$0x33]  ;;  %v7234_v0 = vld [vmem:[#allocation5 + $0x198] sm:$0xff] }
  0x21   :  { %317 = vmatpush.bf16.msra.mxu1 %v7210_v26  ;;  %v147_v26 = vrot.slane %v145_v15, 5  ;;  %v7814_v29 = vld [vmem:[#allocation2] sm:$0xee]  ;;  %v7219_v58 = vld [vmem:[#allocation5 + $0x120] sm:$0xff]  ;;  %v710_v60 = vrot.slane %v7774_v22, 5  ;;  %v711_v61 = vrot.slane %v7771_v21, 6  ;;  %vm7846_vm8 = vmor %vm698_vm5, %vm699_vm6 }
  0x22   :  { %452 = vmatpush.bf16.msra.mxu2 %v7186_v30  ;;  %v7236_v30 = vld [vmem:[#allocation5 + $0x1a8] sm:$0xff]  ;;  %v138_v32 = vsel %vm7781_vm2, %v133_v24, %v137_v2  ;;  %v7227_v59 = vld [vmem:[#allocation5 + $0x160] sm:$0xff]  ;;  %v7233_v13 = vld [vmem:[#allocation5 + $0x190] sm:$0xff]  ;;  %v5655_v15 = vrot.slane %v7814_v29, 9  ;;  %vm1595_vm3 = vsmask.f32 4368 }
  0x23   :  { %471 = vmatpush.bf16.msra.mxu3 %v7194_v31  ;;  %v7244_v31 = vld [vmem:[#allocation5 + $0x1e8] sm:$0xff]  ;;  %v148_v33 = vsel %vm7781_vm2, %v143_v25, %v147_v26  ;;  %v187_v48 = vunpack.c.h.b16 %v138_v32  ;;  %v7241_v14 = vld [vmem:[#allocation5 + $0x1d0] sm:$0xff]  ;;  %vm7891_vm13 = vmor %vm940_vm9, %vm941_vm10 }
  0x24   :  { %299 = vmatpush.bf16.msra.mxu0 %v7201_v35  ;;  %v702_v35 = vshrl.u32 %v7814_v29, 16  ;;  %v189_v49 = vunpack.c.h.b16 %v148_v33  ;;  %v7225_v25 = vld [vmem:[#allocation5 + $0x150] sm:$0xff]  ;;  %vm7898_vm14 = vmor %vm1146_vm11, %vm1147_vm12 }
  0x25   :  { %318 = vmatpush.bf16.msra.mxu1 %v7209_v36  ;;  %v705_v36 = vshll.u32 %v7814_v29, 16  ;;  %v7850_v29 = vld [vmem:[#allocation2 + $0x28] sm:$0xee]  ;;  %vm7939_vm4 = vmor %vm1388_vm15, %vm1389_vm0 }
  0x26   :  { %453 = vmatpush.bf16.msra.mxu2 %v7185_v41  ;;  %v7243_v41 = vld [vmem:[#allocation5 + $0x1e0] sm:$0xff]  ;;  %v704_v54 = vrot.slane %v702_v35, 5  ;;  %v193_v2 = vpack.c.b16 %v189_v49, %v187_v48  ;;  %v725_v35 = vshrl.u32 %v7850_v29, 16  ;;  %v7862_v48 = vld [vmem:[#allocation2 + $0x38] sm:$0x33]  ;;  %vm7946_vm5 = vmor %vm1594_vm1, %vm1595_vm3 }
  0x27   :  { %472 = vmatpush.bf16.msra.mxu3 %v7193_v42  ;;  %v340_v42 = vunpack.c.l.b16 %v7785_v40  ;;  %v707_v56 = vrot.slane %v705_v36, 6  ;;  %v728_v36 = vshll.u32 %v7850_v29, 16 }
  0x28   :  { %300 = vmatpush.bf16.msra.mxu0 %v7200_v46  ;;  %v186_v46 = vunpack.c.l.b16 %v138_v32 }
  0x29   :  { %319 = vmatpush.bf16.msra.mxu1 %v7208_v47  ;;  %v188_v47 = vunpack.c.l.b16 %v148_v33  ;;  %v346_v3 = vpack.c.b16 %v342_v44, %v340_v42  ;;  %v7239_v42 = vld [vmem:[#allocation5 + $0x1c0] sm:$0xff] }
  0x2a   :  { %454 = vmatpush.bf16.msra.mxu2 %v7184_v52  ;;  %v341_v52 = vunpack.c.h.b16 %v7785_v40  ;;  %v7242_v40 = vld [vmem:[#allocation5 + $0x1d8] sm:$0xff] }
  0x2b   :  { %473 = vmatpush.bf16.msra.mxu3 %v7192_v53  ;;  %v343_v53 = vunpack.c.h.b16 %v7787_v43  ;;  %v192_v1 = vpack.c.b16 %v188_v47, %v186_v46 }
  0x2c   :  { %301 = vmatpush.bf16.msra.mxu0 %v7199_v62  ;;  %v716_v62 = vshrl.u32 %v7824_v45, 16 }
  0x2d   :  { %320 = vmatpush.bf16.msra.mxu1 %v7207_v63  ;;  %v719_v63 = vshll.u32 %v7824_v45, 16 }
  0x2e   :  { %455 = vmatpush.bf16.msra.mxu2 %v7183_v4  ;;  %v347_v4 = vpack.c.b16 %v343_v53, %v341_v52 }
  0x2f   :  { %474 = vmatpush.bf16.msra.mxu3 %v7191_v5  ;;  %302 = vmatmul.bf16.vlgmr.msra.gmra.mxu0 %v190_v9  ;;  %v497_v5 = vrot.slane %v7764_v17, 5  ;;  %v7226_v9 = vld [vmem:[#allocation5 + $0x158] sm:$0xff] }
  0x30   :  { %321 = vmatmul.bf16.vlgmr.msra.gmra.mxu1 %v191_v10  ;;  %654 = vmatpush.bf16.msrb.mxu0 %v7222_v16  ;;  %v712_v10 = vor.u32 %v711_v61, %v710_v60  ;;  %v7217_v16 = vld [vmem:[#allocation5 + $0x110] sm:$0xff] }
  0x31   :  { %456 = vmatmul.bf16.vlgmr.msra.gmra.mxu2 %v344_v11  ;;  %673 = vmatpush.bf16.msrb.mxu1 %v7230_v19  ;;  %v718_v11 = vrot.slane %v716_v62, 5  ;;  %v727_v62 = vrot.slane %v725_v35, 5 }
  0x32   :  { %892 = vmatpush.bf16.msrb.mxu2 %v7238_v7  ;;  %475 = vmatmul.bf16.vlgmr.msra.gmra.mxu3 %v345_v12  ;;  %v708_v7 = vor.u32 %v707_v56, %v704_v54  ;;  %v721_v12 = vrot.slane %v719_v63, 6  ;;  %v730_v63 = vrot.slane %v728_v36, 6  ;;  %v7871_v36 = vld [vmem:[#allocation2] sm:$0xcc] }
  0x33   :  { %911 = vmatpush.bf16.msrb.mxu3 %v7246_v8  ;;  %v7218_v8 = vld [vmem:[#allocation5 + $0x118] sm:$0xff] }
  0x34   :  { %655 = vmatpush.bf16.msrb.mxu0 %v7221_v27  ;;  %v709_v24 = vrot.slane %v708_v7, 4  ;;  %v714_v27 = vrot.slane %v712_v10, 4  ;;  %v7262_v7 = vld [vmem:[#allocation5 + $0x278] sm:$0xff] }
  0x35   :  { %674 = vmatpush.bf16.msrb.mxu1 %v7229_v28  ;;  %v722_v28 = vor.u32 %v721_v12, %v718_v11 }
  0x36   :  { %893 = vmatpush.bf16.msrb.mxu2 %v7237_v20  ;;  %v499_v20 = vrot.slane %v497_v5, 4  ;;  %v713_v33 = vsel %vm7846_vm8, %v709_v24, %v712_v10  ;;  %v504_v10 = vrot.slane %v7787_v43, 5  ;;  %v7253_v24 = vld [vmem:[#allocation5 + $0x230] sm:$0xff] }
  0x37   :  { %912 = vmatpush.bf16.msrb.mxu3 %v7245_v23  ;;  %v500_v23 = vrot.slane %v7766_v18, 5  ;;  %v498_v18 = vsel %vm7840_vm7, %v5655_v15, %v497_v5  ;;  %v780_v54 = vunpack.c.l.b16 %v713_v33  ;;  %v781_v56 = vunpack.c.h.b16 %v713_v33  ;;  %v7254_v5 = vld [vmem:[#allocation5 + $0x238] sm:$0xff] }
  0x38   :  { %656 = vmatpush.bf16.msrb.mxu0 %v7220_v37  ;;  %v7216_v37 = vld [vmem:[#allocation5 + $0x108] sm:$0xff]  ;;  %v542_v46 = vunpack.c.l.b16 %v498_v18  ;;  %v543_v47 = vunpack.c.h.b16 %v498_v18  ;;  %v507_v18 = vrot.slane %v7807_v6, 5 }
  0x39   :  { %675 = vmatpush.bf16.msrb.mxu1 %v7228_v38  ;;  %v501_v32 = vsel %vm7840_vm7, %v499_v20, %v500_v23  ;;  %v7224_v38 = vld [vmem:[#allocation5 + $0x148] sm:$0xff] }
  0x3a   :  { %894 = vmatpush.bf16.msrb.mxu2 %v7236_v30  ;;  %v7232_v30 = vld [vmem:[#allocation5 + $0x188] sm:$0xff]  ;;  %v544_v49 = vunpack.c.l.b16 %v501_v32  ;;  %v545_v52 = vunpack.c.h.b16 %v501_v32 }
  0x3b   :  { %913 = vmatpush.bf16.msrb.mxu3 %v7244_v31  ;;  %v7240_v31 = vld [vmem:[#allocation5 + $0x1c8] sm:$0xff] }
  0x3c   :  { %657 = vmatpush.bf16.msrb.mxu0 %v7219_v58  ;;  %v7270_v58 = vld [vmem:[#allocation5 + $0x2b8] sm:$0xff]  ;;  %v550_v11 = vpack.c.b16 %v544_v49, %v542_v46  ;;  %v551_v12 = vpack.c.b16 %v545_v52, %v543_v47  ;;  %v1150_v46 = vshrl.u32 %v7871_v36, 16  ;;  %v1153_v47 = vshll.u32 %v7871_v36, 16  ;;  %v7251_v52 = vld [vmem:[#allocation5 + $0x220] sm:$0xff] }
  0x3d   :  { %676 = vmatpush.bf16.msrb.mxu1 %v7227_v59  ;;  %v7278_v59 = vld [vmem:[#allocation5 + $0x2f8] sm:$0xff] }
  0x3e   :  { %895 = vmatpush.bf16.msrb.mxu2 %v7235_v39  ;;  %v723_v39 = vsel %vm7846_vm8, %v714_v27, %v722_v28  ;;  %v7268_v27 = vld [vmem:[#allocation5 + $0x2a8] sm:$0xff] }
  0x3f   :  { %914 = vmatpush.bf16.msrb.mxu3 %v7243_v41  ;;  %307 = vmatmul.bf16.gmra.mxu0 %v192_v1  ;;  %v7231_v41 = vld [vmem:[#allocation5 + $0x180] sm:$0xff]  ;;  %v782_v60 = vunpack.c.l.b16 %v723_v39  ;;  %v783_v61 = vunpack.c.h.b16 %v723_v39  ;;  %v733_v1 = vrot.slane %v7799_v51, 5  ;;  %v7276_v28 = vld [vmem:[#allocation5 + $0x2e8] sm:$0xff] }
  0x40   :  { %326 = vmatmul.bf16.gmra.mxu1 %v193_v2  ;;  %658 = vmatpush.bf16.msrb.mxu0 %v7218_v8  ;;  %v734_v2 = vrot.slane %v7796_v50, 6  ;;  %v7269_v8 = vld [vmem:[#allocation5 + $0x2b0] sm:$0xff]  ;;  %v7267_v39 = vld [vmem:[#allocation5 + $0x2a0] sm:$0xff] }
  0x41   :  { %461 = vmatmul.bf16.gmra.mxu2 %v346_v3  ;;  %677 = vmatpush.bf16.msrb.mxu1 %v7226_v9  ;;  %v739_v3 = vshrl.u32 %v7862_v48, 16  ;;  %v7277_v9 = vld [vmem:[#allocation5 + $0x2f0] sm:$0xff]  ;;  %v789_v15 = vpack.c.b16 %v783_v61, %v781_v56 }
  0x42   :  { %896 = vmatpush.bf16.msrb.mxu2 %v7234_v0  ;;  %480 = vmatmul.bf16.gmra.mxu3 %v347_v4  ;;  %v7215_v0 = vld [vmem:[#allocation5 + $0x100] sm:$0xff]  ;;  %v742_v4 = vshll.u32 %v7862_v48, 16 }
  0x43   :  { %915 = vmatpush.bf16.msrb.mxu3 %v7242_v40  ;;  %v7223_v40 = vld [vmem:[#allocation5 + $0x140] sm:$0xff]  ;;  %v741_v20 = vrot.slane %v739_v3, 5  ;;  %v1152_v3 = vrot.slane %v1150_v46, 6 }
  0x44   :  { %659 = vmatpush.bf16.msrb.mxu0 %v7217_v16  ;;  %v735_v16 = vor.u32 %v734_v2, %v733_v1  ;;  %v744_v23 = vrot.slane %v742_v4, 6  ;;  %v1155_v4 = vrot.slane %v1153_v47, 7  ;;  %v7263_v46 = vld [vmem:[#allocation5 + $0x280] sm:$0xff] }
  0x45   :  { %678 = vmatpush.bf16.msrb.mxu1 %v7225_v25  ;;  %v7261_v25 = vld [vmem:[#allocation5 + $0x270] sm:$0xff]  ;;  %v7271_v47 = vld [vmem:[#allocation5 + $0x2c0] sm:$0xff] }
  0x46   :  { %897 = vmatpush.bf16.msrb.mxu2 %v7233_v13  ;;  %v788_v13 = vpack.c.b16 %v782_v60, %v780_v54  ;;  %v737_v33 = vrot.slane %v735_v16, 4  ;;  %v745_v35 = vor.u32 %v744_v23, %v741_v20  ;;  %v7259_v54 = vld [vmem:[#allocation5 + $0x260] sm:$0xff]  ;;  %v945_v23 = vrot.slane %v7764_v17, 6 }
  0x47   :  { %916 = vmatpush.bf16.msrb.mxu3 %v7241_v14  ;;  %v731_v14 = vor.u32 %v730_v63, %v727_v62 }
  0x48   :  { %660 = vmatpush.bf16.msrb.mxu0 %v7216_v37  ;;  %v7252_v37 = vld [vmem:[#allocation5 + $0x228] sm:$0xff]  ;;  %v746_v49 = vsel %vm7846_vm8, %v737_v33, %v745_v35  ;;  %v5785_v33 = vrot.slane %v7871_v36, 10  ;;  %v947_v35 = vrot.slane %v945_v23, 4 }
  0x49   :  { %679 = vmatpush.bf16.msrb.mxu1 %v7224_v38  ;;  %v732_v32 = vrot.slane %v731_v14, 4  ;;  %v7260_v38 = vld [vmem:[#allocation5 + $0x268] sm:$0xff]  ;;  %v786_v1 = vunpack.c.l.b16 %v746_v49  ;;  %v787_v2 = vunpack.c.h.b16 %v746_v49  ;;  %v7273_v14 = vld [vmem:[#allocation5 + $0x2d0] sm:$0xff]  ;;  %v7902_v49 = vld [vmem:[#allocation2 + $0x28] sm:$0xcc] }
  0x4a   :  { %898 = vmatpush.bf16.msrb.mxu2 %v7232_v30  ;;  %v5656_v30 = vrot.slane %v7850_v29, 9  ;;  %v7275_v29 = vld [vmem:[#allocation5 + $0x2e0] sm:$0xff] }
  0x4b   :  { %917 = vmatpush.bf16.msrb.mxu3 %v7240_v31  ;;  %v506_v31 = vrot.slane %v504_v10, 4 }
  0x4c   :  { %661 = vmatpush.bf16.msrb.mxu0 %v7215_v0  ;;  %v505_v6 = vsel %vm7840_vm7, %v5656_v30, %v504_v10  ;;  %v7266_v0 = vld [vmem:[#allocation5 + $0x298] sm:$0xff]  ;;  %v7249_v30 = vld [vmem:[#allocation5 + $0x210] sm:$0xff] }
  0x4d   :  { %680 = vmatpush.bf16.msrb.mxu1 %v7223_v40  ;;  %v546_v56 = vunpack.c.l.b16 %v505_v6  ;;  %v547_v60 = vunpack.c.h.b16 %v505_v6  ;;  %v7274_v40 = vld [vmem:[#allocation5 + $0x2d8] sm:$0xff] }
  0x4e   :  { %899 = vmatpush.bf16.msrb.mxu2 %v7231_v41  ;;  %v508_v41 = vsel %vm7840_vm7, %v506_v31, %v507_v18  ;;  %v7250_v10 = vld [vmem:[#allocation5 + $0x218] sm:$0xff]  ;;  %v7257_v31 = vld [vmem:[#allocation5 + $0x250] sm:$0xff]  ;;  %v7264_v18 = vld [vmem:[#allocation5 + $0x288] sm:$0xff] }
  0x4f   :  { %918 = vmatpush.bf16.msrb.mxu3 %v7239_v42  ;;  %662 = vmatmul.bf16.vlgmr.msrb.gmra.mxu0 %v550_v11  ;;  %v736_v42 = vsel %vm7846_vm8, %v732_v32, %v735_v16  ;;  %v549_v61 = vunpack.c.h.b16 %v508_v41  ;;  %v7258_v11 = vld [vmem:[#allocation5 + $0x258] sm:$0xff]  ;;  %v7272_v32 = vld [vmem:[#allocation5 + $0x2c8] sm:$0xff] }
  0x50   :  { %1102 = vmatpush.bf16.msra.mxu0 %v7254_v5  ;;  %681 = vmatmul.bf16.vlgmr.msrb.gmra.mxu1 %v551_v12  ;;  %v784_v62 = vunpack.c.l.b16 %v736_v42  ;;  %v785_v63 = vunpack.c.h.b16 %v736_v42  ;;  %v1158_v5 = vrot.slane %v7774_v22, 6  ;;  %v7256_v42 = vld [vmem:[#allocation5 + $0x248] sm:$0xff] }
  0x51   :  { %1121 = vmatpush.bf16.msra.mxu1 %v7262_v7  ;;  %900 = vmatmul.bf16.vlgmr.msrb.gmra.mxu2 %v788_v13  ;;  %v1159_v7 = vrot.slane %v7771_v21, 7  ;;  %v7265_v13 = vld [vmem:[#allocation5 + $0x290] sm:$0xff] }
  0x52   :  { %1340 = vmatpush.bf16.msra.mxu2 %v7270_v58  ;;  %919 = vmatmul.bf16.vlgmr.msrb.gmra.mxu3 %v789_v15  ;;  %v548_v58 = vunpack.c.l.b16 %v508_v41  ;;  %v553_v15 = vpack.c.b16 %v549_v61, %v547_v60  ;;  %v790_v16 = vpack.c.b16 %v786_v1, %v784_v62  ;;  %v791_v20 = vpack.c.b16 %v787_v2, %v785_v63  ;;  %v7248_v41 = vld [vmem:[#allocation5 + $0x208] sm:$0xff]  ;;  %v7247_v61 = vld [vmem:[#allocation5 + $0x200] sm:$0xff]  ;;  %v7286_v2 = vld [vmem:[#allocation5 + $0x338] sm:$0xff] }
  0x53   :  { %1359 = vmatpush.bf16.msra.mxu3 %v7278_v59  ;;  %v7883_v59 = vld [vmem:[#allocation2 + $0x10] sm:$0x77]  ;;  %v1173_v63 = vshrl.u32 %v7902_v49, 16 }
  0x54   :  { %1103 = vmatpush.bf16.msra.mxu0 %v7253_v24  ;;  %v552_v12 = vpack.c.b16 %v548_v58, %v546_v56  ;;  %v1156_v24 = vor.u32 %v1155_v4, %v1152_v3  ;;  %v7255_v62 = vld [vmem:[#allocation5 + $0x240] sm:$0xff]  ;;  %v7294_v3 = vld [vmem:[#allocation5 + $0x378] sm:$0xff]  ;;  %v7914_v4 = vld [vmem:[#allocation2 + $0x38] sm:$0x77] }
  0x55   :  { %1122 = vmatpush.bf16.msra.mxu1 %v7261_v25  ;;  %v1160_v25 = vor.u32 %v1159_v7, %v1158_v5 }
  0x56   :  { %1341 = vmatpush.bf16.msra.mxu2 %v7269_v8  ;;  %v1164_v8 = vshrl.u32 %v7883_v59, 16 }
  0x57   :  { %1360 = vmatpush.bf16.msra.mxu3 %v7277_v9  ;;  %v1167_v9 = vshll.u32 %v7883_v59, 16 }
  0x58   :  { %1104 = vmatpush.bf16.msra.mxu0 %v7252_v37  ;;  %v5083_v37 = vld [vmem:[#allocation2 + $0x20] sm:$0xff] }
  0x59   :  { %1123 = vmatpush.bf16.msra.mxu1 %v7260_v38  ;;  %v948_v38 = vrot.slane %v7824_v45, 6  ;;  %v946_v45 = vsel %vm7891_vm13, %v5785_v33, %v945_v23  ;;  %v1187_v23 = vshrl.u32 %v7914_v4, 16  ;;  %v7300_v33 = vld [vmem:[#allocation5 + $0x3a8] sm:$0xff] }
  0x5a   :  { %1342 = vmatpush.bf16.msra.mxu2 %v7268_v27  ;;  %v1166_v27 = vrot.slane %v1164_v8, 6  ;;  %v991_v1 = vunpack.c.h.b16 %v946_v45 }
  0x5b   :  { %1361 = vmatpush.bf16.msra.mxu3 %v7276_v28  ;;  %v1169_v28 = vrot.slane %v1167_v9, 7  ;;  %v949_v56 = vsel %vm7891_vm13, %v947_v35, %v948_v38  ;;  %v7308_v35 = vld [vmem:[#allocation5 + $0x3e8] sm:$0xff] }
  0x5c   :  { %1105 = vmatpush.bf16.msra.mxu0 %v7251_v52  ;;  %v7302_v52 = vld [vmem:[#allocation5 + $0x3b8] sm:$0xff]  ;;  %v992_v5 = vunpack.c.l.b16 %v949_v56  ;;  %v993_v7 = vunpack.c.h.b16 %v949_v56 }
  0x5d   :  { %1124 = vmatpush.bf16.msra.mxu1 %v7259_v54  ;;  %v1170_v6 = vor.u32 %v1169_v28, %v1166_v27  ;;  %v7310_v54 = vld [vmem:[#allocation5 + $0x3f8] sm:$0xff]  ;;  %v7293_v27 = vld [vmem:[#allocation5 + $0x370] sm:$0xff] }
  0x5e   :  { %1343 = vmatpush.bf16.msra.mxu2 %v7267_v39  ;;  %v1157_v39 = vrot.slane %v1156_v24, 4  ;;  %v1190_v24 = vshll.u32 %v7914_v4, 16 }
  0x5f   :  { %1362 = vmatpush.bf16.msra.mxu3 %v7275_v29  ;;  %667 = vmatmul.bf16.gmra.mxu0 %v552_v12  ;;  %v1162_v29 = vrot.slane %v1160_v25, 4 }
  0x60   :  { %1106 = vmatpush.bf16.msra.mxu0 %v7250_v10  ;;  %686 = vmatmul.bf16.gmra.mxu1 %v553_v15  ;;  %v1161_v58 = vsel %vm7898_vm14, %v1157_v39, %v1160_v25  ;;  %v7301_v10 = vld [vmem:[#allocation5 + $0x3b0] sm:$0xff]  ;;  %v1182_v15 = vrot.slane %v7796_v50, 7 }
  0x61   :  { %1125 = vmatpush.bf16.msra.mxu1 %v7258_v11  ;;  %905 = vmatmul.bf16.gmra.mxu2 %v790_v16  ;;  %v1171_v60 = vsel %vm7898_vm14, %v1162_v29, %v1170_v6  ;;  %v1228_v8 = vunpack.c.l.b16 %v1161_v58  ;;  %v7309_v11 = vld [vmem:[#allocation5 + $0x3f0] sm:$0xff]  ;;  %v1229_v12 = vunpack.c.h.b16 %v1161_v58  ;;  %v1175_v16 = vrot.slane %v1173_v63, 6  ;;  %v7923_v63 = vld [vmem:[#allocation2 + $0x10] sm:$0xff] }
  0x62   :  { %1344 = vmatpush.bf16.msra.mxu2 %v7266_v0  ;;  %924 = vmatmul.bf16.gmra.mxu3 %v791_v20  ;;  %v1176_v0 = vshll.u32 %v7902_v49, 16  ;;  %v1230_v9 = vunpack.c.l.b16 %v1171_v60  ;;  %v7285_v25 = vld [vmem:[#allocation5 + $0x330] sm:$0xff]  ;;  %v1189_v29 = vrot.slane %v1187_v23, 6  ;;  %v1192_v6 = vrot.slane %v1190_v24, 7 }
  0x63   :  { %1363 = vmatpush.bf16.msra.mxu3 %v7274_v40  ;;  %v990_v40 = vunpack.c.l.b16 %v946_v45  ;;  %v955_v45 = vrot.slane %v7862_v48, 6  ;;  %v1382_v23 = vld [vmem:[#allocation2] sm:$0x88]  ;;  %v1610_v24 = vshll.u32 %v7923_v63, 16 }
  0x64   :  { %1107 = vmatpush.bf16.msra.mxu0 %v7249_v30  ;;  %v1178_v20 = vrot.slane %v1176_v0, 7  ;;  %v999_v30 = vpack.c.b16 %v993_v7, %v991_v1  ;;  %v7298_v1 = vld [vmem:[#allocation5 + $0x398] sm:$0xff] }
  0x65   :  { %1126 = vmatpush.bf16.msra.mxu1 %v7257_v31  ;;  %v998_v28 = vpack.c.b16 %v992_v5, %v990_v40  ;;  %v1236_v31 = vpack.c.b16 %v1230_v9, %v1228_v8  ;;  %v7282_v5 = vld [vmem:[#allocation5 + $0x318] sm:$0xff] }
  0x66   :  { %1345 = vmatpush.bf16.msra.mxu2 %v7265_v13  ;;  %v1231_v13 = vunpack.c.h.b16 %v1171_v60  ;;  %v1179_v38 = vor.u32 %v1178_v20, %v1175_v16  ;;  %v1193_v60 = vor.u32 %v1192_v6, %v1189_v29  ;;  %v7290_v7 = vld [vmem:[#allocation5 + $0x358] sm:$0xff]  ;;  %v7297_v16 = vld [vmem:[#allocation5 + $0x390] sm:$0xff]  ;;  %v7304_v29 = vld [vmem:[#allocation5 + $0x3c8] sm:$0xff] }
  0x67   :  { %1364 = vmatpush.bf16.msra.mxu3 %v7273_v14  ;;  %v1181_v14 = vrot.slane %v7799_v51, 6  ;;  %v7305_v20 = vld [vmem:[#allocation5 + $0x3d0] sm:$0xff]  ;;  %v7280_v6 = vld [vmem:[#allocation5 + $0x308] sm:$0xff] }
  0x68   :  { %1108 = vmatpush.bf16.msra.mxu0 %v7248_v41  ;;  %v7284_v41 = vld [vmem:[#allocation5 + $0x328] sm:$0xff]  ;;  %v1180_v56 = vrot.slane %v1179_v38, 4  ;;  %v1602_v38 = vrot.slane %v7774_v22, 7 }
  0x69   :  { %1127 = vmatpush.bf16.msra.mxu1 %v7256_v42  ;;  %v1183_v39 = vor.u32 %v1182_v15, %v1181_v14  ;;  %v7292_v42 = vld [vmem:[#allocation5 + $0x368] sm:$0xff] }
  0x6a   :  { %1346 = vmatpush.bf16.msra.mxu2 %v7264_v18  ;;  %v1237_v18 = vpack.c.b16 %v1231_v13, %v1229_v12 }
  0x6b   :  { %1365 = vmatpush.bf16.msra.mxu3 %v7272_v32  ;;  %v952_v32 = vrot.slane %v7787_v43, 6  ;;  %v1185_v58 = vrot.slane %v1183_v39, 4  ;;  %v1184_v48 = vsel %vm7898_vm14, %v1180_v56, %v1183_v39  ;;  %v7296_v39 = vld [vmem:[#allocation5 + $0x388] sm:$0xff] }
  0x6c   :  { %1109 = vmatpush.bf16.msra.mxu0 %v7247_v61  ;;  %v7283_v61 = vld [vmem:[#allocation5 + $0x320] sm:$0xff]  ;;  %v1232_v12 = vunpack.c.l.b16 %v1184_v48  ;;  %v1233_v14 = vunpack.c.h.b16 %v1184_v48  ;;  %v7344_v48 = vld [vmem:[#allocation5 + $0x4f8] sm:$0xff] }
  0x6d   :  { %1128 = vmatpush.bf16.msra.mxu1 %v7255_v62  ;;  %v7291_v62 = vld [vmem:[#allocation5 + $0x360] sm:$0xff]  ;;  %v1194_v40 = vsel %vm7898_vm14, %v1185_v58, %v1193_v60 }
  0x6e   :  { %1347 = vmatpush.bf16.msra.mxu2 %v7263_v46  ;;  %v5786_v46 = vrot.slane %v7902_v49, 10  ;;  %v1234_v13 = vunpack.c.l.b16 %v1194_v40  ;;  %v1235_v15 = vunpack.c.h.b16 %v1194_v40  ;;  %v7295_v58 = vld [vmem:[#allocation5 + $0x380] sm:$0xff] }
  0x6f   :  { %1366 = vmatpush.bf16.msra.mxu3 %v7271_v47  ;;  %1110 = vmatmul.bf16.vlgmr.msra.gmra.mxu0 %v998_v28  ;;  %v954_v47 = vrot.slane %v952_v32, 4  ;;  %v7303_v60 = vld [vmem:[#allocation5 + $0x3c0] sm:$0xff] }
  0x70   :  { %1550 = vmatpush.bf16.msrb.mxu0 %v7286_v2  ;;  %1129 = vmatmul.bf16.vlgmr.msra.gmra.mxu1 %v999_v30  ;;  %v953_v0 = vsel %vm7891_vm13, %v5786_v46, %v952_v32  ;;  %v7306_v2 = vld [vmem:[#allocation5 + $0x3d8] sm:$0xff]  ;;  %v1238_v32 = vpack.c.b16 %v1234_v13, %v1232_v12 }
  0x71   :  { %1569 = vmatpush.bf16.msrb.mxu1 %v7294_v3  ;;  %1348 = vmatmul.bf16.vlgmr.msra.gmra.mxu2 %v1236_v31  ;;  %v956_v49 = vsel %vm7891_vm13, %v954_v47, %v955_v45  ;;  %v1607_v3 = vshrl.u32 %v7923_v63, 16  ;;  %v994_v8 = vunpack.c.l.b16 %v953_v0  ;;  %v1396_v47 = vrot.slane %v7883_v59, 7  ;;  %v7577_v59 = vld [vmem:[#allocation5 + $0xc10] sm:$0xff] }
  0x72   :  { %1776 = vmatpush.bf16.msrb.mxu2 %v7302_v52  ;;  %1367 = vmatmul.bf16.vlgmr.msra.gmra.mxu3 %v1237_v18  ;;  %v7299_v52 = vld [vmem:[#allocation5 + $0x3a0] sm:$0xff]  ;;  %v996_v9 = vunpack.c.l.b16 %v956_v49  ;;  %v1393_v18 = vrot.slane %v7764_v17, 7  ;;  %v8013_v17 = vld [vmem:[#allocation2 + $0x8] sm:$0xee] }
  0x73   :  { %1795 = vmatpush.bf16.msrb.mxu3 %v7310_v54  ;;  %v7307_v54 = vld [vmem:[#allocation5 + $0x3e0] sm:$0xff]  ;;  %v1609_v28 = vrot.slane %v1607_v3, 7  ;;  %v7326_v3 = vld [vmem:[#allocation5 + $0x478] sm:$0xff] }
  0x74   :  { %1551 = vmatpush.bf16.msrb.mxu0 %v7285_v25  ;;  %v7281_v25 = vld [vmem:[#allocation5 + $0x310] sm:$0xff]  ;;  %v1000_v30 = vpack.c.b16 %v996_v9, %v994_v8  ;;  %v1395_v46 = vrot.slane %v1393_v18, 4 }
  0x75   :  { %1570 = vmatpush.bf16.msrb.mxu1 %v7293_v27  ;;  %v7289_v27 = vld [vmem:[#allocation5 + $0x350] sm:$0xff]  ;;  %v1612_v56 = vor.u32 %v1610_v24, %v1609_v28 }
  0x76   :  { %1777 = vmatpush.bf16.msrb.mxu2 %v7301_v10  ;;  %v995_v10 = vunpack.c.h.b16 %v953_v0 }
  0x77   :  { %1796 = vmatpush.bf16.msrb.mxu3 %v7309_v11  ;;  %v997_v11 = vunpack.c.h.b16 %v956_v49  ;;  %v7336_v49 = vld [vmem:[#allocation5 + $0x4b8] sm:$0xff] }
  0x78   :  { %1552 = vmatpush.bf16.msrb.mxu0 %v7284_v41  ;;  %v7288_v41 = vld [vmem:[#allocation5 + $0x348] sm:$0xff] }
  0x79   :  { %1571 = vmatpush.bf16.msrb.mxu1 %v7292_v42  ;;  %v1001_v31 = vpack.c.b16 %v997_v11, %v995_v10  ;;  %v5915_v42 = vrot.slane %v1382_v23, 11 }
  0x7a   :  { %1778 = vmatpush.bf16.msrb.mxu2 %v7300_v33  ;;  %v1239_v33 = vpack.c.b16 %v1235_v15, %v1233_v14  ;;  %v7335_v15 = vld [vmem:[#allocation5 + $0x4b0] sm:$0xff] }
  0x7b   :  { %1797 = vmatpush.bf16.msrb.mxu3 %v7308_v35  ;;  %v1598_v35 = vshrl.u32 %v1382_v23, 16  ;;  %v1394_v0 = vsel %vm7939_vm4, %v5915_v42, %v1393_v18  ;;  %v7325_v23 = vld [vmem:[#allocation5 + $0x470] sm:$0xff]  ;;  %v1400_v18 = vrot.slane %v7787_v43, 7  ;;  %v7362_v43 = vld [vmem:[#allocation5 + $0x588] sm:$0xff] }
  0x7c   :  { %1553 = vmatpush.bf16.msrb.mxu0 %v7283_v61  ;;  %v7279_v61 = vld [vmem:[#allocation5 + $0x300] sm:$0xff]  ;;  %v1439_v9 = vunpack.c.h.b16 %v1394_v0 }
  0x7d   :  { %1572 = vmatpush.bf16.msrb.mxu1 %v7291_v62  ;;  %v5981_v45 = vrot.slane %v1598_v35, 11  ;;  %v7287_v62 = vld [vmem:[#allocation5 + $0x340] sm:$0xff] }
  0x7e   :  { %1779 = vmatpush.bf16.msrb.mxu2 %v7299_v52  ;;  %v1603_v52 = vor.u32 %v1602_v38, %v7771_v21  ;;  %v1397_v21 = vsel %vm7939_vm4, %v1395_v46, %v1396_v47  ;;  %v1402_v46 = vrot.slane %v1400_v18, 4  ;;  %v1403_v47 = vrot.slane %v7914_v4, 7  ;;  %v2003_v4 = vld [vmem:[#allocation2 + $0x8] sm:$0xff] }
  0x7f   :  { %1798 = vmatpush.bf16.msrb.mxu3 %v7307_v54  ;;  %1115 = vmatmul.bf16.gmra.mxu0 %v1000_v30  ;;  %v1605_v54 = vrot.slane %v1602_v38, 4  ;;  %v1440_v8 = vunpack.c.l.b16 %v1397_v21  ;;  %v1441_v10 = vunpack.c.h.b16 %v1397_v21 }
  0x80   :  { %1554 = vmatpush.bf16.msrb.mxu0 %v7282_v5  ;;  %1134 = vmatmul.bf16.gmra.mxu1 %v1001_v31  ;;  %v1604_v40 = vsel %vm7946_vm5, %v5981_v45, %v1603_v52  ;;  %v7958_v5 = vld [vmem:[#allocation2 + $0x38] sm:$0xff] }
  0x81   :  { %1573 = vmatpush.bf16.msrb.mxu1 %v7290_v7  ;;  %1353 = vmatmul.bf16.gmra.mxu2 %v1238_v32  ;;  %v1438_v7 = vunpack.c.l.b16 %v1394_v0  ;;  %v1664_v11 = vunpack.c.l.b16 %v1604_v40  ;;  %v1665_v13 = vunpack.c.h.b16 %v1604_v40  ;;  %v7961_v24 = vshrl.u32 %v7958_v5, 16  ;;  %v7340_v40 = vld [vmem:[#allocation5 + $0x4d8] sm:$0xff] }
  0x82   :  { %1780 = vmatpush.bf16.msrb.mxu2 %v7298_v1  ;;  %1372 = vmatmul.bf16.gmra.mxu3 %v1239_v33  ;;  %v1613_v1 = vsel %vm7946_vm5, %v1605_v54, %v1612_v56  ;;  %v1447_v28 = vpack.c.b16 %v1441_v10, %v1439_v9  ;;  %v1619_v33 = vrot.slane %v7799_v51, 7  ;;  %v7967_v38 = vshll.u32 %v7958_v5, 16  ;;  %v7333_v56 = vld [vmem:[#allocation5 + $0x4a0] sm:$0xff]  ;;  %v7322_v9 = vld [vmem:[#allocation5 + $0x458] sm:$0xff] }
  0x83   :  { %1799 = vmatpush.bf16.msrb.mxu3 %v7306_v2  ;;  %v7318_v2 = vld [vmem:[#allocation5 + $0x438] sm:$0xff]  ;;  %v1666_v12 = vunpack.c.l.b16 %v1613_v1  ;;  %v1667_v14 = vunpack.c.h.b16 %v1613_v1  ;;  %v1626_v35 = vrot.slane %v7961_v24, 7  ;;  %v1404_v0 = vsel %vm7939_vm4, %v1402_v46, %v1403_v47  ;;  %v7338_v46 = vld [vmem:[#allocation5 + $0x4c8] sm:$0xff] }
  0x84   :  { %1555 = vmatpush.bf16.msrb.mxu0 %v7281_v25  ;;  %v1383_v25 = vld [vmem:[#allocation2 + $0x28] sm:$0x88]  ;;  %v1620_v51 = vor.u32 %v1619_v33, %v7796_v50  ;;  %v1622_v52 = vrot.slane %v1619_v33, 4  ;;  %v2010_v1 = vshrl.u32 %v2003_v4, 16  ;;  %v7995_v33 = vld [vmem:[#allocation2 + $0x18] sm:$0x11] }
  0x85   :  { %1574 = vmatpush.bf16.msrb.mxu1 %v7289_v27  ;;  %v1446_v27 = vpack.c.b16 %v1440_v8, %v1438_v7  ;;  %v1672_v30 = vpack.c.b16 %v1666_v12, %v1664_v11  ;;  %v1673_v31 = vpack.c.b16 %v1667_v14, %v1665_v13  ;;  %v1615_v32 = vshrl.u32 %v1383_v25, 16  ;;  %v7314_v8 = vld [vmem:[#allocation5 + $0x418] sm:$0xff] }
  0x86   :  { %1781 = vmatpush.bf16.msrb.mxu2 %v7297_v16  ;;  %v7343_v16 = vld [vmem:[#allocation5 + $0x4f0] sm:$0xff]  ;;  %v5916_v42 = vrot.slane %v1383_v25, 11  ;;  %v7974_v54 = vor.u32 %v7967_v38, %v1626_v35  ;;  %v1444_v11 = vunpack.c.l.b16 %v1404_v0  ;;  %v1445_v13 = vunpack.c.h.b16 %v1404_v0  ;;  %v7311_v0 = vld [vmem:[#allocation5 + $0x400] sm:$0xff] }
  0x87   :  { %1800 = vmatpush.bf16.msrb.mxu3 %v7305_v20  ;;  %v7317_v20 = vld [vmem:[#allocation5 + $0x430] sm:$0xff]  ;;  %v5982_v45 = vrot.slane %v1615_v32, 11 }
  0x88   :  { %1556 = vmatpush.bf16.msrb.mxu0 %v7280_v6  ;;  %v7316_v6 = vld [vmem:[#allocation5 + $0x428] sm:$0xff]  ;;  %v1401_v50 = vsel %vm7939_vm4, %v5916_v42, %v1400_v18  ;;  %v7339_v25 = vld [vmem:[#allocation5 + $0x4d0] sm:$0xff] }
  0x89   :  { %1575 = vmatpush.bf16.msrb.mxu1 %v7288_v41  ;;  %v7324_v41 = vld [vmem:[#allocation5 + $0x468] sm:$0xff]  ;;  %v1621_v21 = vsel %vm7946_vm5, %v5982_v45, %v1620_v51  ;;  %v1442_v10 = vunpack.c.l.b16 %v1401_v50  ;;  %v1443_v12 = vunpack.c.h.b16 %v1401_v50  ;;  %v7313_v18 = vld [vmem:[#allocation5 + $0x410] sm:$0xff]  ;;  %v2029_v51 = vshll.u32 %v7995_v33, 16 }
  0x8a   :  { %1782 = vmatpush.bf16.msrb.mxu2 %v7296_v39  ;;  %v7334_v39 = vld [vmem:[#allocation5 + $0x4a8] sm:$0xff]  ;;  %v1668_v14 = vunpack.c.l.b16 %v1621_v21  ;;  %v7321_v32 = vld [vmem:[#allocation5 + $0x450] sm:$0xff] }
  0x8b   :  { %1801 = vmatpush.bf16.msrb.mxu3 %v7304_v29  ;;  %v7342_v29 = vld [vmem:[#allocation5 + $0x4e8] sm:$0xff]  ;;  %v2031_v50 = vrot.slane %v2029_v51, 5 }
  0x8c   :  { %1557 = vmatpush.bf16.msrb.mxu0 %v7279_v61  ;;  %v7323_v61 = vld [vmem:[#allocation5 + $0x460] sm:$0xff]  ;;  %v7330_v42 = vld [vmem:[#allocation5 + $0x488] sm:$0xff] }
  0x8d   :  { %1576 = vmatpush.bf16.msrb.mxu1 %v7287_v62  ;;  %v7976_v62 = vld [vmem:[#allocation2 + $0x10] sm:$0xff]  ;;  %v7374_v51 = vld [vmem:[#allocation5 + $0x5e8] sm:$0xff] }
  0x8e   :  { %1783 = vmatpush.bf16.msrb.mxu2 %v7295_v58  ;;  %v7341_v58 = vld [vmem:[#allocation5 + $0x4e0] sm:$0xff]  ;;  %v7991_v7 = vshrl.u32 %v7976_v62, 16 }
  0x8f   :  { %1802 = vmatpush.bf16.msrb.mxu3 %v7303_v60  ;;  %1558 = vmatmul.bf16.vlgmr.msrb.gmra.mxu0 %v1446_v27  ;;  %v7315_v60 = vld [vmem:[#allocation5 + $0x420] sm:$0xff]  ;;  %v2012_v27 = vrot.slane %v2010_v1, 4  ;;  %v7352_v1 = vld [vmem:[#allocation5 + $0x538] sm:$0xff] }
  0x90   :  { %1961 = vmatpush.bf16.msra.mxu0 %v7318_v2  ;;  %1577 = vmatmul.bf16.vlgmr.msrb.gmra.mxu1 %v1447_v28  ;;  %v2013_v2 = vshll.u32 %v2003_v4, 16 }
  0x91   :  { %1980 = vmatpush.bf16.msra.mxu1 %v7326_v3  ;;  %1784 = vmatmul.bf16.vlgmr.msrb.gmra.mxu2 %v1672_v30  ;;  %v7988_v3 = vshll.u32 %v7976_v62, 16 }
  0x92   :  { %2202 = vmatpush.bf16.msra.mxu2 %v7336_v49  ;;  %1803 = vmatmul.bf16.vlgmr.msrb.gmra.mxu3 %v1673_v31  ;;  %v1630_v49 = vsel %vm7946_vm5, %v1622_v52, %v7974_v54  ;;  %v2015_v28 = vrot.slane %v2013_v2, 5  ;;  %v2025_v31 = vrot.slane %v7991_v7, 4  ;;  %v7312_v52 = vld [vmem:[#allocation5 + $0x408] sm:$0xff]  ;;  %v7360_v2 = vld [vmem:[#allocation5 + $0x578] sm:$0xff] }
  0x93   :  { %2221 = vmatpush.bf16.msra.mxu3 %v7344_v48  ;;  %v7332_v48 = vld [vmem:[#allocation5 + $0x498] sm:$0xff]  ;;  %v2021_v30 = vrot.slane %v7988_v3, 5 }
  0x94   :  { %1962 = vmatpush.bf16.msra.mxu0 %v7317_v20  ;;  %v1671_v20 = vunpack.c.h.b16 %v1630_v49  ;;  %v2016_v47 = vor.u32 %v2015_v28, %v2012_v27  ;;  %v7351_v27 = vld [vmem:[#allocation5 + $0x530] sm:$0xff] }
  0x95   :  { %1981 = vmatpush.bf16.msra.mxu1 %v7325_v23  ;;  %v7331_v23 = vld [vmem:[#allocation5 + $0x490] sm:$0xff]  ;;  %v2026_v45 = vor.u32 %v2025_v31, %v2021_v30 }
  0x96   :  { %2203 = vmatpush.bf16.msra.mxu2 %v7335_v15  ;;  %v1670_v15 = vunpack.c.l.b16 %v1630_v49  ;;  %v2006_v49 = vld [vmem:[#allocation2 + $0x30] sm:$0xff]  ;;  %v7359_v28 = vld [vmem:[#allocation5 + $0x570] sm:$0xff] }
  0x97   :  { %2222 = vmatpush.bf16.msra.mxu3 %v7343_v16  ;;  %v1669_v16 = vunpack.c.h.b16 %v1621_v21  ;;  %v2027_v4 = vrot.slane %v2026_v45, 4  ;;  %v7319_v21 = vld [vmem:[#allocation5 + $0x440] sm:$0xff]  ;;  %v7366_v45 = vld [vmem:[#allocation5 + $0x5a8] sm:$0xff] }
  0x98   :  { %1963 = vmatpush.bf16.msra.mxu0 %v7316_v6  ;;  %v1674_v6 = vpack.c.b16 %v1670_v15, %v1668_v14  ;;  %v7367_v14 = vld [vmem:[#allocation5 + $0x5b0] sm:$0xff] }
  0x99   :  { %1982 = vmatpush.bf16.msra.mxu1 %v7324_v41  ;;  %v1675_v41 = vpack.c.b16 %v1671_v20, %v1669_v16  ;;  %v7375_v15 = vld [vmem:[#allocation5 + $0x5f0] sm:$0xff] }
  0x9a   :  { %2204 = vmatpush.bf16.msra.mxu2 %v7334_v39  ;;  %v1448_v39 = vpack.c.b16 %v1444_v11, %v1442_v10  ;;  %v2034_v10 = vshrl.u32 %v2006_v49, 16  ;;  %v2037_v11 = vshll.u32 %v2006_v49, 16 }
  0x9b   :  { %2223 = vmatpush.bf16.msra.mxu3 %v7342_v29  ;;  %v1449_v29 = vpack.c.b16 %v1445_v13, %v1443_v12  ;;  %v1853_v12 = vunpack.c.l.b16 %v7923_v63  ;;  %v1854_v13 = vunpack.c.h.b16 %v7923_v63 }
  0x9c   :  { %1964 = vmatpush.bf16.msra.mxu0 %v7315_v60  ;;  %v7337_v60 = vld [vmem:[#allocation5 + $0x4c0] sm:$0xff]  ;;  %v2039_v31 = vrot.slane %v2037_v11, 5 }
  0x9d   :  { %1983 = vmatpush.bf16.msra.mxu1 %v7323_v61  ;;  %v2017_v61 = vrot.slane %v2016_v47, 4  ;;  %v1857_v63 = vpack.c.b16 %v1853_v12, %v338_v55  ;;  %v7358_v55 = vld [vmem:[#allocation5 + $0x568] sm:$0xff] }
  0x9e   :  { %2205 = vmatpush.bf16.msra.mxu2 %v7333_v56  ;;  %v7320_v56 = vld [vmem:[#allocation5 + $0x448] sm:$0xff] }
  0x9f   :  { %2224 = vmatpush.bf16.msra.mxu3 %v7341_v58  ;;  %1563 = vmatmul.bf16.gmra.mxu0 %v1448_v39  ;;  %v7329_v58 = vld [vmem:[#allocation5 + $0x480] sm:$0xff]  ;;  %v8006_v39 = vld [vmem:[#allocation2 + $0x40] sm:$0x11]  ;;  %v8017_v12 = vld [vmem:[#allocation2 + $0x18] sm:$0x33] }
  0xa0   :  { %1965 = vmatpush.bf16.msra.mxu0 %v7314_v8  ;;  %1582 = vmatmul.bf16.gmra.mxu1 %v1449_v29  ;;  %v2022_v8 = vsel %vm7781_vm2, %v2017_v61, %v2021_v30  ;;  %v2036_v30 = vrot.slane %v2034_v10, 4  ;;  %v1858_v29 = vpack.c.b16 %v1854_v13, %v339_v57  ;;  %v7365_v57 = vld [vmem:[#allocation5 + $0x5a0] sm:$0xff] }
  0xa1   :  { %1984 = vmatpush.bf16.msra.mxu1 %v7322_v9  ;;  %1789 = vmatmul.bf16.gmra.mxu2 %v1674_v6  ;;  %v2032_v9 = vsel %vm7781_vm2, %v2027_v4, %v2031_v50  ;;  %v2090_v16 = vunpack.c.l.b16 %v2022_v8  ;;  %v7373_v61 = vld [vmem:[#allocation5 + $0x5e0] sm:$0xff] }
  0xa2   :  { %2206 = vmatpush.bf16.msra.mxu2 %v7332_v48  ;;  %1808 = vmatmul.bf16.gmra.mxu3 %v1675_v41  ;;  %v7368_v48 = vld [vmem:[#allocation5 + $0x5b8] sm:$0xff]  ;;  %v2092_v20 = vunpack.c.l.b16 %v2032_v9 }
  0xa3   :  { %2225 = vmatpush.bf16.msra.mxu3 %v7340_v40  ;;  %v7376_v40 = vld [vmem:[#allocation5 + $0x5f8] sm:$0xff] }
  0xa4   :  { %1966 = vmatpush.bf16.msra.mxu0 %v7313_v18  ;;  %v2045_v18 = vrot.slane %v7967_v38, 5 }
  0xa5   :  { %1985 = vmatpush.bf16.msra.mxu1 %v7321_v32  ;;  %v2049_v32 = vrot.slane %v7961_v24, 4 }
  0xa6   :  { %2207 = vmatpush.bf16.msra.mxu2 %v7331_v23  ;;  %v2091_v23 = vunpack.c.h.b16 %v2022_v8 }
  0xa7   :  { %2226 = vmatpush.bf16.msra.mxu3 %v7339_v25  ;;  %v2093_v25 = vunpack.c.h.b16 %v2032_v9 }
  0xa8   :  { %1967 = vmatpush.bf16.msra.mxu0 %v7312_v52  ;;  %v2040_v52 = vor.u32 %v2039_v31, %v2036_v30 }
  0xa9   :  { %1986 = vmatpush.bf16.msra.mxu1 %v7320_v56  ;;  %v2099_v47 = vpack.c.b16 %v2093_v25, %v2091_v23  ;;  %v2050_v56 = vor.u32 %v2049_v32, %v2045_v18  ;;  %v1855_v23 = vunpack.c.l.b16 %v7958_v5  ;;  %v1856_v25 = vunpack.c.h.b16 %v7958_v5 }
  0xaa   :  { %2208 = vmatpush.bf16.msra.mxu2 %v7330_v42  ;;  %v2041_v4 = vrot.slane %v2040_v52, 4  ;;  %v2464_v32 = vrot.slane %v7991_v7, 5 }
  0xab   :  { %2227 = vmatpush.bf16.msra.mxu3 %v7338_v46  ;;  %v2098_v46 = vpack.c.b16 %v2092_v20, %v2090_v16  ;;  %v2051_v50 = vrot.slane %v2050_v56, 4  ;;  %v7364_v16 = vld [vmem:[#allocation5 + $0x598] sm:$0xff]  ;;  %v1859_v56 = vpack.c.b16 %v1855_v23, %v342_v44  ;;  %v8040_v23 = vld [vmem:[#allocation2 + $0x30] sm:$0xee] }
  0xac   :  { %1968 = vmatpush.bf16.msra.mxu0 %v7311_v0  ;;  %v303_v6 = vpop.f32.mrf.mxu0  ;;  %v7372_v20 = vld [vmem:[#allocation5 + $0x5d8] sm:$0xff] }
  0xad   :  { %1987 = vmatpush.bf16.msra.mxu1 %v7319_v21  ;;  %v322_v41 = vpop.f32.mrf.mxu1 }
  0xae   :  { %2209 = vmatpush.bf16.msra.mxu2 %v7329_v58  ;;  %v323_v42 = vadd.f32 %v322_v41, %v303_v6  ;;  %v2053_v58 = vshll.u32 %v8006_v39, 16 }
  0xaf   :  { %2228 = vmatpush.bf16.msra.mxu3 %v7337_v60  ;;  %v7350_v60 = vld [vmem:[#allocation5 + $0x528] sm:$0xff]  ;;  %1969 = vmatmul.bf16.vlgmr.msra.gmra.mxu0 %v1857_v63  ;;  %v2465_v63 = vrot.slane %v7988_v3, 6 }
  0xb0   :  { %2411 = vmatpush.bf16.msrb.mxu0 %v7352_v1  ;;  %1988 = vmatmul.bf16.vlgmr.msra.gmra.mxu1 %v1858_v29  ;;  %v2055_v0 = vrot.slane %v2053_v58, 5  ;;  %v2456_v1 = vshrl.u32 %v8013_v17, 16  ;;  %v2473_v29 = vshll.u32 %v8017_v12, 16  ;;  %v1860_v58 = vpack.c.b16 %v1856_v25, %v343_v53  ;;  %v7370_v53 = vld [vmem:[#allocation5 + $0x5c8] sm:$0xff]  ;;  %v7361_v25 = vld [vmem:[#allocation5 + $0x580] sm:$0xff] }
  0xb1   :  { %2430 = vmatpush.bf16.msrb.mxu1 %v7360_v2  ;;  %2210 = vmatmul.bf16.vlgmr.msra.gmra.mxu2 %v2098_v46  ;;  %v2459_v2 = vshll.u32 %v8013_v17, 16 }
  0xb2   :  { %2646 = vmatpush.bf16.msrb.mxu2 %v7368_v48  ;;  %2229 = vmatmul.bf16.vlgmr.msra.gmra.mxu3 %v2099_v47  ;;  %v7349_v48 = vld [vmem:[#allocation5 + $0x520] sm:$0xff]  ;;  %v2458_v30 = vrot.slane %v2456_v1, 5  ;;  %v7363_v47 = vld [vmem:[#allocation5 + $0x590] sm:$0xff] }
  0xb3   :  { %2665 = vmatpush.bf16.msrb.mxu3 %v7376_v40  ;;  %v7357_v40 = vld [vmem:[#allocation5 + $0x560] sm:$0xff]  ;;  %v2461_v31 = vrot.slane %v2459_v2, 6 }
  0xb4   :  { %2412 = vmatpush.bf16.msrb.mxu0 %v7351_v27  ;;  %v457_v21 = vpop.f32.mrf.mxu2  ;;  %v305_v9 = vpop.f32.mrf.mxu0  ;;  %v7348_v27 = vld [vmem:[#allocation5 + $0x518] sm:$0xff] }
  0xb5   :  { %2431 = vmatpush.bf16.msrb.mxu1 %v7359_v28  ;;  %v476_v49 = vpop.f32.mrf.mxu3  ;;  %v458_v8 = vadd.f32 %v457_v21, %v323_v42  ;;  %v324_v10 = vpop.f32.mrf.mxu1  ;;  %v7356_v28 = vld [vmem:[#allocation5 + $0x558] sm:$0xff]  ;;  %v2466_v21 = vor.u32 %v2465_v63, %v2464_v32 }
  0xb6   :  { %2647 = vmatpush.bf16.msrb.mxu2 %v7367_v14  ;;  %v325_v11 = vadd.f32 %v324_v10, %v305_v9  ;;  %v2046_v14 = vsel %vm7781_vm2, %v2041_v4, %v2045_v18  ;;  %v2470_v18 = vshrl.u32 %v8017_v12, 16  ;;  %v7354_v9 = vld [vmem:[#allocation5 + $0x548] sm:$0xff]  ;;  %v6175_v10 = vrot.slane %v8013_v17, 9  ;;  %v7345_v17 = vld [vmem:[#allocation5 + $0x500] sm:$0xff] }
  0xb7   :  { %2666 = vmatpush.bf16.msrb.mxu3 %v7375_v15  ;;  %v8019_v13 = vadd.f32 %v476_v49, %v458_v8  ;;  %v2056_v15 = vsel %vm7781_vm2, %v2051_v50, %v2055_v0  ;;  %v2094_v6 = vunpack.c.l.b16 %v2046_v14  ;;  %v2095_v42 = vunpack.c.h.b16 %v2046_v14  ;;  %v7346_v8 = vld [vmem:[#allocation5 + $0x508] sm:$0xff] }
  0xb8   :  { %2413 = vmatpush.bf16.msrb.mxu0 %v7350_v60  ;;  %v2096_v41 = vunpack.c.l.b16 %v2056_v15  ;;  %v2097_v46 = vunpack.c.h.b16 %v2056_v15  ;;  %v7347_v60 = vld [vmem:[#allocation5 + $0x510] sm:$0xff]  ;;  %v2472_v49 = vrot.slane %v2470_v18, 5  ;;  %v2257_v14 = vrot.slane %v7995_v33, 5 }
  0xb9   :  { %2432 = vmatpush.bf16.msrb.mxu1 %v7358_v55  ;;  %v7355_v55 = vld [vmem:[#allocation5 + $0x550] sm:$0xff] }
  0xba   :  { %2648 = vmatpush.bf16.msrb.mxu2 %v7366_v45  ;;  %v7371_v45 = vld [vmem:[#allocation5 + $0x5d0] sm:$0xff]  ;;  %v2100_v1 = vpack.c.b16 %v2096_v41, %v2094_v6  ;;  %v2101_v2 = vpack.c.b16 %v2097_v46, %v2095_v42  ;;  %v7400_v42 = vld [vmem:[#allocation5 + $0x6b8] sm:$0xff] }
  0xbb   :  { %2667 = vmatpush.bf16.msrb.mxu3 %v7374_v51  ;;  %v7408_v46 = vld [vmem:[#allocation5 + $0x6f8] sm:$0xff] }
  0xbc   :  { %2414 = vmatpush.bf16.msrb.mxu0 %v7349_v48  ;;  %v459_v51 = vpop.f32.mrf.mxu2  ;;  %v308_v50 = vpop.f32.mrf.mxu0  ;;  %v2475_v48 = vrot.slane %v2473_v29, 6 }
  0xbd   :  { %2433 = vmatpush.bf16.msrb.mxu1 %v7357_v40  ;;  %v478_v52 = vpop.f32.mrf.mxu3  ;;  %v460_v4 = vadd.f32 %v459_v51, %v325_v11  ;;  %v327_v0 = vpop.f32.mrf.mxu1 }
  0xbe   :  { %2649 = vmatpush.bf16.msrb.mxu2 %v7365_v57  ;;  %v2254_v57 = vrot.slane %v7976_v62, 5  ;;  %v328_v40 = vadd.f32 %v327_v0, %v308_v50 }
  0xbf   :  { %2668 = vmatpush.bf16.msrb.mxu3 %v7373_v61  ;;  %v2462_v61 = vor.u32 %v2461_v31, %v2458_v30  ;;  %v8036_v44 = vadd.f32 %v478_v52, %v460_v4  ;;  %1974 = vmatmul.bf16.gmra.mxu0 %v1859_v56  ;;  %v7353_v31 = vld [vmem:[#allocation5 + $0x540] sm:$0xff]  ;;  %v7384_v52 = vld [vmem:[#allocation5 + $0x638] sm:$0xff] }
  0xc0   :  { %2415 = vmatpush.bf16.msrb.mxu0 %v7348_v27  ;;  %v2256_v11 = vrot.slane %v2254_v57, 4  ;;  %1993 = vmatmul.bf16.gmra.mxu1 %v1860_v58  ;;  %v7369_v27 = vld [vmem:[#allocation5 + $0x5c0] sm:$0xff]  ;;  %v2255_v33 = vsel %vm7840_vm7, %v6175_v10, %v2254_v57  ;;  %v7392_v56 = vld [vmem:[#allocation5 + $0x678] sm:$0xff]  ;;  %v8054_v57 = vld [vmem:[#allocation2 + $0x40] sm:$0x33] }
  0xc1   :  { %2434 = vmatpush.bf16.msrb.mxu1 %v7356_v28  ;;  %v2463_v15 = vrot.slane %v2462_v61, 4  ;;  %2215 = vmatmul.bf16.gmra.mxu2 %v2100_v1  ;;  %v2300_v61 = vunpack.c.h.b16 %v2255_v33  ;;  %v2493_v10 = vshrl.u32 %v8054_v57, 16 }
  0xc2   :  { %2650 = vmatpush.bf16.msrb.mxu2 %v7364_v16  ;;  %v2468_v16 = vrot.slane %v2466_v21, 4  ;;  %2234 = vmatmul.bf16.gmra.mxu3 %v2101_v2  ;;  %v2258_v32 = vsel %vm7840_vm7, %v2256_v11, %v2257_v14  ;;  %v2496_v11 = vshll.u32 %v8054_v57, 16  ;;  %v2261_v14 = vrot.slane %v7958_v5, 5 }
  0xc3   :  { %2669 = vmatpush.bf16.msrb.mxu3 %v7372_v20  ;;  %v2476_v20 = vor.u32 %v2475_v48, %v2472_v49  ;;  %v2467_v63 = vsel %vm7846_vm8, %v2463_v15, %v2466_v21  ;;  %v2302_v4 = vunpack.c.h.b16 %v2258_v32  ;;  %v7399_v48 = vld [vmem:[#allocation5 + $0x6b0] sm:$0xff] }
  0xc4   :  { %2416 = vmatpush.bf16.msrb.mxu0 %v7347_v60  ;;  %v462_v28 = vpop.f32.mrf.mxu2  ;;  %v310_v29 = vpop.f32.mrf.mxu0  ;;  %v2299_v60 = vunpack.c.l.b16 %v2255_v33  ;;  %v2534_v50 = vunpack.c.l.b16 %v2467_v63  ;;  %v2535_v21 = vunpack.c.h.b16 %v2467_v63 }
  0xc5   :  { %2435 = vmatpush.bf16.msrb.mxu1 %v7355_v55  ;;  %v481_v30 = vpop.f32.mrf.mxu3  ;;  %v463_v18 = vadd.f32 %v462_v28, %v328_v40  ;;  %v329_v6 = vpop.f32.mrf.mxu1  ;;  %v2477_v41 = vsel %vm7846_vm8, %v2468_v16, %v2476_v20  ;;  %v2301_v55 = vunpack.c.l.b16 %v2258_v32  ;;  %v7407_v40 = vld [vmem:[#allocation5 + $0x6f0] sm:$0xff]  ;;  %v6176_v32 = vrot.slane %v8040_v23, 9 }
  0xc6   :  { %2651 = vmatpush.bf16.msrb.mxu2 %v7363_v47  ;;  %v2479_v47 = vshrl.u32 %v8040_v23, 16  ;;  %v330_v51 = vadd.f32 %v329_v6, %v310_v29  ;;  %v2536_v0 = vunpack.c.l.b16 %v2477_v41  ;;  %v2537_v49 = vunpack.c.h.b16 %v2477_v41 }
  0xc7   :  { %2670 = vmatpush.bf16.msrb.mxu3 %v7371_v45  ;;  %v2482_v45 = vshll.u32 %v8040_v23, 16  ;;  %v8052_v58 = vadd.f32 %v481_v30, %v463_v18  ;;  %v2307_v20 = vpack.c.b16 %v2301_v55, %v2299_v60  ;;  %v2495_v18 = vrot.slane %v2493_v10, 5  ;;  %v8066_v60 = vld [vmem:[#allocation2 + $0x8] sm:$0xcc]  ;;  %v7397_v55 = vld [vmem:[#allocation5 + $0x6a0] sm:$0xff] }
  0xc8   :  { %2417 = vmatpush.bf16.msrb.mxu0 %v7346_v8  ;;  %v2481_v1 = vrot.slane %v2479_v47, 5  ;;  %v2487_v8 = vrot.slane %v7961_v24, 5  ;;  %v2543_v30 = vpack.c.b16 %v2537_v49, %v2535_v21  ;;  %v2498_v29 = vrot.slane %v2496_v11, 6  ;;  %v7389_v21 = vld [vmem:[#allocation5 + $0x660] sm:$0xff]  ;;  %v8076_v11 = vld [vmem:[#allocation2 + $0x18] sm:$0x77] }
  0xc9   :  { %2436 = vmatpush.bf16.msrb.mxu1 %v7354_v9  ;;  %v2484_v2 = vrot.slane %v2482_v45, 6  ;;  %v2488_v9 = vrot.slane %v7967_v38, 6  ;;  %v2263_v47 = vrot.slane %v2261_v14, 4  ;;  %v2264_v45 = vrot.slane %v8006_v39, 5 }
  0xca   :  { %2652 = vmatpush.bf16.msrb.mxu2 %v7362_v43  ;;  %v7383_v43 = vld [vmem:[#allocation5 + $0x630] sm:$0xff]  ;;  %v2898_v49 = vshrl.u32 %v8066_v60, 16 }
  0xcb   :  { %2671 = vmatpush.bf16.msrb.mxu3 %v7370_v53  ;;  %v7391_v53 = vld [vmem:[#allocation5 + $0x670] sm:$0xff]  ;;  %v2489_v63 = vor.u32 %v2488_v9, %v2487_v8  ;;  %v2265_v39 = vsel %vm7840_vm7, %v2263_v47, %v2264_v45 }
  0xcc   :  { %2418 = vmatpush.bf16.msrb.mxu0 %v7345_v17  ;;  %v464_v15 = vpop.f32.mrf.mxu2  ;;  %v2485_v17 = vor.u32 %v2484_v2, %v2481_v1  ;;  %v2305_v9 = vunpack.c.l.b16 %v2265_v39 }
  0xcd   :  { %2437 = vmatpush.bf16.msrb.mxu1 %v7353_v31  ;;  %v483_v16 = vpop.f32.mrf.mxu3  ;;  %v465_v28 = vadd.f32 %v464_v15, %v330_v51  ;;  %v663_v31 = vpop.f32.mrf.mxu0  ;;  %v7382_v51 = vld [vmem:[#allocation5 + $0x628] sm:$0xff] }
  0xce   :  { %2653 = vmatpush.bf16.msrb.mxu2 %v7361_v25  ;;  %v2308_v25 = vpack.c.b16 %v2302_v4, %v2300_v61  ;;  %v682_v33 = vpop.f32.mrf.mxu1  ;;  %v2486_v23 = vrot.slane %v2485_v17, 4  ;;  %v7405_v61 = vld [vmem:[#allocation5 + $0x6e0] sm:$0xff]  ;;  %v2262_v4 = vsel %vm7840_vm7, %v6176_v32, %v2261_v14  ;;  %v7388_v17 = vld [vmem:[#allocation5 + $0x658] sm:$0xff]  ;;  %v2906_v32 = vrot.slane %v7991_v7, 6 }
  0xcf   :  { %2672 = vmatpush.bf16.msrb.mxu3 %v7369_v27  ;;  %v2542_v27 = vpack.c.b16 %v2536_v0, %v2534_v50  ;;  %v8062_v6 = vadd.f32 %v483_v16, %v465_v28  ;;  %v683_v41 = vadd.f32 %v682_v33, %v663_v31  ;;  %2419 = vmatmul.bf16.vlgmr.msrb.gmra.mxu0 %v2307_v20  ;;  %v2491_v50 = vrot.slane %v2489_v63, 4 }
  0xd0   :  { %2853 = vmatpush.bf16.msra.mxu0 %v7384_v52  ;;  %v7390_v52 = vld [vmem:[#allocation5 + $0x668] sm:$0xff]  ;;  %2438 = vmatmul.bf16.vlgmr.msrb.gmra.mxu1 %v2308_v25  ;;  %v2499_v0 = vor.u32 %v2498_v29, %v2495_v18  ;;  %v2303_v8 = vunpack.c.l.b16 %v2262_v4  ;;  %v2490_v10 = vsel %vm7846_vm8, %v2486_v23, %v2489_v63  ;;  %v2304_v15 = vunpack.c.h.b16 %v2262_v4  ;;  %v7396_v25 = vld [vmem:[#allocation5 + $0x698] sm:$0xff] }
  0xd1   :  { %2872 = vmatpush.bf16.msra.mxu1 %v7392_v56  ;;  %v692_v56 = vadd.f32 %v683_v41, %v8019_v13  ;;  %2654 = vmatmul.bf16.vlgmr.msrb.gmra.mxu2 %v2542_v27  ;;  %v7381_v13 = vld [vmem:[#allocation5 + $0x620] sm:$0xff]  ;;  %v2306_v16 = vunpack.c.h.b16 %v2265_v39  ;;  %v7404_v27 = vld [vmem:[#allocation5 + $0x6d8] sm:$0xff]  ;;  %v2900_v31 = vrot.slane %v2898_v49, 6  ;;  %v2907_v18 = vrot.slane %v7988_v3, 7 }
  0xd2   :  { %3088 = vmatpush.bf16.msra.mxu2 %v7400_v42  ;;  %v7398_v42 = vld [vmem:[#allocation5 + $0x6a8] sm:$0xff]  ;;  %2673 = vmatmul.bf16.vlgmr.msrb.gmra.mxu3 %v2543_v30  ;;  %v2500_v20 = vsel %vm7846_vm8, %v2491_v50, %v2499_v0  ;;  %v7380_v30 = vld [vmem:[#allocation5 + $0x618] sm:$0xff]  ;;  %v2912_v29 = vshrl.u32 %v8076_v11, 16  ;;  %v2915_v41 = vshll.u32 %v8076_v11, 16  ;;  %v2539_v47 = vunpack.c.h.b16 %v2490_v10 }
  0xd3   :  { %3107 = vmatpush.bf16.msra.mxu3 %v7408_v46  ;;  %v7406_v46 = vld [vmem:[#allocation5 + $0x6e8] sm:$0xff]  ;;  %v2541_v45 = vunpack.c.h.b16 %v2500_v20  ;;  %v2310_v23 = vpack.c.b16 %v2306_v16, %v2304_v15  ;;  %v2908_v0 = vor.u32 %v2907_v18, %v2906_v32  ;;  %v2699_v16 = vrot.slane %v8017_v12, 6  ;;  %v7377_v12 = vld [vmem:[#allocation5 + $0x600] sm:$0xff] }
  0xd4   :  { %2854 = vmatpush.bf16.msra.mxu0 %v7383_v43 }
  0xd5   :  { %2873 = vmatpush.bf16.msra.mxu1 %v7391_v53  ;;  %v920_v1 = vpop.f32.mrf.mxu3  ;;  %v665_v43 = vpop.f32.mrf.mxu0 }
  0xd6   :  { %3089 = vmatpush.bf16.msra.mxu2 %v7399_v48  ;;  %v2901_v48 = vshll.u32 %v8066_v60, 16  ;;  %v684_v53 = vpop.f32.mrf.mxu1 }
  0xd7   :  { %3108 = vmatpush.bf16.msra.mxu3 %v7407_v40  ;;  %v901_v40 = vpop.f32.mrf.mxu2  ;;  %v685_v14 = vadd.f32 %v684_v53, %v665_v43  ;;  %v7394_v53 = vld [vmem:[#allocation5 + $0x688] sm:$0xff] }
  0xd8   :  { %2855 = vmatpush.bf16.msra.mxu0 %v7382_v51  ;;  %v921_v2 = vadd.f32 %v920_v1, %v901_v40  ;;  %v2903_v33 = vrot.slane %v2901_v48, 7  ;;  %v7395_v51 = vld [vmem:[#allocation5 + $0x690] sm:$0xff] }
  0xd9   :  { %2874 = vmatpush.bf16.msra.mxu1 %v7390_v52  ;;  %v693_v63 = vadd.f32 %v685_v14, %v8036_v44  ;;  %v7403_v52 = vld [vmem:[#allocation5 + $0x6d0] sm:$0xff]  ;;  %v7386_v14 = vld [vmem:[#allocation5 + $0x648] sm:$0xff] }
  0xda   :  { %3090 = vmatpush.bf16.msra.mxu2 %v7398_v42  ;;  %v8080_v28 = vadd.f32 %v921_v2, %v692_v56  ;;  %v2538_v42 = vunpack.c.l.b16 %v2490_v10  ;;  %v2309_v56 = vpack.c.b16 %v2305_v9, %v2303_v8  ;;  %v7387_v44 = vld [vmem:[#allocation5 + $0x650] sm:$0xff]  ;;  %v2904_v50 = vor.u32 %v2903_v33, %v2900_v31  ;;  %v7402_v8 = vld [vmem:[#allocation5 + $0x6c8] sm:$0xff]  ;;  %v7401_v31 = vld [vmem:[#allocation5 + $0x6c0] sm:$0xff] }
  0xdb   :  { %3109 = vmatpush.bf16.msra.mxu3 %v7406_v46  ;;  %v2540_v46 = vunpack.c.l.b16 %v2500_v20  ;;  %v2545_v2 = vpack.c.b16 %v2541_v45, %v2539_v47  ;;  %v6305_v9 = vrot.slane %v8066_v60, 10  ;;  %v7393_v60 = vld [vmem:[#allocation5 + $0x680] sm:$0xff] }
  0xdc   :  { %2856 = vmatpush.bf16.msra.mxu0 %v7381_v13  ;;  %v2914_v13 = vrot.slane %v2912_v29, 6 }
  0xdd   :  { %2875 = vmatpush.bf16.msra.mxu1 %v7389_v21  ;;  %v922_v39 = vpop.f32.mrf.mxu3  ;;  %v2917_v21 = vrot.slane %v2915_v41, 7  ;;  %v668_v48 = vpop.f32.mrf.mxu0  ;;  %v2544_v1 = vpack.c.b16 %v2540_v46, %v2538_v42  ;;  %v7434_v42 = vld [vmem:[#allocation5 + $0x7b8] sm:$0xff] }
  0xde   :  { %3091 = vmatpush.bf16.msra.mxu2 %v7397_v55  ;;  %v7379_v55 = vld [vmem:[#allocation5 + $0x610] sm:$0xff]  ;;  %v687_v40 = vpop.f32.mrf.mxu1  ;;  %v7442_v46 = vld [vmem:[#allocation5 + $0x7f8] sm:$0xff] }
  0xdf   :  { %3110 = vmatpush.bf16.msra.mxu3 %v7405_v61  ;;  %v2696_v61 = vrot.slane %v7976_v62, 6  ;;  %v903_v4 = vpop.f32.mrf.mxu2  ;;  %v688_v43 = vadd.f32 %v687_v40, %v668_v48  ;;  %v7378_v62 = vld [vmem:[#allocation5 + $0x608] sm:$0xff]  ;;  %2424 = vmatmul.bf16.gmra.mxu0 %v2309_v56 }
  0xe0   :  { %2857 = vmatpush.bf16.msra.mxu0 %v7380_v30  ;;  %v923_v49 = vadd.f32 %v922_v39, %v903_v4  ;;  %2443 = vmatmul.bf16.gmra.mxu1 %v2310_v23  ;;  %v2918_v30 = vor.u32 %v2917_v21, %v2914_v13 }
  0xe1   :  { %2876 = vmatpush.bf16.msra.mxu1 %v7388_v17  ;;  %v2698_v15 = vrot.slane %v2696_v61, 4  ;;  %v694_v20 = vadd.f32 %v688_v43, %v8052_v58  ;;  %2659 = vmatmul.bf16.gmra.mxu2 %v2544_v1  ;;  %v8093_v17 = vld [vmem:[#allocation2 + $0x30] sm:$0xcc]  ;;  %v2697_v33 = vsel %vm7891_vm13, %v6305_v9, %v2696_v61  ;;  %v7441_v43 = vld [vmem:[#allocation5 + $0x7f0] sm:$0xff] }
  0xe2   :  { %3092 = vmatpush.bf16.msra.mxu2 %v7396_v25  ;;  %v8089_v10 = vadd.f32 %v923_v49, %v693_v63  ;;  %v2905_v25 = vrot.slane %v2904_v50, 4  ;;  %2678 = vmatmul.bf16.gmra.mxu3 %v2545_v2  ;;  %v7385_v58 = vld [vmem:[#allocation5 + $0x640] sm:$0xff]  ;;  %v2921_v47 = vshrl.u32 %v8093_v17, 16  ;;  %v2924_v45 = vshll.u32 %v8093_v17, 16  ;;  %v7433_v2 = vld [vmem:[#allocation5 + $0x7b0] sm:$0xff] }
  0xe3   :  { %3111 = vmatpush.bf16.msra.mxu3 %v7404_v27  ;;  %v2910_v27 = vrot.slane %v2908_v0, 4  ;;  %v2700_v32 = vsel %vm7891_vm13, %v2698_v15, %v2699_v16  ;;  %v2741_v23 = vunpack.c.l.b16 %v2697_v33  ;;  %v2742_v39 = vunpack.c.h.b16 %v2697_v33  ;;  %v7415_v9 = vld [vmem:[#allocation5 + $0x730] sm:$0xff] }
  0xe4   :  { %2858 = vmatpush.bf16.msra.mxu0 %v7379_v55  ;;  %v2909_v29 = vsel %vm7898_vm14, %v2905_v25, %v2908_v0  ;;  %v7416_v55 = vld [vmem:[#allocation5 + $0x738] sm:$0xff]  ;;  %v2743_v4 = vunpack.c.l.b16 %v2700_v32  ;;  %v2744_v50 = vunpack.c.h.b16 %v2700_v32  ;;  %v8105_v0 = vld [vmem:[#allocation2 + $0x40] sm:$0x77]  ;;  %v2930_v15 = vrot.slane %v7967_v38, 7 }
  0xe5   :  { %2877 = vmatpush.bf16.msra.mxu1 %v7387_v44  ;;  %v925_v18 = vpop.f32.mrf.mxu3  ;;  %v2919_v41 = vsel %vm7898_vm14, %v2910_v27, %v2918_v30  ;;  %v7424_v44 = vld [vmem:[#allocation5 + $0x778] sm:$0xff]  ;;  %v2976_v21 = vunpack.c.l.b16 %v2909_v29  ;;  %v2977_v48 = vunpack.c.h.b16 %v2909_v29  ;;  %v2935_v16 = vshrl.u32 %v8105_v0, 16 }
  0xe6   :  { %3093 = vmatpush.bf16.msra.mxu2 %v7395_v51  ;;  %v689_v56 = vpop.f32.mrf.mxu1  ;;  %v2978_v49 = vunpack.c.l.b16 %v2919_v41  ;;  %v2979_v1 = vunpack.c.h.b16 %v2919_v41  ;;  %v2750_v25 = vpack.c.b16 %v2744_v50, %v2742_v39  ;;  %v2703_v27 = vrot.slane %v7958_v5, 6  ;;  %v7414_v5 = vld [vmem:[#allocation5 + $0x728] sm:$0xff]  ;;  %v7439_v39 = vld [vmem:[#allocation5 + $0x7e0] sm:$0xff] }
  0xe7   :  { %3112 = vmatpush.bf16.msra.mxu3 %v7403_v52  ;;  %v906_v63 = vpop.f32.mrf.mxu2  ;;  %v670_v52 = vpop.f32.mrf.mxu0  ;;  %v7413_v50 = vld [vmem:[#allocation5 + $0x720] sm:$0xff] }
  0xe8   :  { %2859 = vmatpush.bf16.msra.mxu0 %v7378_v62  ;;  %v926_v51 = vadd.f32 %v925_v18, %v906_v63  ;;  %v690_v61 = vadd.f32 %v689_v56, %v670_v52  ;;  %v7423_v62 = vld [vmem:[#allocation5 + $0x770] sm:$0xff]  ;;  %v2985_v33 = vpack.c.b16 %v2979_v1, %v2977_v48  ;;  %v2937_v18 = vrot.slane %v2935_v16, 6 }
  0xe9   :  { %2878 = vmatpush.bf16.msra.mxu1 %v7386_v14  ;;  %v2929_v14 = vrot.slane %v7961_v24, 6  ;;  %v2705_v52 = vrot.slane %v2703_v27, 4  ;;  %v2706_v56 = vrot.slane %v8054_v57, 6 }
  0xea   :  { %3094 = vmatpush.bf16.msra.mxu2 %v7394_v53  ;;  %v8107_v13 = vadd.f32 %v926_v51, %v694_v20  ;;  %v695_v40 = vadd.f32 %v690_v61, %v8062_v6  ;;  %v2923_v53 = vrot.slane %v2921_v47, 6  ;;  %v2938_v20 = vshll.u32 %v8105_v0, 16 }
  0xeb   :  { %3113 = vmatpush.bf16.msra.mxu3 %v7402_v8  ;;  %v2926_v8 = vrot.slane %v2924_v45, 7  ;;  %v2749_v6 = vpack.c.b16 %v2743_v4, %v2741_v23  ;;  %v2931_v38 = vor.u32 %v2930_v15, %v2929_v14  ;;  %v7422_v45 = vld [vmem:[#allocation5 + $0x768] sm:$0xff]  ;;  %v6306_v51 = vrot.slane %v8093_v17, 10  ;;  %v7431_v4 = vld [vmem:[#allocation5 + $0x7a0] sm:$0xff]  ;;  %v7438_v14 = vld [vmem:[#allocation5 + $0x7d8] sm:$0xff] }
  0xec   :  { %2860 = vmatpush.bf16.msra.mxu0 %v7377_v12  ;;  %v2940_v29 = vrot.slane %v2938_v20, 7  ;;  %v7421_v17 = vld [vmem:[#allocation5 + $0x760] sm:$0xff]  ;;  %v8128_v15 = vld [vmem:[#allocation2 + $0x18] sm:$0xff] }
  0xed   :  { %2879 = vmatpush.bf16.msra.mxu1 %v7385_v58  ;;  %v2927_v12 = vor.u32 %v2926_v8, %v2923_v53  ;;  %v2704_v57 = vsel %vm7891_vm13, %v6306_v51, %v2703_v27  ;;  %v7412_v27 = vld [vmem:[#allocation5 + $0x718] sm:$0xff]  ;;  %v7616_v51 = vld [vmem:[#allocation2 + $0x10] sm:$0xff] }
  0xee   :  { %3095 = vmatpush.bf16.msra.mxu2 %v7393_v60  ;;  %v927_v60 = vpop.f32.mrf.mxu3  ;;  %v1130_v63 = vpop.f32.mrf.mxu1  ;;  %v2941_v61 = vor.u32 %v2940_v29, %v2937_v18  ;;  %v2745_v8 = vunpack.c.l.b16 %v2704_v57  ;;  %v2746_v20 = vunpack.c.h.b16 %v2704_v57  ;;  %v7436_v57 = vld [vmem:[#allocation5 + $0x7c8] sm:$0xff] }
  0xef   :  { %3114 = vmatpush.bf16.msra.mxu3 %v7401_v31  ;;  %v908_v30 = vpop.f32.mrf.mxu2  ;;  %v2984_v31 = vpack.c.b16 %v2978_v49, %v2976_v21  ;;  %v1111_v32 = vpop.f32.mrf.mxu0  ;;  %2861 = vmatmul.bf16.vlgmr.msra.gmra.mxu0 %v2749_v6 }
  0xf0   :  { %3295 = vmatpush.bf16.msrb.mxu0 %v7416_v55  ;;  %v928_v58 = vadd.f32 %v927_v60, %v908_v30  ;;  %v1131_v41 = vadd.f32 %v1130_v63, %v1111_v32  ;;  %2880 = vmatmul.bf16.vlgmr.msra.gmra.mxu1 %v2750_v25  ;;  %v2928_v55 = vrot.slane %v2927_v12, 4  ;;  %v7420_v30 = vld [vmem:[#allocation5 + $0x758] sm:$0xff]  ;;  %v8134_v32 = vshrl.u32 %v8128_v15, 16  ;;  %v7429_v63 = vld [vmem:[#allocation5 + $0x790] sm:$0xff] }
  0xf1   :  { %3314 = vmatpush.bf16.msrb.mxu1 %v7424_v44  ;;  %3096 = vmatmul.bf16.vlgmr.msra.gmra.mxu2 %v2984_v31  ;;  %v2933_v44 = vrot.slane %v2931_v38, 4 }
  0xf2   :  { %3518 = vmatpush.bf16.msrb.mxu2 %v7434_v42  ;;  %v7432_v42 = vld [vmem:[#allocation5 + $0x7a8] sm:$0xff]  ;;  %v8115_v47 = vadd.f32 %v928_v58, %v695_v40  ;;  %v1140_v23 = vadd.f32 %v1131_v41, %v8080_v28  ;;  %3115 = vmatmul.bf16.vlgmr.msra.gmra.mxu3 %v2985_v33  ;;  %v2707_v28 = vsel %vm7891_vm13, %v2705_v52, %v2706_v56  ;;  %v3130_v58 = vld [vmem:[#allocation2 + $0x8] sm:$0x88]  ;;  %v7411_v41 = vld [vmem:[#allocation5 + $0x710] sm:$0xff]  ;;  %v3138_v52 = vrot.slane %v7616_v51, 7 }
  0xf3   :  { %3537 = vmatpush.bf16.msrb.mxu3 %v7442_v46  ;;  %v7440_v46 = vld [vmem:[#allocation5 + $0x7e8] sm:$0xff]  ;;  %v2932_v48 = vsel %vm7898_vm14, %v2928_v55, %v2931_v38  ;;  %v2748_v6 = vunpack.c.h.b16 %v2707_v28  ;;  %v7437_v38 = vld [vmem:[#allocation5 + $0x7d0] sm:$0xff]  ;;  %v3340_v56 = vshrl.u32 %v3130_v58, 16 }
  0xf4   :  { %3296 = vmatpush.bf16.msrb.mxu0 %v7415_v9  ;;  %v2747_v9 = vunpack.c.l.b16 %v2707_v28  ;;  %v2980_v25 = vunpack.c.l.b16 %v2932_v48  ;;  %v2981_v33 = vunpack.c.h.b16 %v2932_v48 }
  0xf5   :  { %3315 = vmatpush.bf16.msrb.mxu1 %v7423_v62  ;;  %v7430_v62 = vld [vmem:[#allocation5 + $0x798] sm:$0xff]  ;;  %v2752_v29 = vpack.c.b16 %v2748_v6, %v2746_v20 }
  0xf6   :  { %3519 = vmatpush.bf16.msrb.mxu2 %v7433_v2  ;;  %v1368_v49 = vpop.f32.mrf.mxu3  ;;  %v1132_v2 = vpop.f32.mrf.mxu1  ;;  %v2751_v18 = vpack.c.b16 %v2747_v9, %v2745_v8  ;;  %v7435_v9 = vld [vmem:[#allocation5 + $0x7c0] sm:$0xff] }
  0xf7   :  { %3538 = vmatpush.bf16.msrb.mxu3 %v7441_v43  ;;  %v1349_v21 = vpop.f32.mrf.mxu2  ;;  %v1113_v1 = vpop.f32.mrf.mxu0  ;;  %v2942_v43 = vsel %vm7898_vm14, %v2933_v44, %v2941_v61  ;;  %v3344_v61 = vrot.slane %v7991_v7, 7  ;;  %v6435_v7 = vrot.slane %v3130_v58, 11  ;;  %v7450_v58 = vld [vmem:[#allocation5 + $0x838] sm:$0xff] }
  0xf8   :  { %3297 = vmatpush.bf16.msrb.mxu0 %v7414_v5  ;;  %v1369_v40 = vadd.f32 %v1368_v49, %v1349_v21  ;;  %v1133_v53 = vadd.f32 %v1132_v2, %v1113_v1  ;;  %v2982_v31 = vunpack.c.l.b16 %v2942_v43  ;;  %v2983_v12 = vunpack.c.h.b16 %v2942_v43  ;;  %v7410_v21 = vld [vmem:[#allocation5 + $0x708] sm:$0xff] }
  0xf9   :  { %3316 = vmatpush.bf16.msrb.mxu1 %v7422_v45  ;;  %v7418_v49 = vld [vmem:[#allocation5 + $0x748] sm:$0xff]  ;;  %v3141_v1 = vrot.slane %v8076_v11, 7  ;;  %v6501_v2 = vrot.slane %v3340_v56, 11  ;;  %v3345_v43 = vor.u32 %v3344_v61, %v7988_v3  ;;  %v3139_v6 = vsel %vm7939_vm4, %v6435_v7, %v3138_v52  ;;  %v7475_v56 = vld [vmem:[#allocation5 + $0x8f0] sm:$0xff] }
  0xfa   :  { %3520 = vmatpush.bf16.msrb.mxu2 %v7432_v42  ;;  %v8130_v16 = vadd.f32 %v1369_v40, %v1140_v23  ;;  %v1141_v60 = vadd.f32 %v1133_v53, %v8089_v10  ;;  %v7419_v42 = vld [vmem:[#allocation5 + $0x750] sm:$0xff]  ;;  %v2986_v10 = vpack.c.b16 %v2982_v31, %v2980_v25  ;;  %v2987_v45 = vpack.c.b16 %v2983_v12, %v2981_v33  ;;  %v7468_v25 = vld [vmem:[#allocation5 + $0x8b8] sm:$0xff] }
  0xfb   :  { %3539 = vmatpush.bf16.msrb.mxu3 %v7440_v46  ;;  %v3140_v40 = vrot.slane %v3138_v52, 4  ;;  %v3347_v53 = vrot.slane %v3344_v61, 4  ;;  %v3346_v33 = vsel %vm7946_vm5, %v6501_v2, %v3345_v43  ;;  %v7467_v52 = vld [vmem:[#allocation5 + $0x8b0] sm:$0xff] }
  0xfc   :  { %3298 = vmatpush.bf16.msrb.mxu0 %v7413_v50  ;;  %v7457_v61 = vld [vmem:[#allocation5 + $0x870] sm:$0xff] }
  0xfd   :  { %3317 = vmatpush.bf16.msrb.mxu1 %v7421_v17  ;;  %v7428_v17 = vld [vmem:[#allocation5 + $0x788] sm:$0xff]  ;;  %v3142_v3 = vsel %vm7939_vm4, %v3140_v40, %v3141_v1 }
  0xfe   :  { %3521 = vmatpush.bf16.msrb.mxu2 %v7431_v4  ;;  %v1370_v5 = vpop.f32.mrf.mxu3  ;;  %v1135_v44 = vpop.f32.mrf.mxu1  ;;  %v3351_v4 = vrot.slane %v8134_v32, 7 }
  0xff   :  { %3540 = vmatpush.bf16.msrb.mxu3 %v7439_v39  ;;  %v1351_v46 = vpop.f32.mrf.mxu2  ;;  %v1116_v55 = vpop.f32.mrf.mxu0  ;;  %v8139_v39 = vshll.u32 %v8128_v15, 16  ;;  %2866 = vmatmul.bf16.gmra.mxu0 %v2751_v18  ;;  %v8160_v18 = vld [vmem:[#allocation2 + $0x40] sm:$0xff] }
 0x100   :  { %3299 = vmatpush.bf16.msrb.mxu0 %v7412_v27  ;;  %v1371_v23 = vadd.f32 %v1370_v5, %v1351_v46  ;;  %v1136_v50 = vadd.f32 %v1135_v44, %v1116_v55  ;;  %2885 = vmatmul.bf16.gmra.mxu1 %v2752_v29  ;;  %v7476_v27 = vld [vmem:[#allocation5 + $0x8f8] sm:$0xff]  ;;  %v3184_v46 = vunpack.c.h.b16 %v3139_v6  ;;  %v7449_v44 = vld [vmem:[#allocation5 + $0x830] sm:$0xff] }
 0x101   :  { %3318 = vmatpush.bf16.msrb.mxu1 %v7420_v30  ;;  %3101 = vmatmul.bf16.gmra.mxu2 %v2986_v10  ;;  %v8149_v8 = vor.u32 %v8139_v39, %v3351_v4  ;;  %v3186_v10 = vunpack.c.h.b16 %v3142_v3 }
 0x102   :  { %3522 = vmatpush.bf16.msrb.mxu2 %v7430_v62  ;;  %v8141_v28 = vadd.f32 %v1371_v23, %v1141_v60  ;;  %v1142_v48 = vadd.f32 %v1136_v50, %v8107_v13  ;;  %3120 = vmatmul.bf16.gmra.mxu3 %v2987_v45  ;;  %v7427_v13 = vld [vmem:[#allocation5 + $0x780] sm:$0xff]  ;;  %v3406_v45 = vunpack.c.l.b16 %v3346_v33  ;;  %v3407_v23 = vunpack.c.h.b16 %v3346_v33 }
 0x103   :  { %3541 = vmatpush.bf16.msrb.mxu3 %v7438_v14  ;;  %v7409_v62 = vld [vmem:[#allocation5 + $0x700] sm:$0xff]  ;;  %v3355_v12 = vsel %vm7946_vm5, %v3347_v53, %v8149_v8  ;;  %v3192_v7 = vpack.c.b16 %v3186_v10, %v3184_v46 }
 0x104   :  { %3300 = vmatpush.bf16.msrb.mxu0 %v7411_v41  ;;  %v7417_v14 = vld [vmem:[#allocation5 + $0x740] sm:$0xff]  ;;  %v3183_v41 = vunpack.c.l.b16 %v3139_v6  ;;  %v3408_v51 = vunpack.c.l.b16 %v3355_v12  ;;  %v3409_v55 = vunpack.c.h.b16 %v3355_v12  ;;  %v3364_v12 = vrot.slane %v1626_v35, 4 }
 0x105   :  { %3319 = vmatpush.bf16.msrb.mxu1 %v7419_v42  ;;  %v3185_v42 = vunpack.c.l.b16 %v3142_v3  ;;  %v3131_v50 = vld [vmem:[#allocation2 + $0x30] sm:$0x88]  ;;  %v7448_v3 = vld [vmem:[#allocation5 + $0x828] sm:$0xff] }
 0x106   :  { %3523 = vmatpush.bf16.msrb.mxu2 %v7429_v63  ;;  %v1373_v20 = vpop.f32.mrf.mxu3  ;;  %v1137_v31 = vpop.f32.mrf.mxu1  ;;  %v7458_v63 = vld [vmem:[#allocation5 + $0x878] sm:$0xff]  ;;  %v3414_v40 = vpack.c.b16 %v3408_v51, %v3406_v45  ;;  %v3357_v1 = vshrl.u32 %v3131_v50, 16 }
 0x107   :  { %3542 = vmatpush.bf16.msrb.mxu3 %v7437_v38  ;;  %v1354_v11 = vpop.f32.mrf.mxu2  ;;  %v1118_v60 = vpop.f32.mrf.mxu0 }
 0x108   :  { %3301 = vmatpush.bf16.msrb.mxu0 %v7410_v21  ;;  %v1374_v30 = vadd.f32 %v1373_v20, %v1354_v11  ;;  %v1138_v38 = vadd.f32 %v1137_v31, %v1118_v60  ;;  %v7617_v21 = vld [vmem:[#allocation2 + $0x38] sm:$0xff]  ;;  %v3148_v31 = vrot.slane %v8105_v0, 7  ;;  %v6502_v33 = vrot.slane %v3357_v1, 11  ;;  %v7455_v0 = vld [vmem:[#allocation5 + $0x860] sm:$0xff] }
 0x109   :  { %3320 = vmatpush.bf16.msrb.mxu1 %v7418_v49  ;;  %v7466_v11 = vld [vmem:[#allocation5 + $0x8a8] sm:$0xff] }
 0x10a   :  { %3524 = vmatpush.bf16.msrb.mxu2 %v7428_v17  ;;  %v8162_v29 = vadd.f32 %v1374_v30, %v1142_v48  ;;  %v1143_v5 = vadd.f32 %v1138_v38, %v8115_v47  ;;  %v8166_v17 = vshrl.u32 %v8160_v18, 16  ;;  %v3145_v47 = vrot.slane %v7617_v21, 7  ;;  %v7474_v20 = vld [vmem:[#allocation5 + $0x8e8] sm:$0xff]  ;;  %v7473_v38 = vld [vmem:[#allocation5 + $0x8e0] sm:$0xff] }
 0x10b   :  { %3543 = vmatpush.bf16.msrb.mxu3 %v7436_v57  ;;  %v3191_v57 = vpack.c.b16 %v3185_v42, %v3183_v41  ;;  %v7447_v41 = vld [vmem:[#allocation5 + $0x820] sm:$0xff] }
 0x10c   :  { %3302 = vmatpush.bf16.msrb.mxu0 %v7409_v62  ;;  %v8170_v62 = vshll.u32 %v8160_v18, 16  ;;  %v3147_v30 = vrot.slane %v3145_v47, 4 }
 0x10d   :  { %3321 = vmatpush.bf16.msrb.mxu1 %v7417_v14 }
 0x10e   :  { %3525 = vmatpush.bf16.msrb.mxu2 %v7427_v13  ;;  %v1375_v48 = vpop.f32.mrf.mxu3  ;;  %v1578_v53 = vpop.f32.mrf.mxu1  ;;  %v3415_v13 = vpack.c.b16 %v3409_v55, %v3407_v23  ;;  %v3149_v35 = vsel %vm7939_vm4, %v3147_v30, %v3148_v31 }
 0x10f   :  { %3544 = vmatpush.bf16.msrb.mxu3 %v7435_v9  ;;  %v1356_v49 = vpop.f32.mrf.mxu2  ;;  %v1559_v43 = vpop.f32.mrf.mxu0  ;;  %v3368_v9 = vrot.slane %v8166_v17, 7  ;;  %3303 = vmatmul.bf16.vlgmr.msrb.gmra.mxu0 %v3191_v57 }
 0x110   :  { %3707 = vmatpush.bf16.msra.mxu0 %v7450_v58  ;;  %v1376_v2 = vadd.f32 %v1375_v48, %v1356_v49  ;;  %v1579_v14 = vadd.f32 %v1578_v53, %v1559_v43  ;;  %3322 = vmatmul.bf16.vlgmr.msrb.gmra.mxu1 %v3192_v7  ;;  %v7454_v49 = vld [vmem:[#allocation5 + $0x858] sm:$0xff]  ;;  %v3190_v7 = vunpack.c.h.b16 %v3149_v35 }
 0x111   :  { %3726 = vmatpush.bf16.msra.mxu1 %v7458_v63  ;;  %3526 = vmatmul.bf16.vlgmr.msrb.gmra.mxu2 %v3414_v40  ;;  %v8181_v58 = vor.u32 %v8170_v62, %v3368_v9  ;;  %v7465_v63 = vld [vmem:[#allocation5 + $0x8a0] sm:$0xff] }
 0x112   :  { %3948 = vmatpush.bf16.msra.mxu2 %v7468_v25  ;;  %v8172_v6 = vadd.f32 %v1376_v2, %v1143_v5  ;;  %v7456_v25 = vld [vmem:[#allocation5 + $0x868] sm:$0xff]  ;;  %v1588_v60 = vadd.f32 %v1579_v14, %v8130_v16  ;;  %3545 = vmatmul.bf16.vlgmr.msrb.gmra.mxu3 %v3415_v13  ;;  %v3749_v16 = vld [vmem:[#allocation2 + $0x10] sm:$0xff]  ;;  %v3363_v5 = vsel %vm7946_vm5, %v6502_v33, %v7974_v54  ;;  %v3189_v54 = vunpack.c.l.b16 %v3149_v35  ;;  %v7463_v14 = vld [vmem:[#allocation5 + $0x890] sm:$0xff] }
 0x113   :  { %3967 = vmatpush.bf16.msra.mxu3 %v7476_v27  ;;  %v6436_v27 = vrot.slane %v3131_v50, 11  ;;  %v3759_v23 = vshll.u32 %v3749_v16, 16  ;;  %v3410_v40 = vunpack.c.l.b16 %v3363_v5  ;;  %v3411_v2 = vunpack.c.h.b16 %v3363_v5 }
 0x114   :  { %3708 = vmatpush.bf16.msra.mxu0 %v7449_v44  ;;  %v7464_v44 = vld [vmem:[#allocation5 + $0x898] sm:$0xff] }
 0x115   :  { %3727 = vmatpush.bf16.msra.mxu1 %v7457_v61  ;;  %v3146_v24 = vsel %vm7939_vm4, %v6436_v27, %v3145_v47  ;;  %v7472_v61 = vld [vmem:[#allocation5 + $0x8d8] sm:$0xff]  ;;  %v3761_v13 = vrot.slane %v3759_v23, 5  ;;  %v7453_v27 = vld [vmem:[#allocation5 + $0x850] sm:$0xff]  ;;  %v7461_v23 = vld [vmem:[#allocation5 + $0x880] sm:$0xff] }
 0x116   :  { %3949 = vmatpush.bf16.msra.mxu2 %v7467_v52  ;;  %v1804_v46 = vpop.f32.mrf.mxu3  ;;  %v1580_v51 = vpop.f32.mrf.mxu1  ;;  %v3372_v52 = vsel %vm7946_vm5, %v3364_v12, %v8181_v58  ;;  %v3187_v57 = vunpack.c.l.b16 %v3146_v24  ;;  %v3188_v21 = vunpack.c.h.b16 %v3146_v24  ;;  %v7446_v47 = vld [vmem:[#allocation5 + $0x818] sm:$0xff]  ;;  %v7470_v24 = vld [vmem:[#allocation5 + $0x8c8] sm:$0xff] }
 0x117   :  { %3968 = vmatpush.bf16.msra.mxu3 %v7475_v56  ;;  %v1785_v42 = vpop.f32.mrf.mxu2  ;;  %v1561_v45 = vpop.f32.mrf.mxu0  ;;  %v3756_v56 = vshrl.u32 %v3749_v16, 16  ;;  %v3412_v1 = vunpack.c.l.b16 %v3372_v52  ;;  %v3413_v43 = vunpack.c.h.b16 %v3372_v52 }
 0x118   :  { %3709 = vmatpush.bf16.msra.mxu0 %v7448_v3  ;;  %v1805_v10 = vadd.f32 %v1804_v46, %v1785_v42  ;;  %v1581_v55 = vadd.f32 %v1580_v51, %v1561_v45  ;;  %v3771_v3 = vrot.slane %v8134_v32, 4  ;;  %v3193_v31 = vpack.c.b16 %v3189_v54, %v3187_v57  ;;  %v7462_v46 = vld [vmem:[#allocation5 + $0x888] sm:$0xff]  ;;  %v7443_v57 = vld [vmem:[#allocation5 + $0x800] sm:$0xff] }
 0x119   :  { %3728 = vmatpush.bf16.msra.mxu1 %v7456_v25  ;;  %v3758_v53 = vrot.slane %v3756_v56, 4  ;;  %v7445_v25 = vld [vmem:[#allocation5 + $0x810] sm:$0xff]  ;;  %v3194_v33 = vpack.c.b16 %v3190_v7, %v3188_v21  ;;  %v3416_v16 = vpack.c.b16 %v3412_v1, %v3410_v40  ;;  %v7444_v45 = vld [vmem:[#allocation5 + $0x808] sm:$0xff]  ;;  %v7451_v54 = vld [vmem:[#allocation5 + $0x840] sm:$0xff] }
 0x11a   :  { %3950 = vmatpush.bf16.msra.mxu2 %v7466_v11  ;;  %v8193_v50 = vadd.f32 %v1805_v10, %v1588_v60  ;;  %v1589_v48 = vadd.f32 %v1581_v55, %v8141_v28  ;;  %v7471_v11 = vld [vmem:[#allocation5 + $0x8d0] sm:$0xff]  ;;  %v7452_v51 = vld [vmem:[#allocation5 + $0x848] sm:$0xff]  ;;  %v7469_v55 = vld [vmem:[#allocation5 + $0x8c0] sm:$0xff] }
 0x11b   :  { %3969 = vmatpush.bf16.msra.mxu3 %v7474_v20  ;;  %v3767_v20 = vrot.slane %v8139_v39, 5  ;;  %v8198_v28 = vld [vmem:[#allocation2 + $0x20] sm:$0x11]  ;;  %v3752_v21 = vld [vmem:[#allocation2 + $0x38] sm:$0xff] }
 0x11c   :  { %3710 = vmatpush.bf16.msra.mxu0 %v7447_v41  ;;  %v3417_v41 = vpack.c.b16 %v3413_v43, %v3411_v2  ;;  %v3775_v5 = vshll.u32 %v8198_v28, 16  ;;  %v7484_v43 = vld [vmem:[#allocation5 + $0x938] sm:$0xff] }
 0x11d   :  { %3729 = vmatpush.bf16.msra.mxu1 %v7455_v0  ;;  %v3762_v0 = vor.u32 %v3761_v13, %v3758_v53  ;;  %v3772_v35 = vor.u32 %v3771_v3, %v3767_v20  ;;  %v7492_v53 = vld [vmem:[#allocation5 + $0x978] sm:$0xff]  ;;  %v3783_v3 = vshll.u32 %v3752_v21, 16 }
 0x11e   :  { %3951 = vmatpush.bf16.msra.mxu2 %v7465_v63  ;;  %v1806_v60 = vpop.f32.mrf.mxu3 }
 0x11f   :  { %3970 = vmatpush.bf16.msra.mxu3 %v7473_v38  ;;  %v1787_v30 = vpop.f32.mrf.mxu2  ;;  %v1564_v63 = vpop.f32.mrf.mxu0  ;;  %3308 = vmatmul.bf16.gmra.mxu0 %v3193_v31  ;;  %v3763_v56 = vrot.slane %v3762_v0, 4  ;;  %v7327_v31 = vld [vmem:[#allocation2 + $0x14] sm:$0xf]  ;;  %v7483_v0 = vld [vmem:[#allocation5 + $0x930] sm:$0xff] }
 0x120   :  { %3711 = vmatpush.bf16.msra.mxu0 %v7446_v47  ;;  %v1807_v12 = vadd.f32 %v1806_v60, %v1787_v30  ;;  %v1583_v38 = vpop.f32.mrf.mxu1  ;;  %3327 = vmatmul.bf16.gmra.mxu1 %v3194_v33  ;;  %v7425_v30 = vld [vmem:[#allocation2 + $0x14] sm:$0xf0]  ;;  %v7507_v33 = vld [vmem:[#allocation5 + $0x9f0] sm:$0xff] }
 0x121   :  { %3730 = vmatpush.bf16.msra.mxu1 %v7454_v49  ;;  %v1584_v42 = vadd.f32 %v1583_v38, %v1564_v63  ;;  %3531 = vmatmul.bf16.gmra.mxu2 %v3416_v16  ;;  %v3768_v2 = vsel %vm7781_vm2, %v3763_v56, %v3767_v20  ;;  %v7499_v20 = vld [vmem:[#allocation5 + $0x9b0] sm:$0xff] }
 0x122   :  { %3952 = vmatpush.bf16.msra.mxu2 %v7464_v44  ;;  %v8201_v10 = vadd.f32 %v1807_v12, %v1589_v48  ;;  %3550 = vmatmul.bf16.gmra.mxu3 %v3417_v41  ;;  %v3773_v44 = vrot.slane %v3772_v35, 4  ;;  %v7500_v48 = vld [vmem:[#allocation5 + $0x9b8] sm:$0xff]  ;;  %v6571_v12 = vld [vmem:[#allocation2 + $0x18] sm:$0xf0]  ;;  %v3836_v63 = vunpack.c.l.b16 %v3768_v2  ;;  %v3837_v16 = vunpack.c.h.b16 %v3768_v2 }
 0x123   :  { %3971 = vmatpush.bf16.msra.mxu3 %v7472_v61  ;;  %v1590_v52 = vadd.f32 %v1584_v42, %v8162_v29  ;;  %v3777_v61 = vrot.slane %v3775_v5, 5  ;;  %v7508_v29 = vld [vmem:[#allocation5 + $0x9f8] sm:$0xff]  ;;  %v7491_v42 = vld [vmem:[#allocation5 + $0x970] sm:$0xff]  ;;  %v3791_v35 = vrot.slane %v8170_v62, 5  ;;  %v6574_v56 = vor.u32 %v7327_v31, %v6571_v12 }
 0x124   :  { %3712 = vmatpush.bf16.msra.mxu0 %v7445_v25  ;;  %v8213_v5 = vld [vmem:[#allocation2 + $0x48] sm:$0x11] }
 0x125   :  { %3731 = vmatpush.bf16.msra.mxu1 %v7453_v27  ;;  %v6569_v27 = vld [vmem:[#allocation2 + $0x10] sm:$0xf] }
 0x126   :  { %3953 = vmatpush.bf16.msra.mxu2 %v7463_v14  ;;  %v1809_v49 = vpop.f32.mrf.mxu3  ;;  %v3778_v14 = vsel %vm7781_vm2, %v3773_v44, %v3777_v61 }
 0x127   :  { %3972 = vmatpush.bf16.msra.mxu3 %v7471_v11  ;;  %v1790_v47 = vpop.f32.mrf.mxu2  ;;  %v1566_v40 = vpop.f32.mrf.mxu0  ;;  %v3780_v11 = vshrl.u32 %v3752_v21, 16  ;;  %v3838_v38 = vunpack.c.l.b16 %v3778_v14  ;;  %v3839_v41 = vunpack.c.h.b16 %v3778_v14  ;;  %v7498_v21 = vld [vmem:[#allocation5 + $0x9a8] sm:$0xff] }
 0x128   :  { %3713 = vmatpush.bf16.msra.mxu0 %v7444_v45  ;;  %v1810_v7 = vadd.f32 %v1809_v49, %v1790_v47  ;;  %v1585_v1 = vpop.f32.mrf.mxu1  ;;  %v7506_v47 = vld [vmem:[#allocation5 + $0x9e8] sm:$0xff] }
 0x129   :  { %3732 = vmatpush.bf16.msra.mxu1 %v7452_v51  ;;  %v1586_v13 = vadd.f32 %v1585_v1, %v1566_v40  ;;  %v3844_v61 = vpack.c.b16 %v3838_v38, %v3836_v63  ;;  %v7482_v40 = vld [vmem:[#allocation5 + $0x928] sm:$0xff]  ;;  %v8223_v38 = vld [vmem:[#allocation2 + $0x20] sm:$0x33] }
 0x12a   :  { %3954 = vmatpush.bf16.msra.mxu2 %v7462_v46  ;;  %v8208_v25 = vadd.f32 %v1810_v7, %v1590_v52  ;;  %v3782_v46 = vrot.slane %v3780_v11, 4  ;;  %v6570_v52 = vor.u32 %v7425_v30, %v6569_v27  ;;  %v7490_v1 = vld [vmem:[#allocation5 + $0x968] sm:$0xff]  ;;  %v7481_v27 = vld [vmem:[#allocation5 + $0x920] sm:$0xff]  ;;  %v4216_v34 = vshrl.u32 %v8223_v38, 16 }
 0x12b   :  { %3973 = vmatpush.bf16.msra.mxu3 %v7470_v24  ;;  %v1591_v60 = vadd.f32 %v1586_v13, %v8172_v6  ;;  %v3785_v24 = vrot.slane %v3783_v3, 5  ;;  %v3795_v6 = vrot.slane %v8166_v17, 4  ;;  %v7505_v13 = vld [vmem:[#allocation5 + $0x9e0] sm:$0xff] }
 0x12c   :  { %3714 = vmatpush.bf16.msra.mxu0 %v7443_v57  ;;  %v3845_v57 = vpack.c.b16 %v3839_v41, %v3837_v16  ;;  %v7489_v30 = vld [vmem:[#allocation5 + $0x960] sm:$0xff]  ;;  %v6577_v41 = vld [vmem:[#allocation2 + $0x38] sm:$0xf] }
 0x12d   :  { %3733 = vmatpush.bf16.msra.mxu1 %v7451_v54  ;;  %v3786_v49 = vor.u32 %v3785_v24, %v3782_v46 }
 0x12e   :  { %3955 = vmatpush.bf16.msra.mxu2 %v7461_v23  ;;  %v1811_v51 = vpop.f32.mrf.mxu3 }
 0x12f   :  { %3974 = vmatpush.bf16.msra.mxu3 %v7469_v55  ;;  %v1792_v45 = vpop.f32.mrf.mxu2  ;;  %v1970_v55 = vpop.f32.mrf.mxu0  ;;  %3715 = vmatmul.bf16.vlgmr.msra.gmra.mxu0 %v6570_v52  ;;  %v3787_v14 = vrot.slane %v3786_v49, 4  ;;  %v7480_v52 = vld [vmem:[#allocation5 + $0x918] sm:$0xff] }
 0x130   :  { %4157 = vmatpush.bf16.msrb.mxu0 %v7484_v43  ;;  %v1812_v23 = vadd.f32 %v1811_v51, %v1792_v45  ;;  %v1989_v44 = vpop.f32.mrf.mxu1  ;;  %3734 = vmatmul.bf16.vlgmr.msra.gmra.mxu1 %v6574_v56  ;;  %v8219_v43 = vld [vmem:[#allocation2 + $0x10] sm:$0xee]  ;;  %v7504_v45 = vld [vmem:[#allocation5 + $0x9d8] sm:$0xff] }
 0x131   :  { %4176 = vmatpush.bf16.msrb.mxu1 %v7492_v53  ;;  %v1990_v54 = vadd.f32 %v1989_v44, %v1970_v55  ;;  %3956 = vmatmul.bf16.vlgmr.msra.gmra.mxu2 %v3844_v61  ;;  %v7497_v53 = vld [vmem:[#allocation5 + $0x9a0] sm:$0xff]  ;;  %v3792_v46 = vsel %vm7781_vm2, %v3787_v14, %v3791_v35  ;;  %v7488_v56 = vld [vmem:[#allocation5 + $0x958] sm:$0xff]  ;;  %v4210_v44 = vrot.slane %v8134_v32, 5 }
 0x132   :  { %4392 = vmatpush.bf16.msrb.mxu2 %v7500_v48  ;;  %v3796_v48 = vor.u32 %v3795_v6, %v3791_v35  ;;  %v8216_v7 = vadd.f32 %v1812_v23, %v1591_v60  ;;  %3975 = vmatmul.bf16.vlgmr.msra.gmra.mxu3 %v3845_v57  ;;  %v4202_v60 = vshrl.u32 %v8219_v43, 16  ;;  %v7496_v6 = vld [vmem:[#allocation5 + $0x998] sm:$0xff]  ;;  %v6579_v57 = vld [vmem:[#allocation2 + $0x40] sm:$0xf0]  ;;  %v4211_v35 = vrot.slane %v8139_v39, 6 }
 0x133   :  { %4411 = vmatpush.bf16.msrb.mxu3 %v7508_v29  ;;  %v3799_v29 = vshll.u32 %v8213_v5, 16  ;;  %v1999_v2 = vadd.f32 %v1990_v54, %v8193_v50  ;;  %v4205_v50 = vshll.u32 %v8219_v43, 16  ;;  %v4219_v54 = vshll.u32 %v8223_v38, 16 }
 0x134   :  { %4158 = vmatpush.bf16.msrb.mxu0 %v7483_v0  ;;  %v3797_v11 = vrot.slane %v3796_v48, 4  ;;  %v7426_v0 = vld [vmem:[#allocation2 + $0x3c] sm:$0xf0]  ;;  %v4204_v23 = vrot.slane %v4202_v60, 5  ;;  %v3841_v49 = vunpack.c.h.b16 %v3792_v46 }
 0x135   :  { %4177 = vmatpush.bf16.msrb.mxu1 %v7491_v42  ;;  %v3801_v3 = vrot.slane %v3799_v29, 5  ;;  %v7328_v42 = vld [vmem:[#allocation2 + $0x3c] sm:$0xf]  ;;  %v4207_v55 = vrot.slane %v4205_v50, 6  ;;  %v7495_v29 = vld [vmem:[#allocation5 + $0x990] sm:$0xff]  ;;  %v4221_v60 = vrot.slane %v4219_v54, 6 }
 0x136   :  { %4393 = vmatpush.bf16.msrb.mxu2 %v7499_v20  ;;  %v2230_v20 = vpop.f32.mrf.mxu3 }
 0x137   :  { %4412 = vmatpush.bf16.msrb.mxu3 %v7507_v33  ;;  %v2211_v31 = vpop.f32.mrf.mxu2  ;;  %v1972_v12 = vpop.f32.mrf.mxu0  ;;  %v3802_v24 = vsel %vm7781_vm2, %v3797_v11, %v3801_v3  ;;  %v4208_v3 = vor.u32 %v4207_v55, %v4204_v23  ;;  %v8242_v55 = vld [vmem:[#allocation2 + $0x38] sm:$0xee] }
 0x138   :  { %4159 = vmatpush.bf16.msrb.mxu0 %v7482_v40  ;;  %v2231_v33 = vadd.f32 %v2230_v20, %v2211_v31  ;;  %v1991_v63 = vpop.f32.mrf.mxu1  ;;  %v3843_v48 = vunpack.c.h.b16 %v3802_v24  ;;  %v7503_v40 = vld [vmem:[#allocation5 + $0x9d0] sm:$0xff] }
 0x139   :  { %4178 = vmatpush.bf16.msrb.mxu1 %v7490_v1  ;;  %v1992_v16 = vadd.f32 %v1991_v63, %v1972_v12  ;;  %v6578_v1 = vor.u32 %v7426_v0, %v6577_v41  ;;  %v7502_v41 = vld [vmem:[#allocation5 + $0x9c8] sm:$0xff]  ;;  %v6711_v0 = vrot.slane %v8219_v43, 9  ;;  %v7493_v43 = vld [vmem:[#allocation5 + $0x980] sm:$0xff] }
 0x13a   :  { %4394 = vmatpush.bf16.msrb.mxu2 %v7498_v21  ;;  %v8229_v51 = vadd.f32 %v2231_v33, %v1999_v2  ;;  %v3840_v21 = vunpack.c.l.b16 %v3792_v46  ;;  %v6582_v2 = vor.u32 %v7328_v42, %v6579_v57  ;;  %v3847_v12 = vpack.c.b16 %v3843_v48, %v3841_v49  ;;  %v7486_v46 = vld [vmem:[#allocation5 + $0x948] sm:$0xff]  ;;  %v7540_v49 = vld [vmem:[#allocation5 + $0xaf8] sm:$0xff] }
 0x13b   :  { %4413 = vmatpush.bf16.msrb.mxu3 %v7506_v47  ;;  %v2000_v61 = vadd.f32 %v1992_v16, %v8201_v10  ;;  %v3842_v47 = vunpack.c.l.b16 %v3802_v24  ;;  %v7479_v10 = vld [vmem:[#allocation5 + $0x910] sm:$0xff]  ;;  %v7494_v16 = vld [vmem:[#allocation5 + $0x988] sm:$0xff]  ;;  %v4225_v48 = vshrl.u32 %v8242_v55, 16 }
 0x13c   :  { %4160 = vmatpush.bf16.msrb.mxu0 %v7481_v27  ;;  %v4212_v27 = vor.u32 %v4211_v35, %v4210_v44  ;;  %v7501_v44 = vld [vmem:[#allocation5 + $0x9c0] sm:$0xff] }
 0x13d   :  { %4179 = vmatpush.bf16.msrb.mxu1 %v7489_v30  ;;  %v4218_v30 = vrot.slane %v4216_v34, 5  ;;  %v3846_v33 = vpack.c.b16 %v3842_v47, %v3840_v21  ;;  %v7532_v47 = vld [vmem:[#allocation5 + $0xab8] sm:$0xff] }
 0x13e   :  { %4395 = vmatpush.bf16.msrb.mxu2 %v7497_v53  ;;  %v7487_v53 = vld [vmem:[#allocation5 + $0x950] sm:$0xff]  ;;  %v2232_v11 = vpop.f32.mrf.mxu3 }
 0x13f   :  { %4414 = vmatpush.bf16.msrb.mxu3 %v7505_v13  ;;  %v4000_v13 = vrot.slane %v8128_v15, 5  ;;  %v2213_v14 = vpop.f32.mrf.mxu2  ;;  %v1975_v31 = vpop.f32.mrf.mxu0  ;;  %v7478_v15 = vld [vmem:[#allocation5 + $0x908] sm:$0xff]  ;;  %3720 = vmatmul.bf16.gmra.mxu0 %v6578_v1  ;;  %v4222_v23 = vor.u32 %v4221_v60, %v4218_v30  ;;  %v8254_v30 = vld [vmem:[#allocation2 + $0x48] sm:$0x33] }
 0x140   :  { %4161 = vmatpush.bf16.msrb.mxu0 %v7480_v52  ;;  %v2233_v50 = vadd.f32 %v2232_v11, %v2213_v14  ;;  %v1994_v20 = vpop.f32.mrf.mxu1  ;;  %3739 = vmatmul.bf16.gmra.mxu1 %v6582_v2  ;;  %v4209_v52 = vrot.slane %v4208_v3, 4 }
 0x141   :  { %4180 = vmatpush.bf16.msrb.mxu1 %v7488_v56  ;;  %v1995_v63 = vadd.f32 %v1994_v20, %v1975_v31  ;;  %v4002_v24 = vrot.slane %v4000_v13, 4  ;;  %v4214_v56 = vrot.slane %v4212_v27, 4  ;;  %3961 = vmatmul.bf16.gmra.mxu2 %v3846_v33 }
 0x142   :  { %4396 = vmatpush.bf16.msrb.mxu2 %v7496_v6  ;;  %v8238_v42 = vadd.f32 %v2233_v50, %v2000_v61  ;;  %v4003_v6 = vrot.slane %v8198_v28, 5  ;;  %3980 = vmatmul.bf16.gmra.mxu3 %v3847_v12  ;;  %v4001_v61 = vsel %vm7840_vm7, %v6711_v0, %v4000_v13  ;;  %v7477_v28 = vld [vmem:[#allocation5 + $0x900] sm:$0xff]  ;;  %v4213_v54 = vsel %vm7846_vm8, %v4209_v52, %v4212_v27  ;;  %v7524_v13 = vld [vmem:[#allocation5 + $0xa78] sm:$0xff] }
 0x143   :  { %4415 = vmatpush.bf16.msrb.mxu3 %v7504_v45  ;;  %v2001_v45 = vadd.f32 %v1995_v63, %v8208_v25  ;;  %v7485_v25 = vld [vmem:[#allocation5 + $0x940] sm:$0xff]  ;;  %v4223_v21 = vsel %vm7846_vm8, %v4214_v56, %v4222_v23  ;;  %v4046_v3 = vunpack.c.h.b16 %v4001_v61  ;;  %v4280_v50 = vunpack.c.l.b16 %v4213_v54  ;;  %v7531_v63 = vld [vmem:[#allocation5 + $0xab0] sm:$0xff] }
 0x144   :  { %4162 = vmatpush.bf16.msrb.mxu0 %v7479_v10  ;;  %v4004_v57 = vsel %vm7840_vm7, %v4002_v24, %v4003_v6  ;;  %v4045_v10 = vunpack.c.l.b16 %v4001_v61  ;;  %v4282_v31 = vunpack.c.l.b16 %v4223_v21  ;;  %v4281_v20 = vunpack.c.h.b16 %v4213_v54 }
 0x145   :  { %4181 = vmatpush.bf16.msrb.mxu1 %v7487_v53  ;;  %v7516_v53 = vld [vmem:[#allocation5 + $0xa38] sm:$0xff]  ;;  %v4047_v11 = vunpack.c.l.b16 %v4004_v57  ;;  %v4048_v27 = vunpack.c.h.b16 %v4004_v57  ;;  %v4283_v12 = vunpack.c.h.b16 %v4223_v21  ;;  %v4233_v24 = vrot.slane %v8166_v17, 5 }
 0x146   :  { %4397 = vmatpush.bf16.msrb.mxu2 %v7495_v29  ;;  %v2235_v34 = vpop.f32.mrf.mxu3  ;;  %v4228_v29 = vshll.u32 %v8242_v55, 16  ;;  %v4234_v6 = vrot.slane %v8170_v62, 6  ;;  %v4242_v52 = vshll.u32 %v8254_v30, 16  ;;  %v4288_v61 = vpack.c.b16 %v4282_v31, %v4280_v50 }
 0x147   :  { %4416 = vmatpush.bf16.msrb.mxu3 %v7503_v40  ;;  %v2216_v35 = vpop.f32.mrf.mxu2  ;;  %v1977_v1 = vpop.f32.mrf.mxu0  ;;  %v4053_v56 = vpack.c.b16 %v4047_v11, %v4045_v10  ;;  %v4054_v23 = vpack.c.b16 %v4048_v27, %v4046_v3  ;;  %v7514_v10 = vld [vmem:[#allocation5 + $0xa28] sm:$0xff]  ;;  %v7529_v3 = vld [vmem:[#allocation5 + $0xaa0] sm:$0xff] }
 0x148   :  { %4163 = vmatpush.bf16.msrb.mxu0 %v7478_v15  ;;  %v2236_v40 = vadd.f32 %v2235_v34, %v2216_v35  ;;  %v1996_v2 = vpop.f32.mrf.mxu1  ;;  %v4230_v0 = vrot.slane %v4228_v29, 6  ;;  %v7515_v15 = vld [vmem:[#allocation5 + $0xa30] sm:$0xff]  ;;  %v4235_v54 = vor.u32 %v4234_v6, %v4233_v24  ;;  %v6712_v29 = vrot.slane %v8242_v55, 9  ;;  %v7537_v55 = vld [vmem:[#allocation5 + $0xae0] sm:$0xff] }
 0x149   :  { %4182 = vmatpush.bf16.msrb.mxu1 %v7486_v46  ;;  %v1997_v14 = vadd.f32 %v1996_v2, %v1977_v1  ;;  %v7523_v46 = vld [vmem:[#allocation5 + $0xa70] sm:$0xff]  ;;  %v4010_v1 = vrot.slane %v8213_v5, 5 }
 0x14a   :  { %4398 = vmatpush.bf16.msrb.mxu2 %v7494_v16  ;;  %v8256_v60 = vadd.f32 %v2236_v40, %v2001_v45  ;;  %v7539_v16 = vld [vmem:[#allocation5 + $0xaf0] sm:$0xff]  ;;  %v4239_v45 = vshrl.u32 %v8254_v30, 16  ;;  %v4237_v50 = vrot.slane %v4235_v54, 4 }
 0x14b   :  { %4417 = vmatpush.bf16.msrb.mxu3 %v7502_v41  ;;  %v2002_v33 = vadd.f32 %v1997_v14, %v8216_v7  ;;  %v4227_v41 = vrot.slane %v4225_v48, 5  ;;  %v4007_v7 = vrot.slane %v8160_v18, 5  ;;  %v7530_v48 = vld [vmem:[#allocation5 + $0xaa8] sm:$0xff]  ;;  %v8269_v14 = vld [vmem:[#allocation2 + $0x10] sm:$0xcc] }
 0x14c   :  { %4164 = vmatpush.bf16.msrb.mxu0 %v7477_v28  ;;  %v4289_v28 = vpack.c.b16 %v4283_v12, %v4281_v20  ;;  %v4241_v21 = vrot.slane %v4239_v45, 5  ;;  %v7538_v18 = vld [vmem:[#allocation5 + $0xae8] sm:$0xff]  ;;  %v7521_v20 = vld [vmem:[#allocation5 + $0xa60] sm:$0xff]  ;;  %v4647_v12 = vshll.u32 %v8269_v14, 16  ;;  %v8279_v6 = vld [vmem:[#allocation2 + $0x20] sm:$0x77] }
 0x14d   :  { %4183 = vmatpush.bf16.msrb.mxu1 %v7485_v25  ;;  %v4231_v25 = vor.u32 %v4230_v0, %v4227_v41  ;;  %v4009_v40 = vrot.slane %v4007_v7, 4  ;;  %v4008_v5 = vsel %vm7840_vm7, %v6712_v29, %v4007_v7  ;;  %v4661_v26 = vshll.u32 %v8279_v6, 16  ;;  %v7527_v29 = vld [vmem:[#allocation5 + $0xa90] sm:$0xff] }
 0x14e   :  { %4399 = vmatpush.bf16.msrb.mxu2 %v7493_v43 }
 0x14f   :  { %4418 = vmatpush.bf16.msrb.mxu3 %v7501_v44  ;;  %v2218_v43 = vpop.f32.mrf.mxu2  ;;  %v2237_v44 = vpop.f32.mrf.mxu3  ;;  %4165 = vmatmul.bf16.vlgmr.msrb.gmra.mxu0 %v4053_v56  ;;  %v4232_v11 = vrot.slane %v4231_v25, 4  ;;  %v4011_v27 = vsel %vm7840_vm7, %v4009_v40, %v4010_v1  ;;  %v7535_v40 = vld [vmem:[#allocation5 + $0xad0] sm:$0xff] }
 0x150   :  { %4599 = vmatpush.bf16.msra.mxu0 %v7516_v53  ;;  %v2238_v57 = vadd.f32 %v2237_v44, %v2218_v43  ;;  %v2420_v35 = vpop.f32.mrf.mxu0  ;;  %v2439_v34 = vpop.f32.mrf.mxu1  ;;  %v7522_v53 = vld [vmem:[#allocation5 + $0xa68] sm:$0xff]  ;;  %4184 = vmatmul.bf16.vlgmr.msrb.gmra.mxu1 %v4054_v23  ;;  %v4051_v24 = vunpack.c.l.b16 %v4011_v27  ;;  %v4052_v7 = vunpack.c.h.b16 %v4011_v27  ;;  %v7528_v23 = vld [vmem:[#allocation5 + $0xa98] sm:$0xff] }
 0x151   :  { %4618 = vmatpush.bf16.msra.mxu1 %v7524_v13  ;;  %4400 = vmatmul.bf16.vlgmr.msrb.gmra.mxu2 %v4288_v61  ;;  %v4236_v19 = vsel %vm7846_vm8, %v4232_v11, %v4235_v54  ;;  %v7536_v43 = vld [vmem:[#allocation5 + $0xad8] sm:$0xff]  ;;  %v4653_v54 = vrot.slane %v8139_v39, 7 }
 0x152   :  { %4834 = vmatpush.bf16.msra.mxu2 %v7532_v47  ;;  %v4244_v47 = vrot.slane %v4242_v52, 6  ;;  %v8266_v2 = vadd.f32 %v2238_v57, %v2002_v33  ;;  %4419 = vmatmul.bf16.vlgmr.msrb.gmra.mxu3 %v4289_v28  ;;  %v4644_v33 = vshrl.u32 %v8269_v14, 16  ;;  %v4050_v52 = vunpack.c.h.b16 %v4008_v5  ;;  %v7512_v61 = vld [vmem:[#allocation5 + $0xa18] sm:$0xff] }
 0x153   :  { %4853 = vmatpush.bf16.msra.mxu3 %v7540_v49  ;;  %v2440_v49 = vadd.f32 %v2439_v34, %v2420_v35  ;;  %v7520_v28 = vld [vmem:[#allocation5 + $0xa58] sm:$0xff]  ;;  %v4649_v57 = vrot.slane %v4647_v12, 7  ;;  %v4652_v35 = vrot.slane %v8134_v32, 6 }
 0x154   :  { %4600 = vmatpush.bf16.msra.mxu0 %v7515_v15  ;;  %v4245_v31 = vor.u32 %v4244_v47, %v4241_v21  ;;  %v4646_v25 = vrot.slane %v4644_v33, 6  ;;  %v4658_v21 = vshrl.u32 %v8279_v6, 16  ;;  %v4284_v47 = vunpack.c.l.b16 %v4236_v19  ;;  %v7590_v32 = vld [vmem:[#allocation5 + $0xc78] sm:$0xff] }
 0x155   :  { %4619 = vmatpush.bf16.msra.mxu1 %v7523_v46  ;;  %v2449_v13 = vadd.f32 %v2440_v49, %v8229_v51  ;;  %v7513_v51 = vld [vmem:[#allocation5 + $0xa20] sm:$0xff]  ;;  %v4049_v46 = vunpack.c.l.b16 %v4008_v5  ;;  %v4654_v5 = vor.u32 %v4653_v54, %v4652_v35 }
 0x156   :  { %4835 = vmatpush.bf16.msra.mxu2 %v7531_v63  ;;  %v4246_v56 = vsel %vm7846_vm8, %v4237_v50, %v4245_v31  ;;  %v4660_v27 = vrot.slane %v4658_v21, 6  ;;  %v4663_v50 = vrot.slane %v4661_v26, 7  ;;  %v7566_v21 = vld [vmem:[#allocation5 + $0xbb8] sm:$0xff] }
 0x157   :  { %4854 = vmatpush.bf16.msra.mxu3 %v7539_v16  ;;  %v2655_v63 = vpop.f32.mrf.mxu2  ;;  %v2674_v16 = vpop.f32.mrf.mxu3  ;;  %v4286_v49 = vunpack.c.l.b16 %v4246_v56  ;;  %v4055_v1 = vpack.c.b16 %v4051_v24, %v4049_v46  ;;  %v7510_v46 = vld [vmem:[#allocation5 + $0xa08] sm:$0xff]  ;;  %v7574_v26 = vld [vmem:[#allocation5 + $0xbf8] sm:$0xff] }
 0x158   :  { %4601 = vmatpush.bf16.msra.mxu0 %v7514_v10  ;;  %v2675_v41 = vadd.f32 %v2674_v16, %v2655_v63  ;;  %v2422_v0 = vpop.f32.mrf.mxu0  ;;  %v2441_v15 = vpop.f32.mrf.mxu1  ;;  %v4056_v10 = vpack.c.b16 %v4052_v7, %v4050_v52  ;;  %v7526_v16 = vld [vmem:[#allocation5 + $0xa88] sm:$0xff] }
 0x159   :  { %4620 = vmatpush.bf16.msra.mxu1 %v7522_v53  ;;  %v2442_v45 = vadd.f32 %v2441_v15, %v2422_v0  ;;  %v7511_v53 = vld [vmem:[#allocation5 + $0xa10] sm:$0xff]  ;;  %v4290_v33 = vpack.c.b16 %v4286_v49, %v4284_v47  ;;  %v6841_v0 = vrot.slane %v8269_v14, 10  ;;  %v7518_v24 = vld [vmem:[#allocation5 + $0xa48] sm:$0xff]  ;;  %v7525_v14 = vld [vmem:[#allocation5 + $0xa80] sm:$0xff] }
 0x15a   :  { %4836 = vmatpush.bf16.msra.mxu2 %v7530_v48  ;;  %v8283_v44 = vadd.f32 %v2675_v41, %v2449_v13  ;;  %v4285_v48 = vunpack.c.h.b16 %v4236_v19  ;;  %v8290_v13 = vld [vmem:[#allocation2 + $0x18] sm:$0xff] }
 0x15b   :  { %4855 = vmatpush.bf16.msra.mxu3 %v7538_v18  ;;  %v2450_v34 = vadd.f32 %v2442_v45, %v8238_v42  ;;  %v4287_v18 = vunpack.c.h.b16 %v4246_v56  ;;  %v7519_v42 = vld [vmem:[#allocation5 + $0xa50] sm:$0xff]  ;;  %v4442_v39 = vrot.slane %v8290_v13, 6  ;;  %v7534_v41 = vld [vmem:[#allocation5 + $0xac8] sm:$0xff]  ;;  %v4445_v45 = vrot.slane %v8223_v38, 6  ;;  %v7509_v38 = vld [vmem:[#allocation5 + $0xa00] sm:$0xff] }
 0x15c   :  { %4602 = vmatpush.bf16.msra.mxu0 %v7513_v51  ;;  %v4656_v56 = vrot.slane %v4654_v5, 4 }
 0x15d   :  { %4621 = vmatpush.bf16.msra.mxu1 %v7521_v20  ;;  %v4291_v12 = vpack.c.b16 %v4287_v18, %v4285_v48  ;;  %v4444_v19 = vrot.slane %v4442_v39, 4 }
 0x15e   :  { %4837 = vmatpush.bf16.msra.mxu2 %v7529_v3 }
 0x15f   :  { %4856 = vmatpush.bf16.msra.mxu3 %v7537_v55  ;;  %v2657_v11 = vpop.f32.mrf.mxu2  ;;  %v2676_v3 = vpop.f32.mrf.mxu3  ;;  %v4650_v55 = vor.u32 %v4649_v57, %v4646_v25  ;;  %4170 = vmatmul.bf16.gmra.mxu0 %v4055_v1  ;;  %v4446_v25 = vsel %vm7891_vm13, %v4444_v19, %v4445_v45  ;;  %v7548_v1 = vld [vmem:[#allocation5 + $0xb38] sm:$0xff] }
 0x160   :  { %4603 = vmatpush.bf16.msra.mxu0 %v7512_v61  ;;  %v2677_v31 = vadd.f32 %v2676_v3, %v2657_v11  ;;  %v2425_v51 = vpop.f32.mrf.mxu0  ;;  %v2444_v20 = vpop.f32.mrf.mxu1  ;;  %4189 = vmatmul.bf16.gmra.mxu1 %v4056_v10  ;;  %v7533_v61 = vld [vmem:[#allocation5 + $0xac0] sm:$0xff]  ;;  %v7556_v10 = vld [vmem:[#allocation5 + $0xb78] sm:$0xff]  ;;  %v4490_v11 = vunpack.c.h.b16 %v4446_v25 }
 0x161   :  { %4622 = vmatpush.bf16.msra.mxu1 %v7520_v28  ;;  %v2445_v63 = vadd.f32 %v2444_v20, %v2425_v51  ;;  %v4651_v7 = vrot.slane %v4650_v55, 4  ;;  %4405 = vmatmul.bf16.gmra.mxu2 %v4290_v33  ;;  %v4443_v28 = vsel %vm7891_vm13, %v6841_v0, %v4442_v39  ;;  %v8310_v3 = vld [vmem:[#allocation2 + $0x48] sm:$0x77]  ;;  %v7565_v20 = vld [vmem:[#allocation5 + $0xbb0] sm:$0xff]  ;;  %v4675_v0 = vrot.slane %v8166_v17, 6 }
 0x162   :  { %4838 = vmatpush.bf16.msra.mxu2 %v7528_v23  ;;  %v8294_v15 = vadd.f32 %v2677_v31, %v2450_v34  ;;  %v4664_v23 = vor.u32 %v4663_v50, %v4660_v27  ;;  %4424 = vmatmul.bf16.gmra.mxu3 %v4291_v12  ;;  %v4488_v39 = vunpack.c.h.b16 %v4443_v28  ;;  %v7573_v33 = vld [vmem:[#allocation5 + $0xbf0] sm:$0xff]  ;;  %v4684_v19 = vshll.u32 %v8310_v3, 16 }
 0x163   :  { %4857 = vmatpush.bf16.msra.mxu3 %v7536_v43  ;;  %v2451_v52 = vadd.f32 %v2445_v63, %v8256_v60  ;;  %v8298_v43 = vld [vmem:[#allocation2 + $0x38] sm:$0xcc]  ;;  %v7517_v60 = vld [vmem:[#allocation5 + $0xa40] sm:$0xff]  ;;  %v4655_v34 = vsel %vm7898_vm14, %v4651_v7, %v4654_v5 }
 0x164   :  { %4604 = vmatpush.bf16.msra.mxu0 %v7511_v53  ;;  %v4665_v54 = vsel %vm7898_vm14, %v4656_v56, %v4664_v23  ;;  %v4667_v47 = vshrl.u32 %v8298_v43, 16  ;;  %v4670_v49 = vshll.u32 %v8298_v43, 16  ;;  %v4722_v5 = vunpack.c.l.b16 %v4655_v34 }
 0x165   :  { %4623 = vmatpush.bf16.msra.mxu1 %v7519_v42  ;;  %v4489_v42 = vunpack.c.l.b16 %v4446_v25  ;;  %v4724_v27 = vunpack.c.l.b16 %v4665_v54  ;;  %v4723_v50 = vunpack.c.h.b16 %v4655_v34  ;;  %v4725_v51 = vunpack.c.h.b16 %v4665_v54  ;;  %v7564_v54 = vld [vmem:[#allocation5 + $0xba8] sm:$0xff] }
 0x166   :  { %4839 = vmatpush.bf16.msra.mxu2 %v7527_v29  ;;  %v4669_v12 = vrot.slane %v4667_v47, 6  ;;  %v4672_v63 = vrot.slane %v4670_v49, 7  ;;  %v4496_v45 = vpack.c.b16 %v4490_v11, %v4488_v39  ;;  %v7546_v47 = vld [vmem:[#allocation5 + $0xb28] sm:$0xff]  ;;  %v7571_v39 = vld [vmem:[#allocation5 + $0xbe0] sm:$0xff] }
 0x167   :  { %4858 = vmatpush.bf16.msra.mxu3 %v7535_v40  ;;  %v2660_v57 = vpop.f32.mrf.mxu2  ;;  %v2679_v35 = vpop.f32.mrf.mxu3  ;;  %v4487_v40 = vunpack.c.l.b16 %v4443_v28  ;;  %v7554_v49 = vld [vmem:[#allocation5 + $0xb68] sm:$0xff]  ;;  %v7545_v11 = vld [vmem:[#allocation5 + $0xb20] sm:$0xff] }
 0x168   :  { %4605 = vmatpush.bf16.msra.mxu0 %v7510_v46  ;;  %v2680_v48 = vadd.f32 %v2679_v35, %v2660_v57  ;;  %v2427_v18 = vpop.f32.mrf.mxu0  ;;  %v2446_v29 = vpop.f32.mrf.mxu1  ;;  %v4676_v46 = vrot.slane %v8170_v62, 7  ;;  %v4673_v28 = vor.u32 %v4672_v63, %v4669_v12  ;;  %v4686_v35 = vrot.slane %v4684_v19, 7 }
 0x169   :  { %4624 = vmatpush.bf16.msra.mxu1 %v7518_v24  ;;  %v2447_v53 = vadd.f32 %v2446_v29, %v2427_v18  ;;  %v4681_v24 = vshrl.u32 %v8310_v3, 16  ;;  %v4452_v29 = vrot.slane %v8254_v30, 6 }
 0x16a   :  { %4840 = vmatpush.bf16.msra.mxu2 %v7526_v16  ;;  %v8312_v55 = vadd.f32 %v2680_v48, %v2451_v52  ;;  %v7547_v16 = vld [vmem:[#allocation5 + $0xb30] sm:$0xff]  ;;  %v4677_v25 = vor.u32 %v4676_v46, %v4675_v0  ;;  %v6842_v48 = vrot.slane %v8298_v43, 10  ;;  %v7553_v43 = vld [vmem:[#allocation5 + $0xb60] sm:$0xff]  ;;  %v7570_v0 = vld [vmem:[#allocation5 + $0xbd8] sm:$0xff] }
 0x16b   :  { %4859 = vmatpush.bf16.msra.mxu3 %v7534_v41  ;;  %v2452_v31 = vadd.f32 %v2447_v53, %v8266_v2  ;;  %v7555_v41 = vld [vmem:[#allocation5 + $0xb70] sm:$0xff]  ;;  %v4495_v2 = vpack.c.b16 %v4489_v42, %v4487_v40  ;;  %v4683_v57 = vrot.slane %v4681_v24, 6  ;;  %v7563_v42 = vld [vmem:[#allocation5 + $0xba0] sm:$0xff] }
 0x16c   :  { %4606 = vmatpush.bf16.msra.mxu0 %v7509_v38  ;;  %v8319_v52 = vld [vmem:[#allocation2 + $0x40] sm:$0xff] }
 0x16d   :  { %4625 = vmatpush.bf16.msra.mxu1 %v7517_v60  ;;  %v4449_v7 = vrot.slane %v8319_v52, 6  ;;  %v4687_v53 = vor.u32 %v4686_v35, %v4683_v57  ;;  %v7543_v57 = vld [vmem:[#allocation5 + $0xb10] sm:$0xff] }
 0x16e   :  { %4841 = vmatpush.bf16.msra.mxu2 %v7525_v14  ;;  %v4730_v14 = vpack.c.b16 %v4724_v27, %v4722_v5  ;;  %v7551_v35 = vld [vmem:[#allocation5 + $0xb50] sm:$0xff] }
 0x16f   :  { %4860 = vmatpush.bf16.msra.mxu3 %v7533_v61  ;;  %v2662_v56 = vpop.f32.mrf.mxu2  ;;  %v2681_v23 = vpop.f32.mrf.mxu3  ;;  %v4731_v61 = vpack.c.b16 %v4725_v51, %v4723_v50  ;;  %v4451_v18 = vrot.slane %v4449_v7, 4  ;;  %4607 = vmatmul.bf16.vlgmr.msra.gmra.mxu0 %v4495_v2  ;;  %v4450_v30 = vsel %vm7891_vm13, %v6842_v48, %v4449_v7  ;;  %v7552_v7 = vld [vmem:[#allocation5 + $0xb58] sm:$0xff] }
 0x170   :  { %5041 = vmatpush.bf16.msrb.mxu0 %v7548_v1  ;;  %v2682_v38 = vadd.f32 %v2681_v23, %v2662_v56  ;;  %v2862_v60 = vpop.f32.mrf.mxu0  ;;  %v2881_v62 = vpop.f32.mrf.mxu1  ;;  %4626 = vmatmul.bf16.vlgmr.msra.gmra.mxu1 %v4496_v45  ;;  %v4674_v1 = vrot.slane %v4673_v28, 4  ;;  %v4491_v63 = vunpack.c.l.b16 %v4450_v30  ;;  %v4492_v24 = vunpack.c.h.b16 %v4450_v30  ;;  %v7544_v45 = vld [vmem:[#allocation5 + $0xb18] sm:$0xff] }
 0x171   :  { %5060 = vmatpush.bf16.msrb.mxu1 %v7556_v10  ;;  %v2882_v34 = vadd.f32 %v2881_v62, %v2862_v60  ;;  %4842 = vmatmul.bf16.vlgmr.msra.gmra.mxu2 %v4730_v14  ;;  %v4679_v10 = vrot.slane %v4677_v25, 4  ;;  %v5095_v28 = vshrl.u32 %v5083_v37, 16  ;;  %v7569_v60 = vld [vmem:[#allocation5 + $0xbd0] sm:$0xff] }
 0x172   :  { %5264 = vmatpush.bf16.msrb.mxu2 %v7566_v21  ;;  %v7572_v21 = vld [vmem:[#allocation5 + $0xbe8] sm:$0xff]  ;;  %4861 = vmatmul.bf16.vlgmr.msra.gmra.mxu3 %v4731_v61  ;;  %v4678_v50 = vsel %vm7898_vm14, %v4674_v1, %v4677_v25  ;;  %v4876_v61 = vld [vmem:[#allocation2 + $0x10] sm:$0x88]  ;;  %v5098_v1 = vshll.u32 %v5083_v37, 16 }
 0x173   :  { %5283 = vmatpush.bf16.msrb.mxu3 %v7574_v26  ;;  %v8322_v26 = vadd.f32 %v2682_v38, %v2452_v31  ;;  %v2891_v40 = vadd.f32 %v2882_v34, %v8283_v44  ;;  %v4453_v44 = vsel %vm7891_vm13, %v4451_v18, %v4452_v29  ;;  %v4726_v2 = vunpack.c.l.b16 %v4678_v50  ;;  %v7561_v38 = vld [vmem:[#allocation5 + $0xb90] sm:$0xff] }
 0x174   :  { %5042 = vmatpush.bf16.msrb.mxu0 %v7547_v16  ;;  %v4493_v16 = vunpack.c.l.b16 %v4453_v44  ;;  %v4494_v19 = vunpack.c.h.b16 %v4453_v44  ;;  %v4727_v23 = vunpack.c.h.b16 %v4678_v50  ;;  %v5093_v50 = vrot.slane %v3351_v4, 4 }
 0x175   :  { %5061 = vmatpush.bf16.msrb.mxu1 %v7555_v41  ;;  %v7562_v41 = vld [vmem:[#allocation5 + $0xb98] sm:$0xff] }
 0x176   :  { %5265 = vmatpush.bf16.msrb.mxu2 %v7565_v20  ;;  %v4497_v62 = vpack.c.b16 %v4493_v16, %v4491_v63  ;;  %v4498_v25 = vpack.c.b16 %v4494_v19, %v4492_v24 }
 0x177   :  { %5284 = vmatpush.bf16.msrb.mxu3 %v7573_v33  ;;  %v3097_v5 = vpop.f32.mrf.mxu2  ;;  %v3116_v27 = vpop.f32.mrf.mxu3  ;;  %v4688_v33 = vsel %vm7898_vm14, %v4679_v10, %v4687_v53  ;;  %v7560_v53 = vld [vmem:[#allocation5 + $0xb88] sm:$0xff] }
 0x178   :  { %5043 = vmatpush.bf16.msrb.mxu0 %v7546_v47  ;;  %v3117_v31 = vadd.f32 %v3116_v27, %v3097_v5  ;;  %v2864_v51 = vpop.f32.mrf.mxu0  ;;  %v2883_v20 = vpop.f32.mrf.mxu1  ;;  %v4728_v56 = vunpack.c.l.b16 %v4688_v33  ;;  %v4729_v14 = vunpack.c.h.b16 %v4688_v33  ;;  %v4887_v5 = vrot.slane %v8279_v6, 7  ;;  %v7549_v33 = vld [vmem:[#allocation5 + $0xb40] sm:$0xff] }
 0x179   :  { %5062 = vmatpush.bf16.msrb.mxu1 %v7554_v49  ;;  %v2884_v12 = vadd.f32 %v2883_v20, %v2864_v51  ;;  %v5086_v49 = vshrl.u32 %v4876_v61, 16  ;;  %v7559_v51 = vld [vmem:[#allocation5 + $0xb80] sm:$0xff] }
 0x17a   :  { %5266 = vmatpush.bf16.msrb.mxu2 %v7564_v54  ;;  %v8335_v46 = vadd.f32 %v3117_v31, %v2891_v40  ;;  %v4733_v47 = vpack.c.b16 %v4729_v14, %v4727_v23  ;;  %v5097_v40 = vrot.slane %v5095_v28, 7  ;;  %v7567_v20 = vld [vmem:[#allocation5 + $0xbc0] sm:$0xff]  ;;  %v5084_v23 = vld [vmem:[#allocation2 + $0x48] sm:$0xff] }
 0x17b   :  { %5285 = vmatpush.bf16.msrb.mxu3 %v7572_v21  ;;  %v2892_v36 = vadd.f32 %v2884_v12, %v8294_v15  ;;  %v4732_v21 = vpack.c.b16 %v4728_v56, %v4726_v2  ;;  %v4884_v15 = vrot.slane %v8290_v13, 7  ;;  %v6971_v13 = vrot.slane %v4876_v61, 11 }
 0x17c   :  { %5044 = vmatpush.bf16.msrb.mxu0 %v7545_v11  ;;  %v7542_v11 = vld [vmem:[#allocation5 + $0xb08] sm:$0xff]  ;;  %v7037_v27 = vrot.slane %v5086_v49, 11  ;;  %v5100_v31 = vor.u32 %v5098_v1, %v5097_v40 }
 0x17d   :  { %5063 = vmatpush.bf16.msrb.mxu1 %v7553_v43  ;;  %v7550_v43 = vld [vmem:[#allocation5 + $0xb48] sm:$0xff]  ;;  %v4886_v44 = vrot.slane %v4884_v15, 4  ;;  %v4885_v6 = vsel %vm7939_vm4, %v6971_v13, %v4884_v15 }
 0x17e   :  { %5267 = vmatpush.bf16.msrb.mxu2 %v7563_v42  ;;  %v7568_v42 = vld [vmem:[#allocation5 + $0xbc8] sm:$0xff]  ;;  %v5092_v24 = vsel %vm7946_vm5, %v7037_v27, %v8149_v8  ;;  %v5101_v19 = vsel %vm7946_vm5, %v5093_v50, %v5100_v31  ;;  %v4930_v56 = vunpack.c.h.b16 %v4885_v6  ;;  %v7581_v8 = vld [vmem:[#allocation5 + $0xc30] sm:$0xff]  ;;  %v7587_v27 = vld [vmem:[#allocation5 + $0xc60] sm:$0xff]  ;;  %v5110_v31 = vrot.slane %v3368_v9, 4 }
 0x17f   :  { %5286 = vmatpush.bf16.msrb.mxu3 %v7571_v39  ;;  %v3099_v34 = vpop.f32.mrf.mxu2  ;;  %v3118_v54 = vpop.f32.mrf.mxu3  ;;  %4612 = vmatmul.bf16.gmra.mxu0 %v4497_v62  ;;  %v4888_v16 = vsel %vm7939_vm4, %v4886_v44, %v4887_v5  ;;  %v5152_v28 = vunpack.c.l.b16 %v5092_v24  ;;  %v5153_v62 = vunpack.c.h.b16 %v5092_v24  ;;  %v4894_v5 = vrot.slane %v8310_v3, 7 }
 0x180   :  { %5045 = vmatpush.bf16.msrb.mxu0 %v7544_v45  ;;  %v3119_v48 = vadd.f32 %v3118_v54, %v3099_v34  ;;  %v2867_v18 = vpop.f32.mrf.mxu0  ;;  %v2886_v29 = vpop.f32.mrf.mxu1  ;;  %4631 = vmatmul.bf16.gmra.mxu1 %v4498_v25  ;;  %v4932_v61 = vunpack.c.h.b16 %v4888_v16  ;;  %v5155_v25 = vunpack.c.h.b16 %v5101_v19 }
 0x181   :  { %5064 = vmatpush.bf16.msrb.mxu1 %v7552_v7  ;;  %v2887_v10 = vadd.f32 %v2886_v29, %v2867_v18  ;;  %4847 = vmatmul.bf16.gmra.mxu2 %v4732_v21  ;;  %v4929_v7 = vunpack.c.l.b16 %v4885_v6  ;;  %v4891_v29 = vrot.slane %v8319_v52, 7  ;;  %v7579_v52 = vld [vmem:[#allocation5 + $0xc20] sm:$0xff] }
 0x182   :  { %5268 = vmatpush.bf16.msrb.mxu2 %v7562_v41  ;;  %v8339_v39 = vadd.f32 %v3119_v48, %v2892_v36  ;;  %4866 = vmatmul.bf16.gmra.mxu3 %v4733_v47  ;;  %v7582_v41 = vld [vmem:[#allocation5 + $0xc38] sm:$0xff]  ;;  %v4931_v36 = vunpack.c.l.b16 %v4888_v16  ;;  %v4938_v47 = vpack.c.b16 %v4932_v61, %v4930_v56  ;;  %v5161_v18 = vpack.c.b16 %v5155_v25, %v5153_v62  ;;  %v7576_v25 = vld [vmem:[#allocation5 + $0xc08] sm:$0xff] }
 0x183   :  { %5287 = vmatpush.bf16.msrb.mxu3 %v7570_v0  ;;  %v2893_v30 = vadd.f32 %v2887_v10, %v8312_v55  ;;  %v7541_v55 = vld [vmem:[#allocation5 + $0xb00] sm:$0xff]  ;;  %v7580_v10 = vld [vmem:[#allocation5 + $0xc28] sm:$0xff]  ;;  %v4893_v44 = vrot.slane %v4891_v29, 4  ;;  %v7578_v16 = vld [vmem:[#allocation5 + $0xc18] sm:$0xff] }
 0x184   :  { %5046 = vmatpush.bf16.msrb.mxu0 %v7543_v57  ;;  %v4877_v57 = vld [vmem:[#allocation2 + $0x38] sm:$0x88]  ;;  %v4937_v21 = vpack.c.b16 %v4931_v36, %v4929_v7 }
 0x185   :  { %5065 = vmatpush.bf16.msrb.mxu1 %v7551_v35  ;;  %v5112_v35 = vshrl.u32 %v5084_v23, 16  ;;  %v5103_v40 = vshrl.u32 %v4877_v57, 16  ;;  %v6972_v13 = vrot.slane %v4877_v57, 11  ;;  %v4895_v3 = vsel %vm7939_vm4, %v4893_v44, %v4894_v5  ;;  %v7584_v57 = vld [vmem:[#allocation5 + $0xc48] sm:$0xff] }
 0x186   :  { %5269 = vmatpush.bf16.msrb.mxu2 %v7561_v38  ;;  %v5154_v38 = vunpack.c.l.b16 %v5101_v19  ;;  %v4936_v24 = vunpack.c.h.b16 %v4895_v3 }
 0x187   :  { %5288 = vmatpush.bf16.msrb.mxu3 %v7569_v60  ;;  %v3102_v12 = vpop.f32.mrf.mxu2  ;;  %v3121_v63 = vpop.f32.mrf.mxu3  ;;  %v7589_v60 = vld [vmem:[#allocation5 + $0xc70] sm:$0xff]  ;;  %v7038_v50 = vrot.slane %v5103_v40, 11  ;;  %v7105_v40 = vld [vmem:[#allocation2 + $0x18] sm:$0xf] }
 0x188   :  { %5047 = vmatpush.bf16.msrb.mxu0 %v7542_v11  ;;  %v3122_v4 = vadd.f32 %v3121_v63, %v3102_v12  ;;  %v2869_v0 = vpop.f32.mrf.mxu0  ;;  %v2888_v37 = vpop.f32.mrf.mxu1  ;;  %v5160_v15 = vpack.c.b16 %v5154_v38, %v5152_v28  ;;  %v5115_v11 = vshll.u32 %v5084_v23, 16 }
 0x189   :  { %5066 = vmatpush.bf16.msrb.mxu1 %v7550_v43  ;;  %v2889_v2 = vadd.f32 %v2888_v37, %v2869_v0  ;;  %v5109_v17 = vsel %vm7946_vm5, %v7038_v50, %v8181_v58  ;;  %v4935_v0 = vunpack.c.l.b16 %v4895_v3  ;;  %v7585_v58 = vld [vmem:[#allocation5 + $0xc50] sm:$0xff] }
 0x18a   :  { %5270 = vmatpush.bf16.msrb.mxu2 %v7560_v53  ;;  %v8354_v45 = vadd.f32 %v3122_v4, %v2893_v30  ;;  %v7588_v53 = vld [vmem:[#allocation5 + $0xc68] sm:$0xff]  ;;  %v5156_v19 = vunpack.c.l.b16 %v5109_v17  ;;  %v5157_v7 = vunpack.c.h.b16 %v5109_v17 }
 0x18b   :  { %5289 = vmatpush.bf16.msrb.mxu3 %v7568_v42  ;;  %v2894_v14 = vadd.f32 %v2889_v2, %v8322_v26  ;;  %v5114_v42 = vrot.slane %v5112_v35, 7 }
 0x18c   :  { %5048 = vmatpush.bf16.msrb.mxu0 %v7541_v55  ;;  %v4892_v55 = vsel %vm7939_vm4, %v6972_v13, %v4891_v29  ;;  %v7115_v13 = vld [vmem:[#allocation2 + $0x48] sm:$0xf0] }
 0x18d   :  { %5067 = vmatpush.bf16.msrb.mxu1 %v7549_v33  ;;  %v4933_v4 = vunpack.c.l.b16 %v4892_v55  ;;  %v4934_v37 = vunpack.c.h.b16 %v4892_v55 }
 0x18e   :  { %5271 = vmatpush.bf16.msrb.mxu2 %v7559_v51  ;;  %v5117_v51 = vor.u32 %v5115_v11, %v5114_v42  ;;  %v7107_v42 = vld [vmem:[#allocation2 + $0x20] sm:$0xf0]  ;;  %v7558_v11 = vld [vmem:[#allocation2 + $0x44] sm:$0xf0] }
 0x18f   :  { %5290 = vmatpush.bf16.msrb.mxu3 %v7567_v20  ;;  %v3104_v34 = vpop.f32.mrf.mxu2  ;;  %v3123_v54 = vpop.f32.mrf.mxu3  ;;  %5049 = vmatmul.bf16.vlgmr.msrb.gmra.mxu0 %v4937_v21  ;;  %v4940_v61 = vpack.c.b16 %v4936_v24, %v4934_v37  ;;  %v7583_v21 = vld [vmem:[#allocation5 + $0xc40] sm:$0xff] }
 0x190   :  { %5453 = vmatpush.bf16.msra.mxu0 %v7582_v41  ;;  %v3124_v26 = vadd.f32 %v3123_v54, %v3104_v34  ;;  %v3304_v49 = vpop.f32.mrf.mxu0  ;;  %v3323_v48 = vpop.f32.mrf.mxu1  ;;  %5068 = vmatmul.bf16.vlgmr.msrb.gmra.mxu1 %v4938_v47  ;;  %v5118_v9 = vsel %vm7946_vm5, %v5110_v31, %v5117_v51  ;;  %v7575_v54 = vld [vmem:[#allocation5 + $0xc00] sm:$0xff] }
 0x191   :  { %5472 = vmatpush.bf16.msra.mxu1 %v7590_v32  ;;  %v3324_v1 = vadd.f32 %v3323_v48, %v3304_v49  ;;  %5272 = vmatmul.bf16.vlgmr.msrb.gmra.mxu2 %v5160_v15  ;;  %v5158_v2 = vunpack.c.l.b16 %v5118_v9  ;;  %v5159_v36 = vunpack.c.h.b16 %v5118_v9 }
 0x192   :  { %7591 = vmatpush.bf16.msra.mxu2 %v7582_v41  ;;  %v8358_v43 = vadd.f32 %v3124_v26, %v2894_v14  ;;  %5291 = vmatmul.bf16.vlgmr.msrb.gmra.mxu3 %v5161_v18  ;;  %v7586_v41 = vld [vmem:[#allocation5 + $0xc58] sm:$0xff]  ;;  %v4939_v14 = vpack.c.b16 %v4935_v0, %v4933_v4 }
 0x193   :  { %7599 = vmatpush.bf16.msra.mxu3 %v7590_v32  ;;  %v3333_v30 = vadd.f32 %v3324_v1, %v8335_v46  ;;  %v7557_v1 = vld [vmem:[#allocation2 + $0x1c] sm:$0xf0] }
 0x194   :  { %5454 = vmatpush.bf16.msra.mxu0 %v7581_v8 }
 0x195   :  { %5473 = vmatpush.bf16.msra.mxu1 %v7589_v60 }
 0x196   :  { %7592 = vmatpush.bf16.msra.mxu2 %v7581_v8  ;;  %v5162_v8 = vpack.c.b16 %v5158_v2, %v5156_v19 }
 0x197   :  { %7600 = vmatpush.bf16.msra.mxu3 %v7589_v60  ;;  %v3527_v46 = vpop.f32.mrf.mxu2  ;;  %v3546_v20 = vpop.f32.mrf.mxu3  ;;  %v5163_v60 = vpack.c.b16 %v5159_v36, %v5157_v7 }
 0x198   :  { %5455 = vmatpush.bf16.msra.mxu0 %v7580_v10  ;;  %v3547_v33 = vadd.f32 %v3546_v20, %v3527_v46  ;;  %v3306_v12 = vpop.f32.mrf.mxu0  ;;  %v3325_v63 = vpop.f32.mrf.mxu1 }
 0x199   :  { %5474 = vmatpush.bf16.msra.mxu1 %v7588_v53  ;;  %v3326_v6 = vadd.f32 %v3325_v63, %v3306_v12 }
 0x19a   :  { %7593 = vmatpush.bf16.msra.mxu2 %v7580_v10  ;;  %v8373_v32 = vadd.f32 %v3547_v33, %v3333_v30  ;;  %v7113_v10 = vld [vmem:[#allocation2 + $0x40] sm:$0xf]  ;;  %v7460_v30 = vld [vmem:[#allocation2 + $0x44] sm:$0xf] }
 0x19b   :  { %7601 = vmatpush.bf16.msra.mxu3 %v7588_v53  ;;  %v3334_v22 = vadd.f32 %v3326_v6, %v8339_v39  ;;  %v7459_v53 = vld [vmem:[#allocation2 + $0x1c] sm:$0xf]  ;;  %v7114_v46 = vor.u32 %v7558_v11, %v7113_v10  ;;  %v7118_v20 = vor.u32 %v7460_v30, %v7115_v13 }
 0x19c   :  { %5456 = vmatpush.bf16.msra.mxu0 %v7579_v52 }
 0x19d   :  { %5475 = vmatpush.bf16.msra.mxu1 %v7587_v27 }
 0x19e   :  { %7594 = vmatpush.bf16.msra.mxu2 %v7579_v52  ;;  %v7106_v52 = vor.u32 %v7557_v1, %v7105_v40 }
 0x19f   :  { %7602 = vmatpush.bf16.msra.mxu3 %v7587_v27  ;;  %v3529_v56 = vpop.f32.mrf.mxu2  ;;  %v3548_v23 = vpop.f32.mrf.mxu3  ;;  %5054 = vmatmul.bf16.gmra.mxu0 %v4939_v14  ;;  %v7110_v27 = vor.u32 %v7459_v53, %v7107_v42 }
 0x1a0   :  { %5457 = vmatpush.bf16.msra.mxu0 %v7578_v16  ;;  %v3549_v28 = vadd.f32 %v3548_v23, %v3529_v56  ;;  %v3309_v38 = vpop.f32.mrf.mxu0  ;;  %v3328_v39 = vpop.f32.mrf.mxu1  ;;  %5073 = vmatmul.bf16.gmra.mxu1 %v4940_v61 }
 0x1a1   :  { %5476 = vmatpush.bf16.msra.mxu1 %v7586_v41  ;;  %v3329_v62 = vadd.f32 %v3328_v39, %v3309_v38  ;;  %5277 = vmatmul.bf16.gmra.mxu2 %v5162_v8 }
 0x1a2   :  { %7595 = vmatpush.bf16.msra.mxu2 %v7578_v16  ;;  %v3557_v35 = vadd.f32 %v3549_v28, %v3334_v22  ;;  %5296 = vmatmul.bf16.gmra.mxu3 %v5163_v60 }
 0x1a3   :  { %7603 = vmatpush.bf16.msra.mxu3 %v7586_v41  ;;  %v3335_v34 = vadd.f32 %v3329_v62, %v8354_v45 }
 0x1a4   :  { %5458 = vmatpush.bf16.msra.mxu0 %v7577_v59 }
 0x1a5   :  { %5477 = vmatpush.bf16.msra.mxu1 %v7585_v58 }
 0x1a6   :  { %7596 = vmatpush.bf16.msra.mxu2 %v7577_v59 }
 0x1a7   :  { %7604 = vmatpush.bf16.msra.mxu3 %v7585_v58  ;;  %v3532_v47 = vpop.f32.mrf.mxu2  ;;  %v3551_v15 = vpop.f32.mrf.mxu3 }
 0x1a8   :  { %5459 = vmatpush.bf16.msra.mxu0 %v7576_v25  ;;  %v3552_v26 = vadd.f32 %v3551_v15, %v3532_v47  ;;  %v3311_v49 = vpop.f32.mrf.mxu0  ;;  %v3330_v48 = vpop.f32.mrf.mxu1 }
 0x1a9   :  { %5478 = vmatpush.bf16.msra.mxu1 %v7584_v57  ;;  %v3331_v18 = vadd.f32 %v3330_v48, %v3311_v49 }
 0x1aa   :  { %7597 = vmatpush.bf16.msra.mxu2 %v7576_v25  ;;  %v3558_v29 = vadd.f32 %v3552_v26, %v3335_v34 }
 0x1ab   :  { %7605 = vmatpush.bf16.msra.mxu3 %v7584_v57  ;;  %v3336_v45 = vadd.f32 %v3331_v18, %v8358_v43 }
 0x1ac   :  { %5460 = vmatpush.bf16.msra.mxu0 %v7575_v54 }
 0x1ad   :  { %5479 = vmatpush.bf16.msra.mxu1 %v7583_v21 }
 0x1ae   :  { %7598 = vmatpush.bf16.msra.mxu2 %v7575_v54 }
 0x1af   :  { %7606 = vmatpush.bf16.msra.mxu3 %v7583_v21  ;;  %v3534_v44 = vpop.f32.mrf.mxu2  ;;  %v3553_v5 = vpop.f32.mrf.mxu3  ;;  %5461 = vmatmul.bf16.vlgmr.msra.gmra.mxu0 %v7106_v52 }
 0x1b0   :  { %v3554_v50 = vadd.f32 %v3553_v5, %v3534_v44  ;;  %v3716_v31 = vpop.f32.mrf.mxu0  ;;  %v3735_v51 = vpop.f32.mrf.mxu1  ;;  %5480 = vmatmul.bf16.vlgmr.msra.gmra.mxu1 %v7110_v27 }
 0x1b1   :  { %v3736_v55 = vadd.f32 %v3735_v51, %v3716_v31  ;;  %5466 = vmatmul.bf16.vlgmr.msra.gmra.mxu2 %v7114_v46 }
 0x1b2   :  { %v3559_v33 = vadd.f32 %v3554_v50, %v3336_v45  ;;  %5485 = vmatmul.bf16.vlgmr.msra.gmra.mxu3 %v7118_v20 }
 0x1b3   :  { %v3745_v43 = vadd.f32 %v3736_v55, %v8373_v32 }
 0x1b7   :  { %v3957_v12 = vpop.f32.mrf.mxu2  ;;  %v3976_v63 = vpop.f32.mrf.mxu3 }
 0x1b8   :  { %v3977_v3 = vadd.f32 %v3976_v63, %v3957_v12  ;;  %v3718_v6 = vpop.f32.mrf.mxu0  ;;  %v3737_v17 = vpop.f32.mrf.mxu1 }
 0x1b9   :  { %v3738_v9 = vadd.f32 %v3737_v17, %v3718_v6 }
 0x1ba   :  { %v3986_v16 = vadd.f32 %v3977_v3, %v3745_v43 }
 0x1bb   :  { %v3746_v41 = vadd.f32 %v3738_v9, %v3557_v35 }
 0x1bf   :  { %v3959_v4 = vpop.f32.mrf.mxu2  ;;  %v3978_v22 = vpop.f32.mrf.mxu3 }
 0x1c0   :  { %v3979_v0 = vadd.f32 %v3978_v22, %v3959_v4  ;;  %v3721_v37 = vpop.f32.mrf.mxu0  ;;  %v3740_v24 = vpop.f32.mrf.mxu1 }
 0x1c1   :  { %v3741_v19 = vadd.f32 %v3740_v24, %v3721_v37 }
 0x1c2   :  { %v3987_v2 = vadd.f32 %v3979_v0, %v3746_v41 }
 0x1c3   :  { %v3747_v32 = vadd.f32 %v3741_v19, %v3558_v29 }
 0x1c7   :  { %v3962_v7 = vpop.f32.mrf.mxu2  ;;  %v3981_v36 = vpop.f32.mrf.mxu3 }
 0x1c8   :  { %v3982_v59 = vadd.f32 %v3981_v36, %v3962_v7  ;;  %v3723_v58 = vpop.f32.mrf.mxu0  ;;  %v3742_v56 = vpop.f32.mrf.mxu1 }
 0x1c9   :  { %v3743_v23 = vadd.f32 %v3742_v56, %v3723_v58 }
 0x1ca   :  { %v3988_v14 = vadd.f32 %v3982_v59, %v3747_v32 }
 0x1cb   :  { %v3748_v61 = vadd.f32 %v3743_v23, %v3559_v33 }
 0x1cf   :  { %v3964_v28 = vpop.f32.mrf.mxu2  ;;  %v3983_v38 = vpop.f32.mrf.mxu3 }
 0x1d0   :  { %v3984_v39 = vadd.f32 %v3983_v38, %v3964_v28  ;;  %v4166_v8 = vpop.f32.mrf.mxu0  ;;  %v4185_v60 = vpop.f32.mrf.mxu1 }
 0x1d1   :  { %v4186_v62 = vadd.f32 %v4185_v60, %v4166_v8 }
 0x1d2   :  { %v3989_v25 = vadd.f32 %v3984_v39, %v3748_v61 }
 0x1d3   :  { %v4195_v57 = vadd.f32 %v4186_v62, %v3986_v16 }
 0x1d7   :  { %v4401_v35 = vpop.f32.mrf.mxu2  ;;  %v4420_v34 = vpop.f32.mrf.mxu3 }
 0x1d8   :  { %v4421_v54 = vadd.f32 %v4420_v34, %v4401_v35  ;;  %v4168_v21 = vpop.f32.mrf.mxu0  ;;  %v4187_v47 = vpop.f32.mrf.mxu1 }
 0x1d9   :  { %v4188_v15 = vadd.f32 %v4187_v47, %v4168_v21 }
 0x1da   :  { %v4430_v26 = vadd.f32 %v4421_v54, %v4195_v57 }
 0x1db   :  { %v4196_v49 = vadd.f32 %v4188_v15, %v3987_v2 }
 0x1df   :  { %v4403_v48 = vpop.f32.mrf.mxu2  ;;  %v4422_v18 = vpop.f32.mrf.mxu3 }
 0x1e0   :  { %v4423_v29 = vadd.f32 %v4422_v18, %v4403_v48  ;;  %v4171_v45 = vpop.f32.mrf.mxu0  ;;  %v4190_v40 = vpop.f32.mrf.mxu1 }
 0x1e1   :  { %v4191_v1 = vadd.f32 %v4190_v40, %v4171_v45  ;;  %v7615_v40 = vld [vmem:[#allocation7] ss:$0 sm:$0xff] }
 0x1e2   :  { %v8379_v10 = vadd.f32 %v4423_v29, %v4196_v49 }
 0x1e3   :  { %v4197_v53 = vadd.f32 %v4191_v1, %v3988_v14 }
 0x1e7   :  { %v4406_v42 = vpop.f32.mrf.mxu2  ;;  %v4425_v11 = vpop.f32.mrf.mxu3 }
 0x1e8   :  { %v4426_v30 = vadd.f32 %v4425_v11, %v4406_v42  ;;  %v4173_v13 = vpop.f32.mrf.mxu0  ;;  %v4192_v44 = vpop.f32.mrf.mxu1 }
 0x1e9   :  { %v4193_v5 = vadd.f32 %v4192_v44, %v4173_v13 }
 0x1ea   :  { %v4432_v52 = vadd.f32 %v4426_v30, %v4197_v53 }
 0x1eb   :  { %v4198_v27 = vadd.f32 %v4193_v5, %v3989_v25 }
 0x1ef   :  { %v4408_v50 = vpop.f32.mrf.mxu2  ;;  %v4427_v31 = vpop.f32.mrf.mxu3 }
 0x1f0   :  { %v4428_v51 = vadd.f32 %v4427_v31, %v4408_v50  ;;  %v4608_v46 = vpop.f32.mrf.mxu0  ;;  %v4627_v20 = vpop.f32.mrf.mxu1 }
 0x1f1   :  { %v4628_v14 = vadd.f32 %v4627_v20, %v4608_v46 }
 0x1f2   :  { %v8381_v55 = vadd.f32 %v4428_v51, %v4198_v27 }
 0x1f3   :  { %v4637_v60 = vadd.f32 %v4628_v14, %v4430_v26 }
 0x1f7   :  { %v4843_v33 = vpop.f32.mrf.mxu2  ;;  %v4862_v43 = vpop.f32.mrf.mxu3 }
 0x1f8   :  { %v4610_v12 = vpop.f32.mrf.mxu0  ;;  %v4629_v63 = vpop.f32.mrf.mxu1  ;;  %v4863_v8 = vadd.f32 %v4862_v43, %v4843_v33 }
 0x1f9   :  { %v4630_v34 = vadd.f32 %v4629_v63, %v4610_v12 }
 0x1fa   :  { %v4872_v25 = vadd.f32 %v4863_v8, %v4637_v60 }
 0x1fb   :  { %v4638_v42 = vadd.f32 %v4630_v34, %v8379_v10 }
 0x1ff   :  { %v4845_v3 = vpop.f32.mrf.mxu2  ;;  %v4864_v6 = vpop.f32.mrf.mxu3 }
 0x200   :  { %v4613_v17 = vpop.f32.mrf.mxu0  ;;  %v4632_v9 = vpop.f32.mrf.mxu1  ;;  %v4865_v18 = vadd.f32 %v4864_v6, %v4845_v3 }
 0x201   :  { %v4633_v35 = vadd.f32 %v4632_v9, %v4613_v17 }
 0x202   :  { %v4873_v44 = vadd.f32 %v4865_v18, %v4638_v42 }
 0x203   :  { %v4639_v1 = vadd.f32 %v4633_v35, %v4432_v52 }
 0x207   :  { %v4848_v16 = vpop.f32.mrf.mxu2  ;;  %v4867_v41 = vpop.f32.mrf.mxu3 }
 0x208   :  { %v4615_v4 = vpop.f32.mrf.mxu0  ;;  %v4634_v22 = vpop.f32.mrf.mxu1  ;;  %v4868_v15 = vadd.f32 %v4867_v41, %v4848_v16 }
 0x209   :  { %v4635_v50 = vadd.f32 %v4634_v22, %v4615_v4 }
 0x20a   :  { %v4874_v30 = vadd.f32 %v4868_v15, %v4639_v1 }
 0x20b   :  { %v4640_v6 = vadd.f32 %v4635_v50, %v8381_v55 }
 0x20f   :  { %v4850_v0 = vpop.f32.mrf.mxu2  ;;  %v4869_v37 = vpop.f32.mrf.mxu3 }
 0x210   :  { %v5050_v24 = vpop.f32.mrf.mxu0  ;;  %v5069_v19 = vpop.f32.mrf.mxu1  ;;  %v4870_v33 = vadd.f32 %v4869_v37, %v4850_v0 }
 0x211   :  { %v5070_v62 = vadd.f32 %v5069_v19, %v5050_v24 }
 0x212   :  { %v4875_v41 = vadd.f32 %v4870_v33, %v4640_v6 }
 0x213   :  { %v5079_v54 = vadd.f32 %v5070_v62, %v4872_v25 }
 0x217   :  { %v5273_v2 = vpop.f32.mrf.mxu2  ;;  %v5292_v32 = vpop.f32.mrf.mxu3 }
 0x218   :  { %v5052_v7 = vpop.f32.mrf.mxu0  ;;  %v5071_v36 = vpop.f32.mrf.mxu1  ;;  %v5293_v57 = vadd.f32 %v5292_v32, %v5273_v2 }
 0x219   :  { %v5072_v26 = vadd.f32 %v5071_v36, %v5052_v7 }
 0x21a   :  { %v5302_v29 = vadd.f32 %v5293_v57, %v5079_v54 }
 0x21b   :  { %v5080_v51 = vadd.f32 %v5072_v26, %v4873_v44 }
 0x21f   :  { %v5275_v59 = vpop.f32.mrf.mxu2  ;;  %v5294_v58 = vpop.f32.mrf.mxu3 }
 0x220   :  { %v5055_v56 = vpop.f32.mrf.mxu0  ;;  %v5074_v23 = vpop.f32.mrf.mxu1  ;;  %v5295_v5 = vadd.f32 %v5294_v58, %v5275_v59 }
 0x221   :  { %v5075_v53 = vadd.f32 %v5074_v23, %v5055_v56 }
 0x222   :  { %v5303_v3 = vadd.f32 %v5295_v5, %v5080_v51 }
 0x223   :  { %v5081_v31 = vadd.f32 %v5075_v53, %v4874_v30 }
 0x227   :  { %v5278_v61 = vpop.f32.mrf.mxu2  ;;  %v5297_v28 = vpop.f32.mrf.mxu3 }
 0x228   :  { %v5057_v38 = vpop.f32.mrf.mxu0  ;;  %v5076_v39 = vpop.f32.mrf.mxu1  ;;  %v5298_v13 = vadd.f32 %v5297_v28, %v5278_v61 }
 0x229   :  { %v5077_v17 = vadd.f32 %v5076_v39, %v5057_v38 }
 0x22a   :  { %v5304_v43 = vadd.f32 %v5298_v13, %v5081_v31 }
 0x22b   :  { %v5082_v19 = vadd.f32 %v5077_v17, %v4875_v41 }
 0x22f   :  { %v5280_v21 = vpop.f32.mrf.mxu2  ;;  %v5299_v47 = vpop.f32.mrf.mxu3 }
 0x230   :  { %v5462_v49 = vpop.f32.mrf.mxu0  ;;  %v5481_v48 = vpop.f32.mrf.mxu1  ;;  %v5300_v24 = vadd.f32 %v5299_v47, %v5280_v21 }
 0x231   :  { %v5482_v45 = vadd.f32 %v5481_v48, %v5462_v49 }
 0x232   :  { %v5305_v37 = vadd.f32 %v5300_v24, %v5082_v19 }
 0x233   :  { %v5491_v11 = vadd.f32 %v5482_v45, %v5302_v29 }
 0x235   :  { %v5499_v27 = vadd.f32 %v7615_v40, %v5491_v11 }
 0x237   :  { %5503 = vst [vmem:[#allocation8] sm:$0xff] %v5499_v27  ;;  %v5467_v46 = vpop.f32.mrf.mxu2  ;;  %v5486_v20 = vpop.f32.mrf.mxu3 }
 0x238   :  { %v5487_v12 = vadd.f32 %v5486_v20, %v5467_v46  ;;  %v5464_v52 = vpop.f32.mrf.mxu0  ;;  %v5483_v63 = vpop.f32.mrf.mxu1 }
 0x239   :  { %v5484_v10 = vadd.f32 %v5483_v63, %v5464_v52 }
 0x23a   :  { %v5493_v9 = vadd.f32 %v5487_v12, %v5304_v43 }
 0x23b   :  { %v5492_v16 = vadd.f32 %v5484_v10, %v5303_v3 }
 0x23c   :  { %v5501_v4 = vadd.f32 %v7615_v40, %v5493_v9 }
 0x23d   :  { %v5500_v22 = vadd.f32 %v7615_v40, %v5492_v16 }
 0x23e   :  { %5505 = vst [vmem:[#allocation8 + $0x10] sm:$0xff] %v5501_v4 }
 0x23f   :  { %5504 = vst [vmem:[#allocation8 + $0x8] sm:$0xff] %v5500_v22  ;;  %v5469_v2 = vpop.f32.mrf.mxu2  ;;  %v5488_v0 = vpop.f32.mrf.mxu3 }
 0x240   :  { %v5489_v32 = vadd.f32 %v5488_v0, %v5469_v2 }
 0x242   :  { %v5494_v55 = vadd.f32 %v5489_v32, %v5305_v37 }
 0x244   :  { %v5502_v7 = vadd.f32 %v7615_v40, %v5494_v55 }
 0x246   :  { %5506 = vst [vmem:[#allocation8 + $0x18] sm:$0xff] %v5502_v7 }
 0x247   :  { %5519 = dma.vmem_to_hbm [thread:$0]  %s5512_s29, 512, %s5514_s5, [#allocation4], %s7726_s24, %s7726_s24, %s7727_s25  }
 0x248   :  { %7720 = dma.done.wait [#allocation4], 512  }
 0x249   :  { %7721 = vsyncadd [#allocation4], 4294966784 }
 0x24a   :  { %5524 = vsyncpa [#allocation3], 1 }
 0x24b   :  { %5525 = vsyncpa [#allocation6], 1 }
 0x24c   :  { %5526 = vsyncpa [#allocation4], 1 }

</bundles_post_ra>
